<compile_context>
chip_gen: v7x
topology: tpu7x:2x2x1
jax: 0.10.0
libtpu: 0.0.40
codegen_flags: <defaults>
</compile_context>

<pallas_src>
import jax
import jax.numpy as jnp
import numpy as np
from jax import lax
from jax.experimental import pallas as pl
from jax.experimental.pallas import tpu as pltpu


# ----------------------------- Pallas kernel ----------------------------- #

def _make_kernel(n_pre, n_post, hidden_pad, chunk_t, batch_pad):
  """Kernel closed over static layer counts / padded geometry."""
  Hp = hidden_pad
  Tc = chunk_t
  Bp = batch_pad
  n_in = 2 + 2 * n_pre + 7 + 2 * n_post + 2

  def kernel(*args):
    refs = args[:n_in]
    out_ref = args[n_in]
    h12_scr, gi0_scr = args[n_in + 1], args[n_in + 2]

    x_ref, len_ref = refs[0], refs[1]
    idx = 2
    pre = [(refs[idx + 2 * i], refs[idx + 2 * i + 1]) for i in range(n_pre)]
    idx += 2 * n_pre
    wi0, whh, bi0, bh0n, wi1, bi1, bh1n = refs[idx:idx + 7]
    idx += 7
    post = [(refs[idx + 2 * i], refs[idx + 2 * i + 1]) for i in range(n_post)]
    idx += 2 * n_post
    w_out, b_out = refs[idx], refs[idx + 1]

    c = pl.program_id(0)

    @pl.when(c == 0)
    def _():
      h12_scr[...] = jnp.zeros_like(h12_scr)

    # ---- Phase 1: batched (Tc*Bp rows) pre-linears + layer-0 input projection ----
    h = x_ref[...]                                       # [Tc*Bp, D_in]
    for (w_ref, b_ref) in pre:
      h = jnp.maximum(
          jnp.dot(h, w_ref[...], preferred_element_type=jnp.float32) + b_ref[...],
          0.0)                                           # ReLU; dropout == identity
    # gi0 = x @ Wi0_pad + (b_i with b_hr/b_hz folded in), gates padded to Hp lanes each.
    gi0_scr[...] = (
        jnp.dot(h, wi0[...], preferred_element_type=jnp.float32) + bi0[...])

    # ---- Phase 2: sequential 2-layer GRU over Tc steps, fused state in registers ----
    lens_b = jnp.broadcast_to(len_ref[...], (Bp, Hp))    # hoisted: [Bp, Hp] int32 lengths
    whh_v = whh[...]                                     # [2Hp, 6Hp] block-diag(Wh0, Wh1)
    wi1_v = wi1[...]                                     # [Hp, 3Hp]
    bi1_b = jnp.broadcast_to(bi1[...], (Bp, 3 * Hp))     # hoisted bias broadcasts
    bh0n_b = jnp.broadcast_to(bh0n[...], (Bp, Hp))
    bh1n_b = jnp.broadcast_to(bh1n[...], (Bp, Hp))
    t0 = c * Tc

    def step(i, h12):
      h1 = h12[:, :Hp]
      h2 = h12[:, Hp:]
      row = pl.multiple_of(i * Bp, 8)                    # Bp is a multiple of 8 -> aligned slice
      gi0_t = gi0_scr[pl.ds(row, Bp), :]                 # [Bp, 3Hp]

      # One MXU matmul gives both layers' hidden projections: gh = [gh1 | gh2].
      gh = jnp.dot(h12, whh_v, preferred_element_type=jnp.float32)   # [Bp, 6Hp]

      # Layer 1 (r/z fused into one sigmoid over the aligned first 2Hp lanes).
      rz1 = jax.nn.sigmoid(gi0_t[:, :2 * Hp] + gh[:, :2 * Hp])
      r1 = rz1[:, :Hp]
      z1 = rz1[:, Hp:]
      n1 = jnp.tanh(gi0_t[:, 2 * Hp:] + r1 * (gh[:, 2 * Hp:3 * Hp] + bh0n_b))
      h1n = (1.0 - z1) * n1 + z1 * h1

      # Layer 2: the only remaining serially-dependent matmul.
      gi1 = jnp.dot(h1n, wi1_v, preferred_element_type=jnp.float32) + bi1_b
      rz2 = jax.nn.sigmoid(gi1[:, :2 * Hp] + gh[:, 3 * Hp:5 * Hp])
      r2 = rz2[:, :Hp]
      z2 = rz2[:, Hp:]
      n2 = jnp.tanh(gi1[:, 2 * Hp:] + r2 * (gh[:, 5 * Hp:] + bh1n_b))
      h2n = (1.0 - z2) * n2 + z2 * h2

      # Packed-sequence freeze: scalar-splat compare against the pre-broadcast lengths
      # (off the serial chain; padded batch rows have length 0 and stay frozen at zero).
      keep = (t0 + i) < lens_b                           # [Bp, Hp] bool
      h1u = jnp.where(keep, h1n, h1)
      h2u = jnp.where(keep, h2n, h2)
      return jnp.concatenate([h1u, h2u], axis=-1)

    unroll = True if Tc <= 32 else 16
    h12_f = lax.fori_loop(0, Tc, step, h12_scr[...], unroll=unroll)
    h12_scr[...] = h12_f                                 # carry state to the next chunk

    # ---- Phase 3 (last chunk): post linears, out linear, log-softmax ----
    # NOTE: out_ref has a constant block index, so the single write here is the only writeback.
    @pl.when(c == pl.num_programs(0) - 1)
    def _():
      hidden = h12_f[:, Hp:]                             # [Bp, Hp]; padded lanes are exactly 0
      for (w_ref, b_ref) in post:
        hidden = jnp.maximum(
            jnp.dot(hidden, w_ref[...], preferred_element_type=jnp.float32) + b_ref[...],
            0.0)
      logits = jnp.dot(hidden, w_out[...], preferred_element_type=jnp.float32) + b_out[...]
      mx = jnp.max(logits, axis=-1, keepdims=True)
      shifted = logits - mx
      lse = jnp.log(jnp.sum(jnp.exp(shifted), axis=-1, keepdims=True))
      out_ref[...] = (shifted - lse).astype(out_ref.dtype)

  return kernel


# ------------------------------- Wrapper --------------------------------- #

def rnn_classifier_forward(features, valid_lengths, params, config, *,
                           max_chunk_t=128, vmem_budget_bytes=10 << 20):
  """features: [B, T, input_dim] float32 (batch-first). valid_lengths: [B] int32.
     Returns log-softmax result [B, class_num]."""
  sr = config['sample_rate']
  if sr > 1:
    features = features[:, ::sr, :]
    valid_lengths = valid_lengths // sr

  B, T, D_in = features.shape
  H = config['hidden_size']
  C = params['out'][0].shape[1]
  n_pre = len(params['pre'])
  n_post = len(params['post'])

  f32 = jnp.float32
  Hp = ((H + 127) // 128) * 128                 # each gate block padded to full 128-lane vregs
  Bp = ((B + 7) // 8) * 8                       # batch padded to full 8-sublane tiles

  # --- Offline weight layout: gate-padded, biases folded, block-diagonal hidden weight ---
  def pad_gate_cols(w, n_gates):
    out = jnp.zeros((w.shape[0], n_gates * Hp), f32)
    for g in range(n_gates):
      out = out.at[:, g * Hp:g * Hp + H].set(w[:, g * H:(g + 1) * H].astype(f32))
    return out

  def pad_rows(w, rows):
    return jnp.zeros((rows, w.shape[1]), f32).at[:w.shape[0], :].set(w.astype(f32))

  def fold_bias(bi, bh):
    # PyTorch GRU: b_hr/b_hz add linearly -> fold into b_i; b_hn stays inside r*(.)
    return jnp.concatenate([bi[:, :2 * H] + bh[:, :2 * H], bi[:, 2 * H:]], axis=1)

  wi0, wh0, bi0, bh0 = params['gru0']
  wi1, wh1, bi1, bh1 = params['gru1']

  wi0_p = pad_gate_cols(wi0, 3)                              # [D_pre, 3Hp]
  bi0_p = pad_gate_cols(fold_bias(bi0, bh0), 3)              # [1, 3Hp]
  bh0n_p = pad_gate_cols(bh0[:, 2 * H:], 1)                  # [1, Hp]

  wi1_p = pad_rows(pad_gate_cols(wi1, 3), Hp)                # [Hp, 3Hp]
  bi1_p = pad_gate_cols(fold_bias(bi1, bh1), 3)              # [1, 3Hp]
  bh1n_p = pad_gate_cols(bh1[:, 2 * H:], 1)                  # [1, Hp]

  whh_p = jnp.zeros((2 * Hp, 6 * Hp), f32)                   # diag(Wh0, Wh1), gate-padded
  whh_p = whh_p.at[:H, :3 * Hp].set(pad_gate_cols(wh0, 3))
  whh_p = whh_p.at[Hp:Hp + H, 3 * Hp:].set(pad_gate_cols(wh1, 3))

  pre_params = [(w.astype(f32), b.astype(f32)) for (w, b) in params['pre']]
  post_params = [(w.astype(f32), b.astype(f32)) for (w, b) in params['post']]
  w_out, b_out = params['out']
  w_out = w_out.astype(f32)
  b_out = b_out.astype(f32)
  # The first consumer of the GRU hidden state sees the lane-padded [Bp, Hp] tensor.
  if n_post > 0:
    post_params[0] = (pad_rows(post_params[0][0], Hp), post_params[0][1])
  else:
    w_out = pad_rows(w_out, Hp)

  flat_params = []
  for (w, b) in pre_params:
    flat_params += [w, b]
  flat_params += [wi0_p, whh_p, bi0_p, bh0n_p, wi1_p, bi1_p, bh1n_p]
  for (w, b) in post_params:
    flat_params += [w, b]
  flat_params += [w_out, b_out]

  # --- Time-chunk size from a conservative VMEM budget (safe on v5e/v6e/v7x scoped limits) ---
  weight_bytes = sum(int(np.prod(p.shape)) * 4 for p in flat_params)
  fixed_bytes = 2 * weight_bytes + 8 * Bp * 2 * Hp * 4       # double-buffered weights + state/misc
  per_tc_bytes = Bp * (2 * D_in + 3 * Hp) * 4                # x chunk (x2 buffers) + gi0 scratch
  tc_cap = max(1, (vmem_budget_bytes - fixed_bytes) // per_tc_bytes)
  Tc = int(max(1, min(T, max_chunk_t, tc_cap)))
  n_chunks = -(-T // Tc)                                     # ceil
  T_pad = n_chunks * Tc

  # layout: time-major, time+batch padded, flattened so each chunk is a lane-dense 2-D slab.
  # Padded batch rows get valid_length = 0 (frozen at zero state); padded timesteps are frozen
  # because valid_lengths <= T.
  x_tm = jnp.transpose(features.astype(f32), (1, 0, 2))      # [T, B, D_in]
  x_tm = jnp.pad(x_tm, ((0, T_pad - T), (0, Bp - B), (0, 0)))
  x2d = x_tm.reshape(T_pad * Bp, D_in)
  lens = jnp.zeros((Bp, 1), jnp.int32).at[:B, 0].set(valid_lengths.astype(jnp.int32))

  in_specs = [
      pl.BlockSpec((Tc * Bp, D_in), lambda c: (c, 0)),       # time chunk of flattened features
      pl.BlockSpec((Bp, 1), lambda c: (0, 0)),               # valid lengths (constant block)
  ]

  def full_spec(arr):
    nd = arr.ndim
    return pl.BlockSpec(arr.shape, lambda c, _nd=nd: (0,) * _nd)

  for p in flat_params:
    in_specs.append(full_spec(p))

  kernel = _make_kernel(n_pre, n_post, Hp, Tc, Bp)

  out = pl.pallas_call(
      kernel,
      out_shape=jax.ShapeDtypeStruct((Bp, C), f32),
      grid=(n_chunks,),
      in_specs=in_specs,
      out_specs=pl.BlockSpec((Bp, C), lambda c: (0, 0)),
      scratch_shapes=[
          pltpu.VMEM((Bp, 2 * Hp), f32),                     # fused [h1|h2] cross-chunk carry
          pltpu.VMEM((Tc * Bp, 3 * Hp), f32),                # precomputed layer-0 projections
      ],
      compiler_params=pltpu.CompilerParams(
          dimension_semantics=("arbitrary",)),               # chunks are sequentially dependent
  )(x2d, lens, *flat_params)
  return out[:B]


# --------------------------- Parameter init ------------------------------ #

def init_params(key, input_dim, class_num, config):
  """Deterministic synthetic init (weights stored pre-transposed: [in, out]; gates r,z,n)."""
  H = config['hidden_size']
  keys = iter(jax.random.split(key, 64))

  def linear(in_dim, out_dim):
    k = 1.0 / np.sqrt(in_dim)
    w = jax.random.uniform(next(keys), (in_dim, out_dim), jnp.float32, -k, k)
    b = jax.random.uniform(next(keys), (1, out_dim), jnp.float32, -k, k)
    return w, b

  def gru_layer(in_dim):
    k = 1.0 / np.sqrt(H)
    wi = jax.random.uniform(next(keys), (in_dim, 3 * H), jnp.float32, -k, k)
    wh = jax.random.uniform(next(keys), (H, 3 * H), jnp.float32, -k, k)
    bi = jax.random.uniform(next(keys), (1, 3 * H), jnp.float32, -k, k)
    bh = jax.random.uniform(next(keys), (1, 3 * H), jnp.float32, -k, k)
    return (wi, wh, bi, bh)

  params = {}
  last = input_dim
  pre = []
  for d in config['pre_linear_dims']:
    pre.append(linear(last, d))
    last = d
  params['pre'] = pre
  params['gru0'] = gru_layer(last)
  params['gru1'] = gru_layer(H)
  last = H
  post = []
  for d in config['post_linear_dims']:
    post.append(linear(last, d))
    last = d
  params['post'] = post
  params['out'] = linear(last, class_num)
  return params


# ----------------------------- JAX reference ------------------------------ #

def reference_forward(features, valid_lengths, params, config):
  sr = config['sample_rate']
  if sr > 1:
    features = features[:, ::sr, :]
    valid_lengths = valid_lengths // sr
  x = features.astype(jnp.float32)
  for (w, b) in params['pre']:
    x = jax.nn.relu(x @ w + b)
  B, T, _ = x.shape
  H = config['hidden_size']
  h1 = jnp.zeros((B, H), jnp.float32)
  h2 = jnp.zeros((B, H), jnp.float32)

  def cell(xt, h, p):
    wi, wh, bi, bh = p
    gi = xt @ wi + bi
    gh = h @ wh + bh
    i_r, i_z, i_n = jnp.split(gi, 3, axis=-1)
    h_r, h_z, h_n = jnp.split(gh, 3, axis=-1)
    r = jax.nn.sigmoid(i_r + h_r)
    z = jax.nn.sigmoid(i_z + h_z)
    n = jnp.tanh(i_n + r * h_n)
    return (1.0 - z) * n + z * h

  for t in range(T):
    m = (t < valid_lengths).astype(jnp.float32)[:, None]
    h1n = cell(x[:, t, :], h1, params['gru0'])
    h2n = cell(h1n, h2, params['gru1'])
    h1 = m * h1n + (1.0 - m) * h1
    h2 = m * h2n + (1.0 - m) * h2

  hidden = h2
  for (w, b) in params['post']:
    hidden = jax.nn.relu(hidden @ w + b)
  logits = hidden @ params['out'][0] + params['out'][1]
  return jax.nn.log_softmax(logits, axis=-1)


# --------------------------------- Main ----------------------------------- #

if __name__ == "__main__":
  config = {
      'drop': 0.0,
      'pre_linear_dims': [32],
      'hidden_size': 32,
      'post_linear_dims': [32],
      'mode': 'classification',
      'sample_rate': 1,
  }
  input_dim, class_num = 32, 4
  B, T = 2, 8

  key = jax.random.PRNGKey(0)
  k_feat, k_param = jax.random.split(key)
  features = jax.random.normal(k_feat, (B, T, input_dim), jnp.float32)
  valid_lengths = jnp.array([8, 5], dtype=jnp.int32)
  params = init_params(k_param, input_dim, class_num, config)

  result = rnn_classifier_forward(features, valid_lengths, params, config)
  result = jax.block_until_ready(result)

  ref = reference_forward(features, valid_lengths, params, config)
  np.testing.assert_allclose(np.asarray(result), np.asarray(ref), rtol=1e-4, atol=1e-5)

  print("KERNEL_OK")
</pallas_src>

<mosaic_0001>
module attributes {stable_mosaic.version = 11 : i64} {
  func.func @kernel(%arg0: i32, %arg1: memref<64x32xf32, #tpu.memory_space<vmem>>, %arg2: memref<8x1xi32, #tpu.memory_space<vmem>>, %arg3: memref<32x32xf32, #tpu.memory_space<vmem>>, %arg4: memref<1x32xf32, #tpu.memory_space<vmem>>, %arg5: memref<32x384xf32, #tpu.memory_space<vmem>>, %arg6: memref<256x768xf32, #tpu.memory_space<vmem>>, %arg7: memref<1x384xf32, #tpu.memory_space<vmem>>, %arg8: memref<1x128xf32, #tpu.memory_space<vmem>>, %arg9: memref<128x384xf32, #tpu.memory_space<vmem>>, %arg10: memref<1x384xf32, #tpu.memory_space<vmem>>, %arg11: memref<1x128xf32, #tpu.memory_space<vmem>>, %arg12: memref<128x32xf32, #tpu.memory_space<vmem>>, %arg13: memref<1x32xf32, #tpu.memory_space<vmem>>, %arg14: memref<32x4xf32, #tpu.memory_space<vmem>>, %arg15: memref<1x4xf32, #tpu.memory_space<vmem>>, %arg16: memref<8x4xf32, #tpu.memory_space<vmem>>, %arg17: memref<8x256xf32, #tpu.memory_space<vmem>>, %arg18: memref<64x384xf32, #tpu.memory_space<vmem>>) attributes {dimension_semantics = [#tpu.dimension_semantics<arbitrary>], iteration_bounds = array<i64: 1>, scalar_prefetch = 0 : i64, scratch_operands = 2 : i64, tpu.core_type = #tpu.core_type<tc>, window_params = [{transform_indices = @transform_0, window_bounds = array<i64: 64, 32>}, {pipeline_mode = #tpu.pipeline_mode<synchronous>, transform_indices = @transform_1, window_bounds = array<i64: 8, 1>}, {pipeline_mode = #tpu.pipeline_mode<synchronous>, transform_indices = @transform_2, window_bounds = array<i64: 32, 32>}, {pipeline_mode = #tpu.pipeline_mode<synchronous>, transform_indices = @transform_3, window_bounds = array<i64: 1, 32>}, {pipeline_mode = #tpu.pipeline_mode<synchronous>, transform_indices = @transform_4, window_bounds = array<i64: 32, 384>}, {pipeline_mode = #tpu.pipeline_mode<synchronous>, transform_indices = @transform_5, window_bounds = array<i64: 256, 768>}, {pipeline_mode = #tpu.pipeline_mode<synchronous>, transform_indices = @transform_6, window_bounds = array<i64: 1, 384>}, {pipeline_mode = #tpu.pipeline_mode<synchronous>, transform_indices = @transform_7, window_bounds = array<i64: 1, 128>}, {pipeline_mode = #tpu.pipeline_mode<synchronous>, transform_indices = @transform_8, window_bounds = array<i64: 128, 384>}, {pipeline_mode = #tpu.pipeline_mode<synchronous>, transform_indices = @transform_9, window_bounds = array<i64: 1, 384>}, {pipeline_mode = #tpu.pipeline_mode<synchronous>, transform_indices = @transform_10, window_bounds = array<i64: 1, 128>}, {pipeline_mode = #tpu.pipeline_mode<synchronous>, transform_indices = @transform_11, window_bounds = array<i64: 128, 32>}, {pipeline_mode = #tpu.pipeline_mode<synchronous>, transform_indices = @transform_12, window_bounds = array<i64: 1, 32>}, {pipeline_mode = #tpu.pipeline_mode<synchronous>, transform_indices = @transform_13, window_bounds = array<i64: 32, 4>}, {pipeline_mode = #tpu.pipeline_mode<synchronous>, transform_indices = @transform_14, window_bounds = array<i64: 1, 4>}, {pipeline_mode = #tpu.pipeline_mode<synchronous>, transform_indices = @transform_15, window_bounds = array<i64: 8, 4>}]} {
    %c0_i32 = arith.constant 0 : i32
    %0 = arith.cmpi eq, %arg0, %c0_i32 : i32
    %1 = arith.extui %0 : i1 to i32
    %c0_i32_0 = arith.constant 0 : i32
    %2 = arith.cmpi ne, %1, %c0_i32_0 : i32
    scf.if %2 {
      %cst_98 = arith.constant 0.000000e+00 : f32
      %493 = vector.broadcast %cst_98 : f32 to vector<8x256xf32>
      %c0_99 = arith.constant 0 : index
      %c0_100 = arith.constant 0 : index
      %494 = vector.load %arg17[%c0_99, %c0_100] : memref<8x256xf32, #tpu.memory_space<vmem>>, vector<8x256xf32>
      tpu.vector_store %arg17[%c0_99, %c0_100], %493 {strides = array<i32>} : memref<8x256xf32, #tpu.memory_space<vmem>>, vector<8x256xf32>,
    } else {
    }
    %c0 = arith.constant 0 : index
    %c0_1 = arith.constant 0 : index
    %3 = vector.load %arg1[%c0, %c0_1] : memref<64x32xf32, #tpu.memory_space<vmem>>, vector<64x32xf32>
    %c0_2 = arith.constant 0 : index
    %c0_3 = arith.constant 0 : index
    %4 = vector.load %arg3[%c0_2, %c0_3] : memref<32x32xf32, #tpu.memory_space<vmem>>, vector<32x32xf32>
    %cst = arith.constant dense<0.000000e+00> : vector<64x32xf32>
    %5 = tpu.matmul %3, %4, %cst {dimension_numbers = #tpu.dot_dimension_numbers<[1], [0], [0], [1], [0, 0, 1, 1], [], []>} : vector<64x32xf32>, vector<32x32xf32>, vector<64x32xf32> -> vector<64x32xf32>
    %c0_4 = arith.constant 0 : index
    %c0_5 = arith.constant 0 : index
    %6 = vector.load %arg4[%c0_4, %c0_5] : memref<1x32xf32, #tpu.memory_space<vmem>>, vector<1x32xf32>
    %7 = vector.broadcast %6 : vector<1x32xf32> to vector<64x32xf32>
    %8 = arith.addf %5, %7 : vector<64x32xf32>
    %cst_6 = arith.constant 0.000000e+00 : f32
    %9 = vector.broadcast %cst_6 : f32 to vector<64x32xf32>
    %10 = arith.maximumf %8, %9 : vector<64x32xf32>
    %c0_7 = arith.constant 0 : index
    %c0_8 = arith.constant 0 : index
    %11 = vector.load %arg5[%c0_7, %c0_8] : memref<32x384xf32, #tpu.memory_space<vmem>>, vector<32x384xf32>
    %cst_9 = arith.constant dense<0.000000e+00> : vector<64x384xf32>
    %12 = tpu.matmul %10, %11, %cst_9 {dimension_numbers = #tpu.dot_dimension_numbers<[1], [0], [0], [1], [0, 0, 1, 1], [], []>} : vector<64x32xf32>, vector<32x384xf32>, vector<64x384xf32> -> vector<64x384xf32>
    %c0_10 = arith.constant 0 : index
    %c0_11 = arith.constant 0 : index
    %13 = vector.load %arg7[%c0_10, %c0_11] : memref<1x384xf32, #tpu.memory_space<vmem>>, vector<1x384xf32>
    %14 = vector.broadcast %13 : vector<1x384xf32> to vector<64x384xf32>
    %15 = arith.addf %12, %14 : vector<64x384xf32>
    %c0_12 = arith.constant 0 : index
    %c0_13 = arith.constant 0 : index
    %16 = vector.load %arg18[%c0_12, %c0_13] : memref<64x384xf32, #tpu.memory_space<vmem>>, vector<64x384xf32>
    tpu.vector_store %arg18[%c0_12, %c0_13], %15 {strides = array<i32>} : memref<64x384xf32, #tpu.memory_space<vmem>>, vector<64x384xf32>,
    %c0_14 = arith.constant 0 : index
    %c0_15 = arith.constant 0 : index
    %17 = vector.load %arg2[%c0_14, %c0_15] : memref<8x1xi32, #tpu.memory_space<vmem>>, vector<8x1xi32>
    %18 = vector.shape_cast %17 : vector<8x1xi32> to vector<8x1xi32>
    %19 = vector.broadcast %18 : vector<8x1xi32> to vector<8x128xi32>
    %c0_16 = arith.constant 0 : index
    %c0_17 = arith.constant 0 : index
    %20 = vector.load %arg6[%c0_16, %c0_17] : memref<256x768xf32, #tpu.memory_space<vmem>>, vector<256x768xf32>
    %c0_18 = arith.constant 0 : index
    %c0_19 = arith.constant 0 : index
    %21 = vector.load %arg9[%c0_18, %c0_19] : memref<128x384xf32, #tpu.memory_space<vmem>>, vector<128x384xf32>
    %c0_20 = arith.constant 0 : index
    %c0_21 = arith.constant 0 : index
    %22 = vector.load %arg10[%c0_20, %c0_21] : memref<1x384xf32, #tpu.memory_space<vmem>>, vector<1x384xf32>
    %23 = vector.shape_cast %22 : vector<1x384xf32> to vector<1x384xf32>
    %24 = vector.broadcast %23 : vector<1x384xf32> to vector<8x384xf32>
    %c0_22 = arith.constant 0 : index
    %c0_23 = arith.constant 0 : index
    %25 = vector.load %arg8[%c0_22, %c0_23] : memref<1x128xf32, #tpu.memory_space<vmem>>, vector<1x128xf32>
    %26 = vector.shape_cast %25 : vector<1x128xf32> to vector<1x128xf32>
    %27 = vector.broadcast %26 : vector<1x128xf32> to vector<8x128xf32>
    %c0_24 = arith.constant 0 : index
    %c0_25 = arith.constant 0 : index
    %28 = vector.load %arg11[%c0_24, %c0_25] : memref<1x128xf32, #tpu.memory_space<vmem>>, vector<1x128xf32>
    %29 = vector.shape_cast %28 : vector<1x128xf32> to vector<1x128xf32>
    %30 = vector.broadcast %29 : vector<1x128xf32> to vector<8x128xf32>
    %c8_i32 = arith.constant 8 : i32
    %31 = arith.muli %arg0, %c8_i32 : i32
    %c0_26 = arith.constant 0 : index
    %c0_27 = arith.constant 0 : index
    %32 = vector.load %arg17[%c0_26, %c0_27] : memref<8x256xf32, #tpu.memory_space<vmem>>, vector<8x256xf32>
    %c0_i32_28 = arith.constant 0 : i32
    %33 = vector.extract_strided_slice %32 {offsets = [0, 0], sizes = [8, 128], strides = [1, 1]} : vector<8x256xf32> to vector<8x128xf32>
    %34 = vector.extract_strided_slice %32 {offsets = [0, 128], sizes = [8, 128], strides = [1, 1]} : vector<8x256xf32> to vector<8x128xf32>
    %c8_i32_29 = arith.constant 8 : i32
    %35 = arith.muli %c0_i32_28, %c8_i32_29 : i32
    %36 = tpu.assume_multiple %35, 8 : i32
    %37 = arith.index_cast %36 : i32 to index
    %c0_30 = arith.constant 0 : index
    %38 = vector.load %arg18[%37, %c0_30] : memref<64x384xf32, #tpu.memory_space<vmem>>, vector<8x384xf32>
    %cst_31 = arith.constant dense<0.000000e+00> : vector<8x768xf32>
    %39 = tpu.matmul %32, %20, %cst_31 {dimension_numbers = #tpu.dot_dimension_numbers<[1], [0], [0], [1], [0, 0, 1, 1], [], []>} : vector<8x256xf32>, vector<256x768xf32>, vector<8x768xf32> -> vector<8x768xf32>
    %40 = vector.extract_strided_slice %38 {offsets = [0, 0], sizes = [8, 256], strides = [1, 1]} : vector<8x384xf32> to vector<8x256xf32>
    %41 = vector.extract_strided_slice %39 {offsets = [0, 0], sizes = [8, 256], strides = [1, 1]} : vector<8x768xf32> to vector<8x256xf32>
    %42 = arith.addf %40, %41 : vector<8x256xf32>
    %43 = arith.negf %42 : vector<8x256xf32>
    %44 = math.exp %43 : vector<8x256xf32>
    %cst_32 = arith.constant 1.000000e+00 : f32
    %45 = vector.broadcast %cst_32 : f32 to vector<8x256xf32>
    %46 = arith.addf %45, %44 : vector<8x256xf32>
    %47 = arith.divf %45, %46 : vector<8x256xf32>
    %48 = vector.extract_strided_slice %47 {offsets = [0, 0], sizes = [8, 128], strides = [1, 1]} : vector<8x256xf32> to vector<8x128xf32>
    %49 = vector.extract_strided_slice %47 {offsets = [0, 128], sizes = [8, 128], strides = [1, 1]} : vector<8x256xf32> to vector<8x128xf32>
    %50 = vector.extract_strided_slice %38 {offsets = [0, 256], sizes = [8, 128], strides = [1, 1]} : vector<8x384xf32> to vector<8x128xf32>
    %51 = vector.extract_strided_slice %39 {offsets = [0, 256], sizes = [8, 128], strides = [1, 1]} : vector<8x768xf32> to vector<8x128xf32>
    %52 = arith.addf %51, %27 : vector<8x128xf32>
    %53 = arith.mulf %48, %52 : vector<8x128xf32>
    %54 = arith.addf %50, %53 : vector<8x128xf32>
    %55 = math.tanh %54 : vector<8x128xf32>
    %cst_33 = arith.constant 1.000000e+00 : f32
    %56 = vector.broadcast %cst_33 : f32 to vector<8x128xf32>
    %57 = arith.subf %56, %49 : vector<8x128xf32>
    %58 = arith.mulf %57, %55 : vector<8x128xf32>
    %59 = arith.mulf %49, %33 : vector<8x128xf32>
    %60 = arith.addf %58, %59 : vector<8x128xf32>
    %cst_34 = arith.constant dense<0.000000e+00> : vector<8x384xf32>
    %61 = tpu.matmul %60, %21, %cst_34 {dimension_numbers = #tpu.dot_dimension_numbers<[1], [0], [0], [1], [0, 0, 1, 1], [], []>} : vector<8x128xf32>, vector<128x384xf32>, vector<8x384xf32> -> vector<8x384xf32>
    %62 = arith.addf %61, %24 : vector<8x384xf32>
    %63 = vector.extract_strided_slice %62 {offsets = [0, 0], sizes = [8, 256], strides = [1, 1]} : vector<8x384xf32> to vector<8x256xf32>
    %64 = vector.extract_strided_slice %39 {offsets = [0, 384], sizes = [8, 256], strides = [1, 1]} : vector<8x768xf32> to vector<8x256xf32>
    %65 = arith.addf %63, %64 : vector<8x256xf32>
    %66 = arith.negf %65 : vector<8x256xf32>
    %67 = math.exp %66 : vector<8x256xf32>
    %cst_35 = arith.constant 1.000000e+00 : f32
    %68 = vector.broadcast %cst_35 : f32 to vector<8x256xf32>
    %69 = arith.addf %68, %67 : vector<8x256xf32>
    %70 = arith.divf %68, %69 : vector<8x256xf32>
    %71 = vector.extract_strided_slice %70 {offsets = [0, 0], sizes = [8, 128], strides = [1, 1]} : vector<8x256xf32> to vector<8x128xf32>
    %72 = vector.extract_strided_slice %70 {offsets = [0, 128], sizes = [8, 128], strides = [1, 1]} : vector<8x256xf32> to vector<8x128xf32>
    %73 = vector.extract_strided_slice %62 {offsets = [0, 256], sizes = [8, 128], strides = [1, 1]} : vector<8x384xf32> to vector<8x128xf32>
    %74 = vector.extract_strided_slice %39 {offsets = [0, 640], sizes = [8, 128], strides = [1, 1]} : vector<8x768xf32> to vector<8x128xf32>
    %75 = arith.addf %74, %30 : vector<8x128xf32>
    %76 = arith.mulf %71, %75 : vector<8x128xf32>
    %77 = arith.addf %73, %76 : vector<8x128xf32>
    %78 = math.tanh %77 : vector<8x128xf32>
    %cst_36 = arith.constant 1.000000e+00 : f32
    %79 = vector.broadcast %cst_36 : f32 to vector<8x128xf32>
    %80 = arith.subf %79, %72 : vector<8x128xf32>
    %81 = arith.mulf %80, %78 : vector<8x128xf32>
    %82 = arith.mulf %72, %34 : vector<8x128xf32>
    %83 = arith.addf %81, %82 : vector<8x128xf32>
    %84 = arith.addi %31, %c0_i32_28 : i32
    %85 = vector.broadcast %84 : i32 to vector<8x128xi32>
    %86 = arith.cmpi slt, %85, %19 : vector<8x128xi32>
    %87 = arith.select %86, %60, %33 : vector<8x128xi1>, vector<8x128xf32>
    %88 = arith.select %86, %83, %34 : vector<8x128xi1>, vector<8x128xf32>
    %89 = tpu.concatenate %87, %88 in 1 : vector<8x128xf32>, vector<8x128xf32> -> vector<8x256xf32>
    %c1_i32 = arith.constant 1 : i32
    %90 = vector.extract_strided_slice %89 {offsets = [0, 0], sizes = [8, 128], strides = [1, 1]} : vector<8x256xf32> to vector<8x128xf32>
    %91 = vector.extract_strided_slice %89 {offsets = [0, 128], sizes = [8, 128], strides = [1, 1]} : vector<8x256xf32> to vector<8x128xf32>
    %c8_i32_37 = arith.constant 8 : i32
    %92 = arith.muli %c1_i32, %c8_i32_37 : i32
    %93 = tpu.assume_multiple %92, 8 : i32
    %94 = arith.index_cast %93 : i32 to index
    %c0_38 = arith.constant 0 : index
    %95 = vector.load %arg18[%94, %c0_38] : memref<64x384xf32, #tpu.memory_space<vmem>>, vector<8x384xf32>
    %cst_39 = arith.constant dense<0.000000e+00> : vector<8x768xf32>
    %96 = tpu.matmul %89, %20, %cst_39 {dimension_numbers = #tpu.dot_dimension_numbers<[1], [0], [0], [1], [0, 0, 1, 1], [], []>} : vector<8x256xf32>, vector<256x768xf32>, vector<8x768xf32> -> vector<8x768xf32>
    %97 = vector.extract_strided_slice %95 {offsets = [0, 0], sizes = [8, 256], strides = [1, 1]} : vector<8x384xf32> to vector<8x256xf32>
    %98 = vector.extract_strided_slice %96 {offsets = [0, 0], sizes = [8, 256], strides = [1, 1]} : vector<8x768xf32> to vector<8x256xf32>
    %99 = arith.addf %97, %98 : vector<8x256xf32>
    %100 = arith.negf %99 : vector<8x256xf32>
    %101 = math.exp %100 : vector<8x256xf32>
    %cst_40 = arith.constant 1.000000e+00 : f32
    %102 = vector.broadcast %cst_40 : f32 to vector<8x256xf32>
    %103 = arith.addf %102, %101 : vector<8x256xf32>
    %104 = arith.divf %102, %103 : vector<8x256xf32>
    %105 = vector.extract_strided_slice %104 {offsets = [0, 0], sizes = [8, 128], strides = [1, 1]} : vector<8x256xf32> to vector<8x128xf32>
    %106 = vector.extract_strided_slice %104 {offsets = [0, 128], sizes = [8, 128], strides = [1, 1]} : vector<8x256xf32> to vector<8x128xf32>
    %107 = vector.extract_strided_slice %95 {offsets = [0, 256], sizes = [8, 128], strides = [1, 1]} : vector<8x384xf32> to vector<8x128xf32>
    %108 = vector.extract_strided_slice %96 {offsets = [0, 256], sizes = [8, 128], strides = [1, 1]} : vector<8x768xf32> to vector<8x128xf32>
    %109 = arith.addf %108, %27 : vector<8x128xf32>
    %110 = arith.mulf %105, %109 : vector<8x128xf32>
    %111 = arith.addf %107, %110 : vector<8x128xf32>
    %112 = math.tanh %111 : vector<8x128xf32>
    %cst_41 = arith.constant 1.000000e+00 : f32
    %113 = vector.broadcast %cst_41 : f32 to vector<8x128xf32>
    %114 = arith.subf %113, %106 : vector<8x128xf32>
    %115 = arith.mulf %114, %112 : vector<8x128xf32>
    %116 = arith.mulf %106, %90 : vector<8x128xf32>
    %117 = arith.addf %115, %116 : vector<8x128xf32>
    %cst_42 = arith.constant dense<0.000000e+00> : vector<8x384xf32>
    %118 = tpu.matmul %117, %21, %cst_42 {dimension_numbers = #tpu.dot_dimension_numbers<[1], [0], [0], [1], [0, 0, 1, 1], [], []>} : vector<8x128xf32>, vector<128x384xf32>, vector<8x384xf32> -> vector<8x384xf32>
    %119 = arith.addf %118, %24 : vector<8x384xf32>
    %120 = vector.extract_strided_slice %119 {offsets = [0, 0], sizes = [8, 256], strides = [1, 1]} : vector<8x384xf32> to vector<8x256xf32>
    %121 = vector.extract_strided_slice %96 {offsets = [0, 384], sizes = [8, 256], strides = [1, 1]} : vector<8x768xf32> to vector<8x256xf32>
    %122 = arith.addf %120, %121 : vector<8x256xf32>
    %123 = arith.negf %122 : vector<8x256xf32>
    %124 = math.exp %123 : vector<8x256xf32>
    %cst_43 = arith.constant 1.000000e+00 : f32
    %125 = vector.broadcast %cst_43 : f32 to vector<8x256xf32>
    %126 = arith.addf %125, %124 : vector<8x256xf32>
    %127 = arith.divf %125, %126 : vector<8x256xf32>
    %128 = vector.extract_strided_slice %127 {offsets = [0, 0], sizes = [8, 128], strides = [1, 1]} : vector<8x256xf32> to vector<8x128xf32>
    %129 = vector.extract_strided_slice %127 {offsets = [0, 128], sizes = [8, 128], strides = [1, 1]} : vector<8x256xf32> to vector<8x128xf32>
    %130 = vector.extract_strided_slice %119 {offsets = [0, 256], sizes = [8, 128], strides = [1, 1]} : vector<8x384xf32> to vector<8x128xf32>
    %131 = vector.extract_strided_slice %96 {offsets = [0, 640], sizes = [8, 128], strides = [1, 1]} : vector<8x768xf32> to vector<8x128xf32>
    %132 = arith.addf %131, %30 : vector<8x128xf32>
    %133 = arith.mulf %128, %132 : vector<8x128xf32>
    %134 = arith.addf %130, %133 : vector<8x128xf32>
    %135 = math.tanh %134 : vector<8x128xf32>
    %cst_44 = arith.constant 1.000000e+00 : f32
    %136 = vector.broadcast %cst_44 : f32 to vector<8x128xf32>
    %137 = arith.subf %136, %129 : vector<8x128xf32>
    %138 = arith.mulf %137, %135 : vector<8x128xf32>
    %139 = arith.mulf %129, %91 : vector<8x128xf32>
    %140 = arith.addf %138, %139 : vector<8x128xf32>
    %141 = arith.addi %31, %c1_i32 : i32
    %142 = vector.broadcast %141 : i32 to vector<8x128xi32>
    %143 = arith.cmpi slt, %142, %19 : vector<8x128xi32>
    %144 = arith.select %143, %117, %90 : vector<8x128xi1>, vector<8x128xf32>
    %145 = arith.select %143, %140, %91 : vector<8x128xi1>, vector<8x128xf32>
    %146 = tpu.concatenate %144, %145 in 1 : vector<8x128xf32>, vector<8x128xf32> -> vector<8x256xf32>
    %c2_i32 = arith.constant 2 : i32
    %147 = vector.extract_strided_slice %146 {offsets = [0, 0], sizes = [8, 128], strides = [1, 1]} : vector<8x256xf32> to vector<8x128xf32>
    %148 = vector.extract_strided_slice %146 {offsets = [0, 128], sizes = [8, 128], strides = [1, 1]} : vector<8x256xf32> to vector<8x128xf32>
    %c8_i32_45 = arith.constant 8 : i32
    %149 = arith.muli %c2_i32, %c8_i32_45 : i32
    %150 = tpu.assume_multiple %149, 8 : i32
    %151 = arith.index_cast %150 : i32 to index
    %c0_46 = arith.constant 0 : index
    %152 = vector.load %arg18[%151, %c0_46] : memref<64x384xf32, #tpu.memory_space<vmem>>, vector<8x384xf32>
    %cst_47 = arith.constant dense<0.000000e+00> : vector<8x768xf32>
    %153 = tpu.matmul %146, %20, %cst_47 {dimension_numbers = #tpu.dot_dimension_numbers<[1], [0], [0], [1], [0, 0, 1, 1], [], []>} : vector<8x256xf32>, vector<256x768xf32>, vector<8x768xf32> -> vector<8x768xf32>
    %154 = vector.extract_strided_slice %152 {offsets = [0, 0], sizes = [8, 256], strides = [1, 1]} : vector<8x384xf32> to vector<8x256xf32>
    %155 = vector.extract_strided_slice %153 {offsets = [0, 0], sizes = [8, 256], strides = [1, 1]} : vector<8x768xf32> to vector<8x256xf32>
    %156 = arith.addf %154, %155 : vector<8x256xf32>
    %157 = arith.negf %156 : vector<8x256xf32>
    %158 = math.exp %157 : vector<8x256xf32>
    %cst_48 = arith.constant 1.000000e+00 : f32
    %159 = vector.broadcast %cst_48 : f32 to vector<8x256xf32>
    %160 = arith.addf %159, %158 : vector<8x256xf32>
    %161 = arith.divf %159, %160 : vector<8x256xf32>
    %162 = vector.extract_strided_slice %161 {offsets = [0, 0], sizes = [8, 128], strides = [1, 1]} : vector<8x256xf32> to vector<8x128xf32>
    %163 = vector.extract_strided_slice %161 {offsets = [0, 128], sizes = [8, 128], strides = [1, 1]} : vector<8x256xf32> to vector<8x128xf32>
    %164 = vector.extract_strided_slice %152 {offsets = [0, 256], sizes = [8, 128], strides = [1, 1]} : vector<8x384xf32> to vector<8x128xf32>
    %165 = vector.extract_strided_slice %153 {offsets = [0, 256], sizes = [8, 128], strides = [1, 1]} : vector<8x768xf32> to vector<8x128xf32>
    %166 = arith.addf %165, %27 : vector<8x128xf32>
    %167 = arith.mulf %162, %166 : vector<8x128xf32>
    %168 = arith.addf %164, %167 : vector<8x128xf32>
    %169 = math.tanh %168 : vector<8x128xf32>
    %cst_49 = arith.constant 1.000000e+00 : f32
    %170 = vector.broadcast %cst_49 : f32 to vector<8x128xf32>
    %171 = arith.subf %170, %163 : vector<8x128xf32>
    %172 = arith.mulf %171, %169 : vector<8x128xf32>
    %173 = arith.mulf %163, %147 : vector<8x128xf32>
    %174 = arith.addf %172, %173 : vector<8x128xf32>
    %cst_50 = arith.constant dense<0.000000e+00> : vector<8x384xf32>
    %175 = tpu.matmul %174, %21, %cst_50 {dimension_numbers = #tpu.dot_dimension_numbers<[1], [0], [0], [1], [0, 0, 1, 1], [], []>} : vector<8x128xf32>, vector<128x384xf32>, vector<8x384xf32> -> vector<8x384xf32>
    %176 = arith.addf %175, %24 : vector<8x384xf32>
    %177 = vector.extract_strided_slice %176 {offsets = [0, 0], sizes = [8, 256], strides = [1, 1]} : vector<8x384xf32> to vector<8x256xf32>
    %178 = vector.extract_strided_slice %153 {offsets = [0, 384], sizes = [8, 256], strides = [1, 1]} : vector<8x768xf32> to vector<8x256xf32>
    %179 = arith.addf %177, %178 : vector<8x256xf32>
    %180 = arith.negf %179 : vector<8x256xf32>
    %181 = math.exp %180 : vector<8x256xf32>
    %cst_51 = arith.constant 1.000000e+00 : f32
    %182 = vector.broadcast %cst_51 : f32 to vector<8x256xf32>
    %183 = arith.addf %182, %181 : vector<8x256xf32>
    %184 = arith.divf %182, %183 : vector<8x256xf32>
    %185 = vector.extract_strided_slice %184 {offsets = [0, 0], sizes = [8, 128], strides = [1, 1]} : vector<8x256xf32> to vector<8x128xf32>
    %186 = vector.extract_strided_slice %184 {offsets = [0, 128], sizes = [8, 128], strides = [1, 1]} : vector<8x256xf32> to vector<8x128xf32>
    %187 = vector.extract_strided_slice %176 {offsets = [0, 256], sizes = [8, 128], strides = [1, 1]} : vector<8x384xf32> to vector<8x128xf32>
    %188 = vector.extract_strided_slice %153 {offsets = [0, 640], sizes = [8, 128], strides = [1, 1]} : vector<8x768xf32> to vector<8x128xf32>
    %189 = arith.addf %188, %30 : vector<8x128xf32>
    %190 = arith.mulf %185, %189 : vector<8x128xf32>
    %191 = arith.addf %187, %190 : vector<8x128xf32>
    %192 = math.tanh %191 : vector<8x128xf32>
    %cst_52 = arith.constant 1.000000e+00 : f32
    %193 = vector.broadcast %cst_52 : f32 to vector<8x128xf32>
    %194 = arith.subf %193, %186 : vector<8x128xf32>
    %195 = arith.mulf %194, %192 : vector<8x128xf32>
    %196 = arith.mulf %186, %148 : vector<8x128xf32>
    %197 = arith.addf %195, %196 : vector<8x128xf32>
    %198 = arith.addi %31, %c2_i32 : i32
    %199 = vector.broadcast %198 : i32 to vector<8x128xi32>
    %200 = arith.cmpi slt, %199, %19 : vector<8x128xi32>
    %201 = arith.select %200, %174, %147 : vector<8x128xi1>, vector<8x128xf32>
    %202 = arith.select %200, %197, %148 : vector<8x128xi1>, vector<8x128xf32>
    %203 = tpu.concatenate %201, %202 in 1 : vector<8x128xf32>, vector<8x128xf32> -> vector<8x256xf32>
    %c3_i32 = arith.constant 3 : i32
    %204 = vector.extract_strided_slice %203 {offsets = [0, 0], sizes = [8, 128], strides = [1, 1]} : vector<8x256xf32> to vector<8x128xf32>
    %205 = vector.extract_strided_slice %203 {offsets = [0, 128], sizes = [8, 128], strides = [1, 1]} : vector<8x256xf32> to vector<8x128xf32>
    %c8_i32_53 = arith.constant 8 : i32
    %206 = arith.muli %c3_i32, %c8_i32_53 : i32
    %207 = tpu.assume_multiple %206, 8 : i32
    %208 = arith.index_cast %207 : i32 to index
    %c0_54 = arith.constant 0 : index
    %209 = vector.load %arg18[%208, %c0_54] : memref<64x384xf32, #tpu.memory_space<vmem>>, vector<8x384xf32>
    %cst_55 = arith.constant dense<0.000000e+00> : vector<8x768xf32>
    %210 = tpu.matmul %203, %20, %cst_55 {dimension_numbers = #tpu.dot_dimension_numbers<[1], [0], [0], [1], [0, 0, 1, 1], [], []>} : vector<8x256xf32>, vector<256x768xf32>, vector<8x768xf32> -> vector<8x768xf32>
    %211 = vector.extract_strided_slice %209 {offsets = [0, 0], sizes = [8, 256], strides = [1, 1]} : vector<8x384xf32> to vector<8x256xf32>
    %212 = vector.extract_strided_slice %210 {offsets = [0, 0], sizes = [8, 256], strides = [1, 1]} : vector<8x768xf32> to vector<8x256xf32>
    %213 = arith.addf %211, %212 : vector<8x256xf32>
    %214 = arith.negf %213 : vector<8x256xf32>
    %215 = math.exp %214 : vector<8x256xf32>
    %cst_56 = arith.constant 1.000000e+00 : f32
    %216 = vector.broadcast %cst_56 : f32 to vector<8x256xf32>
    %217 = arith.addf %216, %215 : vector<8x256xf32>
    %218 = arith.divf %216, %217 : vector<8x256xf32>
    %219 = vector.extract_strided_slice %218 {offsets = [0, 0], sizes = [8, 128], strides = [1, 1]} : vector<8x256xf32> to vector<8x128xf32>
    %220 = vector.extract_strided_slice %218 {offsets = [0, 128], sizes = [8, 128], strides = [1, 1]} : vector<8x256xf32> to vector<8x128xf32>
    %221 = vector.extract_strided_slice %209 {offsets = [0, 256], sizes = [8, 128], strides = [1, 1]} : vector<8x384xf32> to vector<8x128xf32>
    %222 = vector.extract_strided_slice %210 {offsets = [0, 256], sizes = [8, 128], strides = [1, 1]} : vector<8x768xf32> to vector<8x128xf32>
    %223 = arith.addf %222, %27 : vector<8x128xf32>
    %224 = arith.mulf %219, %223 : vector<8x128xf32>
    %225 = arith.addf %221, %224 : vector<8x128xf32>
    %226 = math.tanh %225 : vector<8x128xf32>
    %cst_57 = arith.constant 1.000000e+00 : f32
    %227 = vector.broadcast %cst_57 : f32 to vector<8x128xf32>
    %228 = arith.subf %227, %220 : vector<8x128xf32>
    %229 = arith.mulf %228, %226 : vector<8x128xf32>
    %230 = arith.mulf %220, %204 : vector<8x128xf32>
    %231 = arith.addf %229, %230 : vector<8x128xf32>
    %cst_58 = arith.constant dense<0.000000e+00> : vector<8x384xf32>
    %232 = tpu.matmul %231, %21, %cst_58 {dimension_numbers = #tpu.dot_dimension_numbers<[1], [0], [0], [1], [0, 0, 1, 1], [], []>} : vector<8x128xf32>, vector<128x384xf32>, vector<8x384xf32> -> vector<8x384xf32>
    %233 = arith.addf %232, %24 : vector<8x384xf32>
    %234 = vector.extract_strided_slice %233 {offsets = [0, 0], sizes = [8, 256], strides = [1, 1]} : vector<8x384xf32> to vector<8x256xf32>
    %235 = vector.extract_strided_slice %210 {offsets = [0, 384], sizes = [8, 256], strides = [1, 1]} : vector<8x768xf32> to vector<8x256xf32>
    %236 = arith.addf %234, %235 : vector<8x256xf32>
    %237 = arith.negf %236 : vector<8x256xf32>
    %238 = math.exp %237 : vector<8x256xf32>
    %cst_59 = arith.constant 1.000000e+00 : f32
    %239 = vector.broadcast %cst_59 : f32 to vector<8x256xf32>
    %240 = arith.addf %239, %238 : vector<8x256xf32>
    %241 = arith.divf %239, %240 : vector<8x256xf32>
    %242 = vector.extract_strided_slice %241 {offsets = [0, 0], sizes = [8, 128], strides = [1, 1]} : vector<8x256xf32> to vector<8x128xf32>
    %243 = vector.extract_strided_slice %241 {offsets = [0, 128], sizes = [8, 128], strides = [1, 1]} : vector<8x256xf32> to vector<8x128xf32>
    %244 = vector.extract_strided_slice %233 {offsets = [0, 256], sizes = [8, 128], strides = [1, 1]} : vector<8x384xf32> to vector<8x128xf32>
    %245 = vector.extract_strided_slice %210 {offsets = [0, 640], sizes = [8, 128], strides = [1, 1]} : vector<8x768xf32> to vector<8x128xf32>
    %246 = arith.addf %245, %30 : vector<8x128xf32>
    %247 = arith.mulf %242, %246 : vector<8x128xf32>
    %248 = arith.addf %244, %247 : vector<8x128xf32>
    %249 = math.tanh %248 : vector<8x128xf32>
    %cst_60 = arith.constant 1.000000e+00 : f32
    %250 = vector.broadcast %cst_60 : f32 to vector<8x128xf32>
    %251 = arith.subf %250, %243 : vector<8x128xf32>
    %252 = arith.mulf %251, %249 : vector<8x128xf32>
    %253 = arith.mulf %243, %205 : vector<8x128xf32>
    %254 = arith.addf %252, %253 : vector<8x128xf32>
    %255 = arith.addi %31, %c3_i32 : i32
    %256 = vector.broadcast %255 : i32 to vector<8x128xi32>
    %257 = arith.cmpi slt, %256, %19 : vector<8x128xi32>
    %258 = arith.select %257, %231, %204 : vector<8x128xi1>, vector<8x128xf32>
    %259 = arith.select %257, %254, %205 : vector<8x128xi1>, vector<8x128xf32>
    %260 = tpu.concatenate %258, %259 in 1 : vector<8x128xf32>, vector<8x128xf32> -> vector<8x256xf32>
    %c4_i32 = arith.constant 4 : i32
    %261 = vector.extract_strided_slice %260 {offsets = [0, 0], sizes = [8, 128], strides = [1, 1]} : vector<8x256xf32> to vector<8x128xf32>
    %262 = vector.extract_strided_slice %260 {offsets = [0, 128], sizes = [8, 128], strides = [1, 1]} : vector<8x256xf32> to vector<8x128xf32>
    %c8_i32_61 = arith.constant 8 : i32
    %263 = arith.muli %c4_i32, %c8_i32_61 : i32
    %264 = tpu.assume_multiple %263, 8 : i32
    %265 = arith.index_cast %264 : i32 to index
    %c0_62 = arith.constant 0 : index
    %266 = vector.load %arg18[%265, %c0_62] : memref<64x384xf32, #tpu.memory_space<vmem>>, vector<8x384xf32>
    %cst_63 = arith.constant dense<0.000000e+00> : vector<8x768xf32>
    %267 = tpu.matmul %260, %20, %cst_63 {dimension_numbers = #tpu.dot_dimension_numbers<[1], [0], [0], [1], [0, 0, 1, 1], [], []>} : vector<8x256xf32>, vector<256x768xf32>, vector<8x768xf32> -> vector<8x768xf32>
    %268 = vector.extract_strided_slice %266 {offsets = [0, 0], sizes = [8, 256], strides = [1, 1]} : vector<8x384xf32> to vector<8x256xf32>
    %269 = vector.extract_strided_slice %267 {offsets = [0, 0], sizes = [8, 256], strides = [1, 1]} : vector<8x768xf32> to vector<8x256xf32>
    %270 = arith.addf %268, %269 : vector<8x256xf32>
    %271 = arith.negf %270 : vector<8x256xf32>
    %272 = math.exp %271 : vector<8x256xf32>
    %cst_64 = arith.constant 1.000000e+00 : f32
    %273 = vector.broadcast %cst_64 : f32 to vector<8x256xf32>
    %274 = arith.addf %273, %272 : vector<8x256xf32>
    %275 = arith.divf %273, %274 : vector<8x256xf32>
    %276 = vector.extract_strided_slice %275 {offsets = [0, 0], sizes = [8, 128], strides = [1, 1]} : vector<8x256xf32> to vector<8x128xf32>
    %277 = vector.extract_strided_slice %275 {offsets = [0, 128], sizes = [8, 128], strides = [1, 1]} : vector<8x256xf32> to vector<8x128xf32>
    %278 = vector.extract_strided_slice %266 {offsets = [0, 256], sizes = [8, 128], strides = [1, 1]} : vector<8x384xf32> to vector<8x128xf32>
    %279 = vector.extract_strided_slice %267 {offsets = [0, 256], sizes = [8, 128], strides = [1, 1]} : vector<8x768xf32> to vector<8x128xf32>
    %280 = arith.addf %279, %27 : vector<8x128xf32>
    %281 = arith.mulf %276, %280 : vector<8x128xf32>
    %282 = arith.addf %278, %281 : vector<8x128xf32>
    %283 = math.tanh %282 : vector<8x128xf32>
    %cst_65 = arith.constant 1.000000e+00 : f32
    %284 = vector.broadcast %cst_65 : f32 to vector<8x128xf32>
    %285 = arith.subf %284, %277 : vector<8x128xf32>
    %286 = arith.mulf %285, %283 : vector<8x128xf32>
    %287 = arith.mulf %277, %261 : vector<8x128xf32>
    %288 = arith.addf %286, %287 : vector<8x128xf32>
    %cst_66 = arith.constant dense<0.000000e+00> : vector<8x384xf32>
    %289 = tpu.matmul %288, %21, %cst_66 {dimension_numbers = #tpu.dot_dimension_numbers<[1], [0], [0], [1], [0, 0, 1, 1], [], []>} : vector<8x128xf32>, vector<128x384xf32>, vector<8x384xf32> -> vector<8x384xf32>
    %290 = arith.addf %289, %24 : vector<8x384xf32>
    %291 = vector.extract_strided_slice %290 {offsets = [0, 0], sizes = [8, 256], strides = [1, 1]} : vector<8x384xf32> to vector<8x256xf32>
    %292 = vector.extract_strided_slice %267 {offsets = [0, 384], sizes = [8, 256], strides = [1, 1]} : vector<8x768xf32> to vector<8x256xf32>
    %293 = arith.addf %291, %292 : vector<8x256xf32>
    %294 = arith.negf %293 : vector<8x256xf32>
    %295 = math.exp %294 : vector<8x256xf32>
    %cst_67 = arith.constant 1.000000e+00 : f32
    %296 = vector.broadcast %cst_67 : f32 to vector<8x256xf32>
    %297 = arith.addf %296, %295 : vector<8x256xf32>
    %298 = arith.divf %296, %297 : vector<8x256xf32>
    %299 = vector.extract_strided_slice %298 {offsets = [0, 0], sizes = [8, 128], strides = [1, 1]} : vector<8x256xf32> to vector<8x128xf32>
    %300 = vector.extract_strided_slice %298 {offsets = [0, 128], sizes = [8, 128], strides = [1, 1]} : vector<8x256xf32> to vector<8x128xf32>
    %301 = vector.extract_strided_slice %290 {offsets = [0, 256], sizes = [8, 128], strides = [1, 1]} : vector<8x384xf32> to vector<8x128xf32>
    %302 = vector.extract_strided_slice %267 {offsets = [0, 640], sizes = [8, 128], strides = [1, 1]} : vector<8x768xf32> to vector<8x128xf32>
    %303 = arith.addf %302, %30 : vector<8x128xf32>
    %304 = arith.mulf %299, %303 : vector<8x128xf32>
    %305 = arith.addf %301, %304 : vector<8x128xf32>
    %306 = math.tanh %305 : vector<8x128xf32>
    %cst_68 = arith.constant 1.000000e+00 : f32
    %307 = vector.broadcast %cst_68 : f32 to vector<8x128xf32>
    %308 = arith.subf %307, %300 : vector<8x128xf32>
    %309 = arith.mulf %308, %306 : vector<8x128xf32>
    %310 = arith.mulf %300, %262 : vector<8x128xf32>
    %311 = arith.addf %309, %310 : vector<8x128xf32>
    %312 = arith.addi %31, %c4_i32 : i32
    %313 = vector.broadcast %312 : i32 to vector<8x128xi32>
    %314 = arith.cmpi slt, %313, %19 : vector<8x128xi32>
    %315 = arith.select %314, %288, %261 : vector<8x128xi1>, vector<8x128xf32>
    %316 = arith.select %314, %311, %262 : vector<8x128xi1>, vector<8x128xf32>
    %317 = tpu.concatenate %315, %316 in 1 : vector<8x128xf32>, vector<8x128xf32> -> vector<8x256xf32>
    %c5_i32 = arith.constant 5 : i32
    %318 = vector.extract_strided_slice %317 {offsets = [0, 0], sizes = [8, 128], strides = [1, 1]} : vector<8x256xf32> to vector<8x128xf32>
    %319 = vector.extract_strided_slice %317 {offsets = [0, 128], sizes = [8, 128], strides = [1, 1]} : vector<8x256xf32> to vector<8x128xf32>
    %c8_i32_69 = arith.constant 8 : i32
    %320 = arith.muli %c5_i32, %c8_i32_69 : i32
    %321 = tpu.assume_multiple %320, 8 : i32
    %322 = arith.index_cast %321 : i32 to index
    %c0_70 = arith.constant 0 : index
    %323 = vector.load %arg18[%322, %c0_70] : memref<64x384xf32, #tpu.memory_space<vmem>>, vector<8x384xf32>
    %cst_71 = arith.constant dense<0.000000e+00> : vector<8x768xf32>
    %324 = tpu.matmul %317, %20, %cst_71 {dimension_numbers = #tpu.dot_dimension_numbers<[1], [0], [0], [1], [0, 0, 1, 1], [], []>} : vector<8x256xf32>, vector<256x768xf32>, vector<8x768xf32> -> vector<8x768xf32>
    %325 = vector.extract_strided_slice %323 {offsets = [0, 0], sizes = [8, 256], strides = [1, 1]} : vector<8x384xf32> to vector<8x256xf32>
    %326 = vector.extract_strided_slice %324 {offsets = [0, 0], sizes = [8, 256], strides = [1, 1]} : vector<8x768xf32> to vector<8x256xf32>
    %327 = arith.addf %325, %326 : vector<8x256xf32>
    %328 = arith.negf %327 : vector<8x256xf32>
    %329 = math.exp %328 : vector<8x256xf32>
    %cst_72 = arith.constant 1.000000e+00 : f32
    %330 = vector.broadcast %cst_72 : f32 to vector<8x256xf32>
    %331 = arith.addf %330, %329 : vector<8x256xf32>
    %332 = arith.divf %330, %331 : vector<8x256xf32>
    %333 = vector.extract_strided_slice %332 {offsets = [0, 0], sizes = [8, 128], strides = [1, 1]} : vector<8x256xf32> to vector<8x128xf32>
    %334 = vector.extract_strided_slice %332 {offsets = [0, 128], sizes = [8, 128], strides = [1, 1]} : vector<8x256xf32> to vector<8x128xf32>
    %335 = vector.extract_strided_slice %323 {offsets = [0, 256], sizes = [8, 128], strides = [1, 1]} : vector<8x384xf32> to vector<8x128xf32>
    %336 = vector.extract_strided_slice %324 {offsets = [0, 256], sizes = [8, 128], strides = [1, 1]} : vector<8x768xf32> to vector<8x128xf32>
    %337 = arith.addf %336, %27 : vector<8x128xf32>
    %338 = arith.mulf %333, %337 : vector<8x128xf32>
    %339 = arith.addf %335, %338 : vector<8x128xf32>
    %340 = math.tanh %339 : vector<8x128xf32>
    %cst_73 = arith.constant 1.000000e+00 : f32
    %341 = vector.broadcast %cst_73 : f32 to vector<8x128xf32>
    %342 = arith.subf %341, %334 : vector<8x128xf32>
    %343 = arith.mulf %342, %340 : vector<8x128xf32>
    %344 = arith.mulf %334, %318 : vector<8x128xf32>
    %345 = arith.addf %343, %344 : vector<8x128xf32>
    %cst_74 = arith.constant dense<0.000000e+00> : vector<8x384xf32>
    %346 = tpu.matmul %345, %21, %cst_74 {dimension_numbers = #tpu.dot_dimension_numbers<[1], [0], [0], [1], [0, 0, 1, 1], [], []>} : vector<8x128xf32>, vector<128x384xf32>, vector<8x384xf32> -> vector<8x384xf32>
    %347 = arith.addf %346, %24 : vector<8x384xf32>
    %348 = vector.extract_strided_slice %347 {offsets = [0, 0], sizes = [8, 256], strides = [1, 1]} : vector<8x384xf32> to vector<8x256xf32>
    %349 = vector.extract_strided_slice %324 {offsets = [0, 384], sizes = [8, 256], strides = [1, 1]} : vector<8x768xf32> to vector<8x256xf32>
    %350 = arith.addf %348, %349 : vector<8x256xf32>
    %351 = arith.negf %350 : vector<8x256xf32>
    %352 = math.exp %351 : vector<8x256xf32>
    %cst_75 = arith.constant 1.000000e+00 : f32
    %353 = vector.broadcast %cst_75 : f32 to vector<8x256xf32>
    %354 = arith.addf %353, %352 : vector<8x256xf32>
    %355 = arith.divf %353, %354 : vector<8x256xf32>
    %356 = vector.extract_strided_slice %355 {offsets = [0, 0], sizes = [8, 128], strides = [1, 1]} : vector<8x256xf32> to vector<8x128xf32>
    %357 = vector.extract_strided_slice %355 {offsets = [0, 128], sizes = [8, 128], strides = [1, 1]} : vector<8x256xf32> to vector<8x128xf32>
    %358 = vector.extract_strided_slice %347 {offsets = [0, 256], sizes = [8, 128], strides = [1, 1]} : vector<8x384xf32> to vector<8x128xf32>
    %359 = vector.extract_strided_slice %324 {offsets = [0, 640], sizes = [8, 128], strides = [1, 1]} : vector<8x768xf32> to vector<8x128xf32>
    %360 = arith.addf %359, %30 : vector<8x128xf32>
    %361 = arith.mulf %356, %360 : vector<8x128xf32>
    %362 = arith.addf %358, %361 : vector<8x128xf32>
    %363 = math.tanh %362 : vector<8x128xf32>
    %cst_76 = arith.constant 1.000000e+00 : f32
    %364 = vector.broadcast %cst_76 : f32 to vector<8x128xf32>
    %365 = arith.subf %364, %357 : vector<8x128xf32>
    %366 = arith.mulf %365, %363 : vector<8x128xf32>
    %367 = arith.mulf %357, %319 : vector<8x128xf32>
    %368 = arith.addf %366, %367 : vector<8x128xf32>
    %369 = arith.addi %31, %c5_i32 : i32
    %370 = vector.broadcast %369 : i32 to vector<8x128xi32>
    %371 = arith.cmpi slt, %370, %19 : vector<8x128xi32>
    %372 = arith.select %371, %345, %318 : vector<8x128xi1>, vector<8x128xf32>
    %373 = arith.select %371, %368, %319 : vector<8x128xi1>, vector<8x128xf32>
    %374 = tpu.concatenate %372, %373 in 1 : vector<8x128xf32>, vector<8x128xf32> -> vector<8x256xf32>
    %c6_i32 = arith.constant 6 : i32
    %375 = vector.extract_strided_slice %374 {offsets = [0, 0], sizes = [8, 128], strides = [1, 1]} : vector<8x256xf32> to vector<8x128xf32>
    %376 = vector.extract_strided_slice %374 {offsets = [0, 128], sizes = [8, 128], strides = [1, 1]} : vector<8x256xf32> to vector<8x128xf32>
    %c8_i32_77 = arith.constant 8 : i32
    %377 = arith.muli %c6_i32, %c8_i32_77 : i32
    %378 = tpu.assume_multiple %377, 8 : i32
    %379 = arith.index_cast %378 : i32 to index
    %c0_78 = arith.constant 0 : index
    %380 = vector.load %arg18[%379, %c0_78] : memref<64x384xf32, #tpu.memory_space<vmem>>, vector<8x384xf32>
    %cst_79 = arith.constant dense<0.000000e+00> : vector<8x768xf32>
    %381 = tpu.matmul %374, %20, %cst_79 {dimension_numbers = #tpu.dot_dimension_numbers<[1], [0], [0], [1], [0, 0, 1, 1], [], []>} : vector<8x256xf32>, vector<256x768xf32>, vector<8x768xf32> -> vector<8x768xf32>
    %382 = vector.extract_strided_slice %380 {offsets = [0, 0], sizes = [8, 256], strides = [1, 1]} : vector<8x384xf32> to vector<8x256xf32>
    %383 = vector.extract_strided_slice %381 {offsets = [0, 0], sizes = [8, 256], strides = [1, 1]} : vector<8x768xf32> to vector<8x256xf32>
    %384 = arith.addf %382, %383 : vector<8x256xf32>
    %385 = arith.negf %384 : vector<8x256xf32>
    %386 = math.exp %385 : vector<8x256xf32>
    %cst_80 = arith.constant 1.000000e+00 : f32
    %387 = vector.broadcast %cst_80 : f32 to vector<8x256xf32>
    %388 = arith.addf %387, %386 : vector<8x256xf32>
    %389 = arith.divf %387, %388 : vector<8x256xf32>
    %390 = vector.extract_strided_slice %389 {offsets = [0, 0], sizes = [8, 128], strides = [1, 1]} : vector<8x256xf32> to vector<8x128xf32>
    %391 = vector.extract_strided_slice %389 {offsets = [0, 128], sizes = [8, 128], strides = [1, 1]} : vector<8x256xf32> to vector<8x128xf32>
    %392 = vector.extract_strided_slice %380 {offsets = [0, 256], sizes = [8, 128], strides = [1, 1]} : vector<8x384xf32> to vector<8x128xf32>
    %393 = vector.extract_strided_slice %381 {offsets = [0, 256], sizes = [8, 128], strides = [1, 1]} : vector<8x768xf32> to vector<8x128xf32>
    %394 = arith.addf %393, %27 : vector<8x128xf32>
    %395 = arith.mulf %390, %394 : vector<8x128xf32>
    %396 = arith.addf %392, %395 : vector<8x128xf32>
    %397 = math.tanh %396 : vector<8x128xf32>
    %cst_81 = arith.constant 1.000000e+00 : f32
    %398 = vector.broadcast %cst_81 : f32 to vector<8x128xf32>
    %399 = arith.subf %398, %391 : vector<8x128xf32>
    %400 = arith.mulf %399, %397 : vector<8x128xf32>
    %401 = arith.mulf %391, %375 : vector<8x128xf32>
    %402 = arith.addf %400, %401 : vector<8x128xf32>
    %cst_82 = arith.constant dense<0.000000e+00> : vector<8x384xf32>
    %403 = tpu.matmul %402, %21, %cst_82 {dimension_numbers = #tpu.dot_dimension_numbers<[1], [0], [0], [1], [0, 0, 1, 1], [], []>} : vector<8x128xf32>, vector<128x384xf32>, vector<8x384xf32> -> vector<8x384xf32>
    %404 = arith.addf %403, %24 : vector<8x384xf32>
    %405 = vector.extract_strided_slice %404 {offsets = [0, 0], sizes = [8, 256], strides = [1, 1]} : vector<8x384xf32> to vector<8x256xf32>
    %406 = vector.extract_strided_slice %381 {offsets = [0, 384], sizes = [8, 256], strides = [1, 1]} : vector<8x768xf32> to vector<8x256xf32>
    %407 = arith.addf %405, %406 : vector<8x256xf32>
    %408 = arith.negf %407 : vector<8x256xf32>
    %409 = math.exp %408 : vector<8x256xf32>
    %cst_83 = arith.constant 1.000000e+00 : f32
    %410 = vector.broadcast %cst_83 : f32 to vector<8x256xf32>
    %411 = arith.addf %410, %409 : vector<8x256xf32>
    %412 = arith.divf %410, %411 : vector<8x256xf32>
    %413 = vector.extract_strided_slice %412 {offsets = [0, 0], sizes = [8, 128], strides = [1, 1]} : vector<8x256xf32> to vector<8x128xf32>
    %414 = vector.extract_strided_slice %412 {offsets = [0, 128], sizes = [8, 128], strides = [1, 1]} : vector<8x256xf32> to vector<8x128xf32>
    %415 = vector.extract_strided_slice %404 {offsets = [0, 256], sizes = [8, 128], strides = [1, 1]} : vector<8x384xf32> to vector<8x128xf32>
    %416 = vector.extract_strided_slice %381 {offsets = [0, 640], sizes = [8, 128], strides = [1, 1]} : vector<8x768xf32> to vector<8x128xf32>
    %417 = arith.addf %416, %30 : vector<8x128xf32>
    %418 = arith.mulf %413, %417 : vector<8x128xf32>
    %419 = arith.addf %415, %418 : vector<8x128xf32>
    %420 = math.tanh %419 : vector<8x128xf32>
    %cst_84 = arith.constant 1.000000e+00 : f32
    %421 = vector.broadcast %cst_84 : f32 to vector<8x128xf32>
    %422 = arith.subf %421, %414 : vector<8x128xf32>
    %423 = arith.mulf %422, %420 : vector<8x128xf32>
    %424 = arith.mulf %414, %376 : vector<8x128xf32>
    %425 = arith.addf %423, %424 : vector<8x128xf32>
    %426 = arith.addi %31, %c6_i32 : i32
    %427 = vector.broadcast %426 : i32 to vector<8x128xi32>
    %428 = arith.cmpi slt, %427, %19 : vector<8x128xi32>
    %429 = arith.select %428, %402, %375 : vector<8x128xi1>, vector<8x128xf32>
    %430 = arith.select %428, %425, %376 : vector<8x128xi1>, vector<8x128xf32>
    %431 = tpu.concatenate %429, %430 in 1 : vector<8x128xf32>, vector<8x128xf32> -> vector<8x256xf32>
    %c7_i32 = arith.constant 7 : i32
    %432 = vector.extract_strided_slice %431 {offsets = [0, 0], sizes = [8, 128], strides = [1, 1]} : vector<8x256xf32> to vector<8x128xf32>
    %433 = vector.extract_strided_slice %431 {offsets = [0, 128], sizes = [8, 128], strides = [1, 1]} : vector<8x256xf32> to vector<8x128xf32>
    %c8_i32_85 = arith.constant 8 : i32
    %434 = arith.muli %c7_i32, %c8_i32_85 : i32
    %435 = tpu.assume_multiple %434, 8 : i32
    %436 = arith.index_cast %435 : i32 to index
    %c0_86 = arith.constant 0 : index
    %437 = vector.load %arg18[%436, %c0_86] : memref<64x384xf32, #tpu.memory_space<vmem>>, vector<8x384xf32>
    %cst_87 = arith.constant dense<0.000000e+00> : vector<8x768xf32>
    %438 = tpu.matmul %431, %20, %cst_87 {dimension_numbers = #tpu.dot_dimension_numbers<[1], [0], [0], [1], [0, 0, 1, 1], [], []>} : vector<8x256xf32>, vector<256x768xf32>, vector<8x768xf32> -> vector<8x768xf32>
    %439 = vector.extract_strided_slice %437 {offsets = [0, 0], sizes = [8, 256], strides = [1, 1]} : vector<8x384xf32> to vector<8x256xf32>
    %440 = vector.extract_strided_slice %438 {offsets = [0, 0], sizes = [8, 256], strides = [1, 1]} : vector<8x768xf32> to vector<8x256xf32>
    %441 = arith.addf %439, %440 : vector<8x256xf32>
    %442 = arith.negf %441 : vector<8x256xf32>
    %443 = math.exp %442 : vector<8x256xf32>
    %cst_88 = arith.constant 1.000000e+00 : f32
    %444 = vector.broadcast %cst_88 : f32 to vector<8x256xf32>
    %445 = arith.addf %444, %443 : vector<8x256xf32>
    %446 = arith.divf %444, %445 : vector<8x256xf32>
    %447 = vector.extract_strided_slice %446 {offsets = [0, 0], sizes = [8, 128], strides = [1, 1]} : vector<8x256xf32> to vector<8x128xf32>
    %448 = vector.extract_strided_slice %446 {offsets = [0, 128], sizes = [8, 128], strides = [1, 1]} : vector<8x256xf32> to vector<8x128xf32>
    %449 = vector.extract_strided_slice %437 {offsets = [0, 256], sizes = [8, 128], strides = [1, 1]} : vector<8x384xf32> to vector<8x128xf32>
    %450 = vector.extract_strided_slice %438 {offsets = [0, 256], sizes = [8, 128], strides = [1, 1]} : vector<8x768xf32> to vector<8x128xf32>
    %451 = arith.addf %450, %27 : vector<8x128xf32>
    %452 = arith.mulf %447, %451 : vector<8x128xf32>
    %453 = arith.addf %449, %452 : vector<8x128xf32>
    %454 = math.tanh %453 : vector<8x128xf32>
    %cst_89 = arith.constant 1.000000e+00 : f32
    %455 = vector.broadcast %cst_89 : f32 to vector<8x128xf32>
    %456 = arith.subf %455, %448 : vector<8x128xf32>
    %457 = arith.mulf %456, %454 : vector<8x128xf32>
    %458 = arith.mulf %448, %432 : vector<8x128xf32>
    %459 = arith.addf %457, %458 : vector<8x128xf32>
    %cst_90 = arith.constant dense<0.000000e+00> : vector<8x384xf32>
    %460 = tpu.matmul %459, %21, %cst_90 {dimension_numbers = #tpu.dot_dimension_numbers<[1], [0], [0], [1], [0, 0, 1, 1], [], []>} : vector<8x128xf32>, vector<128x384xf32>, vector<8x384xf32> -> vector<8x384xf32>
    %461 = arith.addf %460, %24 : vector<8x384xf32>
    %462 = vector.extract_strided_slice %461 {offsets = [0, 0], sizes = [8, 256], strides = [1, 1]} : vector<8x384xf32> to vector<8x256xf32>
    %463 = vector.extract_strided_slice %438 {offsets = [0, 384], sizes = [8, 256], strides = [1, 1]} : vector<8x768xf32> to vector<8x256xf32>
    %464 = arith.addf %462, %463 : vector<8x256xf32>
    %465 = arith.negf %464 : vector<8x256xf32>
    %466 = math.exp %465 : vector<8x256xf32>
    %cst_91 = arith.constant 1.000000e+00 : f32
    %467 = vector.broadcast %cst_91 : f32 to vector<8x256xf32>
    %468 = arith.addf %467, %466 : vector<8x256xf32>
    %469 = arith.divf %467, %468 : vector<8x256xf32>
    %470 = vector.extract_strided_slice %469 {offsets = [0, 0], sizes = [8, 128], strides = [1, 1]} : vector<8x256xf32> to vector<8x128xf32>
    %471 = vector.extract_strided_slice %469 {offsets = [0, 128], sizes = [8, 128], strides = [1, 1]} : vector<8x256xf32> to vector<8x128xf32>
    %472 = vector.extract_strided_slice %461 {offsets = [0, 256], sizes = [8, 128], strides = [1, 1]} : vector<8x384xf32> to vector<8x128xf32>
    %473 = vector.extract_strided_slice %438 {offsets = [0, 640], sizes = [8, 128], strides = [1, 1]} : vector<8x768xf32> to vector<8x128xf32>
    %474 = arith.addf %473, %30 : vector<8x128xf32>
    %475 = arith.mulf %470, %474 : vector<8x128xf32>
    %476 = arith.addf %472, %475 : vector<8x128xf32>
    %477 = math.tanh %476 : vector<8x128xf32>
    %cst_92 = arith.constant 1.000000e+00 : f32
    %478 = vector.broadcast %cst_92 : f32 to vector<8x128xf32>
    %479 = arith.subf %478, %471 : vector<8x128xf32>
    %480 = arith.mulf %479, %477 : vector<8x128xf32>
    %481 = arith.mulf %471, %433 : vector<8x128xf32>
    %482 = arith.addf %480, %481 : vector<8x128xf32>
    %483 = arith.addi %31, %c7_i32 : i32
    %484 = vector.broadcast %483 : i32 to vector<8x128xi32>
    %485 = arith.cmpi slt, %484, %19 : vector<8x128xi32>
    %486 = arith.select %485, %459, %432 : vector<8x128xi1>, vector<8x128xf32>
    %487 = arith.select %485, %482, %433 : vector<8x128xi1>, vector<8x128xf32>
    %488 = tpu.concatenate %486, %487 in 1 : vector<8x128xf32>, vector<8x128xf32> -> vector<8x256xf32>
    %c8_i32_93 = arith.constant 8 : i32
    %c0_94 = arith.constant 0 : index
    %c0_95 = arith.constant 0 : index
    %489 = vector.load %arg17[%c0_94, %c0_95] : memref<8x256xf32, #tpu.memory_space<vmem>>, vector<8x256xf32>
    tpu.vector_store %arg17[%c0_94, %c0_95], %488 {strides = array<i32>} : memref<8x256xf32, #tpu.memory_space<vmem>>, vector<8x256xf32>,
    %c0_i32_96 = arith.constant 0 : i32
    %490 = arith.cmpi eq, %arg0, %c0_i32_96 : i32
    %491 = arith.extui %490 : i1 to i32
    %c0_i32_97 = arith.constant 0 : i32
    %492 = arith.cmpi ne, %491, %c0_i32_97 : i32
    scf.if %492 {
      %493 = vector.extract_strided_slice %488 {offsets = [0, 128], sizes = [8, 128], strides = [1, 1]} : vector<8x256xf32> to vector<8x128xf32>
      %c0_98 = arith.constant 0 : index
      %c0_99 = arith.constant 0 : index
      %494 = vector.load %arg12[%c0_98, %c0_99] : memref<128x32xf32, #tpu.memory_space<vmem>>, vector<128x32xf32>
      %cst_100 = arith.constant dense<0.000000e+00> : vector<8x32xf32>
      %495 = tpu.matmul %493, %494, %cst_100 {dimension_numbers = #tpu.dot_dimension_numbers<[1], [0], [0], [1], [0, 0, 1, 1], [], []>} : vector<8x128xf32>, vector<128x32xf32>, vector<8x32xf32> -> vector<8x32xf32>
      %c0_101 = arith.constant 0 : index
      %c0_102 = arith.constant 0 : index
      %496 = vector.load %arg13[%c0_101, %c0_102] : memref<1x32xf32, #tpu.memory_space<vmem>>, vector<1x32xf32>
      %497 = vector.broadcast %496 : vector<1x32xf32> to vector<8x32xf32>
      %498 = arith.addf %495, %497 : vector<8x32xf32>
      %cst_103 = arith.constant 0.000000e+00 : f32
      %499 = vector.broadcast %cst_103 : f32 to vector<8x32xf32>
      %500 = arith.maximumf %498, %499 : vector<8x32xf32>
      %c0_104 = arith.constant 0 : index
      %c0_105 = arith.constant 0 : index
      %501 = vector.load %arg14[%c0_104, %c0_105] : memref<32x4xf32, #tpu.memory_space<vmem>>, vector<32x4xf32>
      %cst_106 = arith.constant dense<0.000000e+00> : vector<8x4xf32>
      %502 = tpu.matmul %500, %501, %cst_106 {dimension_numbers = #tpu.dot_dimension_numbers<[1], [0], [0], [1], [0, 0, 1, 1], [], []>} : vector<8x32xf32>, vector<32x4xf32>, vector<8x4xf32> -> vector<8x4xf32>
      %c0_107 = arith.constant 0 : index
      %c0_108 = arith.constant 0 : index
      %503 = vector.load %arg15[%c0_107, %c0_108] : memref<1x4xf32, #tpu.memory_space<vmem>>, vector<1x4xf32>
      %504 = vector.broadcast %503 : vector<1x4xf32> to vector<8x4xf32>
      %505 = arith.addf %502, %504 : vector<8x4xf32>
      %cst_109 = arith.constant dense<0xFF800000> : vector<8xf32>
      %506 = vector.multi_reduction <maximumf>, %505, %cst_109 [1] : vector<8x4xf32> to vector<8xf32>
      %507 = vector.shape_cast %506 : vector<8xf32> to vector<8x1xf32>
      %508 = vector.broadcast %507 : vector<8x1xf32> to vector<8x4xf32>
      %509 = arith.subf %505, %508 : vector<8x4xf32>
      %510 = math.exp %509 : vector<8x4xf32>
      %cst_110 = arith.constant dense<0.000000e+00> : vector<8xf32>
      %511 = vector.multi_reduction <add>, %510, %cst_110 [1] : vector<8x4xf32> to vector<8xf32>
      %512 = vector.shape_cast %511 : vector<8xf32> to vector<8x1xf32>
      %513 = math.log %512 : vector<8x1xf32>
      %514 = vector.broadcast %513 : vector<8x1xf32> to vector<8x4xf32>
      %515 = arith.subf %509, %514 : vector<8x4xf32>
      %c0_111 = arith.constant 0 : index
      %c0_112 = arith.constant 0 : index
      %516 = vector.load %arg16[%c0_111, %c0_112] : memref<8x4xf32, #tpu.memory_space<vmem>>, vector<8x4xf32>
      tpu.vector_store %arg16[%c0_111, %c0_112], %515 {strides = array<i32>} : memref<8x4xf32, #tpu.memory_space<vmem>>, vector<8x4xf32>,
    } else {
    }
    return
  }
  func.func @transform_0(%arg0: i32) -> (i32, i32) {
    %c0_i32 = arith.constant 0 : i32
    %c0_i32_0 = arith.constant 0 : i32
    return %arg0, %c0_i32 : i32, i32
  }
  func.func @transform_1(%arg0: i32) -> (i32, i32) {
    %c0_i32 = arith.constant 0 : i32
    %c0_i32_0 = arith.constant 0 : i32
    %c0_i32_1 = arith.constant 0 : i32
    return %c0_i32, %c0_i32_0 : i32, i32
  }
  func.func @transform_2(%arg0: i32) -> (i32, i32) {
    %c0_i32 = arith.constant 0 : i32
    %c0_i32_0 = arith.constant 0 : i32
    %c0_i32_1 = arith.constant 0 : i32
    return %c0_i32, %c0_i32_0 : i32, i32
  }
  func.func @transform_3(%arg0: i32) -> (i32, i32) {
    %c0_i32 = arith.constant 0 : i32
    %c0_i32_0 = arith.constant 0 : i32
    %c0_i32_1 = arith.constant 0 : i32
    return %c0_i32, %c0_i32_0 : i32, i32
  }
  func.func @transform_4(%arg0: i32) -> (i32, i32) {
    %c0_i32 = arith.constant 0 : i32
    %c0_i32_0 = arith.constant 0 : i32
    %c0_i32_1 = arith.constant 0 : i32
    return %c0_i32, %c0_i32_0 : i32, i32
  }
  func.func @transform_5(%arg0: i32) -> (i32, i32) {
    %c0_i32 = arith.constant 0 : i32
    %c0_i32_0 = arith.constant 0 : i32
    %c0_i32_1 = arith.constant 0 : i32
    return %c0_i32, %c0_i32_0 : i32, i32
  }
  func.func @transform_6(%arg0: i32) -> (i32, i32) {
    %c0_i32 = arith.constant 0 : i32
    %c0_i32_0 = arith.constant 0 : i32
    %c0_i32_1 = arith.constant 0 : i32
    return %c0_i32, %c0_i32_0 : i32, i32
  }
  func.func @transform_7(%arg0: i32) -> (i32, i32) {
    %c0_i32 = arith.constant 0 : i32
    %c0_i32_0 = arith.constant 0 : i32
    %c0_i32_1 = arith.constant 0 : i32
    return %c0_i32, %c0_i32_0 : i32, i32
  }
  func.func @transform_8(%arg0: i32) -> (i32, i32) {
    %c0_i32 = arith.constant 0 : i32
    %c0_i32_0 = arith.constant 0 : i32
    %c0_i32_1 = arith.constant 0 : i32
    return %c0_i32, %c0_i32_0 : i32, i32
  }
  func.func @transform_9(%arg0: i32) -> (i32, i32) {
    %c0_i32 = arith.constant 0 : i32
    %c0_i32_0 = arith.constant 0 : i32
    %c0_i32_1 = arith.constant 0 : i32
    return %c0_i32, %c0_i32_0 : i32, i32
  }
  func.func @transform_10(%arg0: i32) -> (i32, i32) {
    %c0_i32 = arith.constant 0 : i32
    %c0_i32_0 = arith.constant 0 : i32
    %c0_i32_1 = arith.constant 0 : i32
    return %c0_i32, %c0_i32_0 : i32, i32
  }
  func.func @transform_11(%arg0: i32) -> (i32, i32) {
    %c0_i32 = arith.constant 0 : i32
    %c0_i32_0 = arith.constant 0 : i32
    %c0_i32_1 = arith.constant 0 : i32
    return %c0_i32, %c0_i32_0 : i32, i32
  }
  func.func @transform_12(%arg0: i32) -> (i32, i32) {
    %c0_i32 = arith.constant 0 : i32
    %c0_i32_0 = arith.constant 0 : i32
    %c0_i32_1 = arith.constant 0 : i32
    return %c0_i32, %c0_i32_0 : i32, i32
  }
  func.func @transform_13(%arg0: i32) -> (i32, i32) {
    %c0_i32 = arith.constant 0 : i32
    %c0_i32_0 = arith.constant 0 : i32
    %c0_i32_1 = arith.constant 0 : i32
    return %c0_i32, %c0_i32_0 : i32, i32
  }
  func.func @transform_14(%arg0: i32) -> (i32, i32) {
    %c0_i32 = arith.constant 0 : i32
    %c0_i32_0 = arith.constant 0 : i32
    %c0_i32_1 = arith.constant 0 : i32
    return %c0_i32, %c0_i32_0 : i32, i32
  }
  func.func @transform_15(%arg0: i32) -> (i32, i32) {
    %c0_i32 = arith.constant 0 : i32
    %c0_i32_0 = arith.constant 0 : i32
    %c0_i32_1 = arith.constant 0 : i32
    return %c0_i32, %c0_i32_0 : i32, i32
  }
}

</mosaic_0001>

<bundles_post_ra>
// kernel: tpu_custom_call.1
= control target key start
LH: loop header
LB: loop body
LE: loop exit
PB: predicated region body
PF: predicated region fallthrough
CT: control target
= control target key end

     0   :  { %20 = vsyncpa [#allocation5], 0  ;;  %s9173_s0 = inlined_call_operand.vmem [shape: f32[64,32], index: 0, kind: input, shape index: {}]   ;;  %s9174_s1 = inlined_call_operand.vmem [shape: s32[8,1], index: 1, kind: input, shape index: {}]   ;;  %s9175_s2 = inlined_call_operand.vmem [shape: f32[32,32], index: 2, kind: input, shape index: {}]   ;;  %s9176_s3 = inlined_call_operand.vmem [shape: f32[1,32], index: 3, kind: input, shape index: {}]   ;;  %s9177_s4 = inlined_call_operand.vmem [shape: f32[32,384], index: 4, kind: input, shape index: {}]   ;;  %s9178_s5 = inlined_call_operand.hbm [shape: f32[256,768], index: 5, kind: input, shape index: {}]   ;;  %s9179_s6 = inlined_call_operand.vmem [shape: f32[1,384], index: 6, kind: input, shape index: {}]   ;;  %s9180_s7 = inlined_call_operand.vmem [shape: f32[1,128], index: 7, kind: input, shape index: {}]   ;;  %s9181_s8 = inlined_call_operand.hbm [shape: f32[128,384], index: 8, kind: input, shape index: {}]   ;;  %s9182_s9 = inlined_call_operand.vmem [shape: f32[1,384], index: 9, kind: input, shape index: {}]   ;;  %s9183_s10 = inlined_call_operand.vmem [shape: f32[1,128], index: 10, kind: input, shape index: {}]   ;;  %s9184_s11 = inlined_call_operand.vmem [shape: f32[128,32], index: 11, kind: input, shape index: {}]   ;;  %s9185_s12 = inlined_call_operand.vmem [shape: f32[1,32], index: 12, kind: input, shape index: {}]   ;;  %s9186_s13 = inlined_call_operand.vmem [shape: f32[32,4], index: 13, kind: input, shape index: {}]   ;;  %s9187_s14 = inlined_call_operand.vmem [shape: f32[1,4], index: 14, kind: input, shape index: {}]   ;;  %s9188_s15 = inlined_call_operand.vmem [shape: f32[8,4], index: 15, kind: output, shape index: {}]  }
   0x1   :  { %21 = vsyncpa [#allocation7], 0  ;;  %s7216_s18 = smov [#allocation4]   ;;  %s7168_s22 = scalar_lea.hbm %s9178_s5, 24576 }
   0x2   :  { %s37_s19 = sshll.u32 %s7216_s18, 4  ;;  %p7169_p0 = scmp.ne.s32.totalorder %s9178_s5, %s7168_s22  ;;  %s38_s19 = int_to_ptr.vmem [resolvable:$true] %s37_s19 }
   0x3   :  { %p7172_p1 = scmp.lt.u32.totalorder %s7168_s22, %s9178_s5 }
   0x5   :  { %p7174_p2 = pnand %p7172_p1, %p7169_p0 }
   0x7   :  { %7177 = shalt.err (!%p7174_p2)
}
   0x8   :  { %s7178_s27 = scalar_lea.vmem %s38_s19, 24576  ;;  %p7183_p4 = scmp.lt.s32.totalorder %s38_s19, %s38_s19 }
   0x9   :  { %p7179_p3 = scmp.ne.s32.totalorder %s38_s19, %s7178_s27  ;;  %p7184_p5 = scmp.lt.s32.totalorder %s7178_s27, %s7178_s27 }
   0xb   :  { %p7185_p6 = por %p7184_p5, %p7183_p4 }
   0xd   :  { %p7186_p7 = pnand %p7185_p6, %p7179_p3 }
   0xf   :  { %7189 = shalt.err (!%p7186_p7)
}
  0x10   :  { %s7217_s28 = smov 768   ;;  %s7218_s29 = smov 48  }
  0x11   :  { %43 = dma.hbm_to_vmem [thread:$0]  %s9178_s5, 24576, %s38_s19, [#allocation5], %s7217_s28, %s7217_s28, %s7218_s29  }
  0x12   :  { %s7219_s17 = smov [#allocation6]   ;;  %s7190_s22 = scalar_lea.hbm %s9181_s8, 6144 }
  0x13   :  { %s53_s18 = sshll.u32 %s7219_s17, 4  ;;  %p7191_p8 = scmp.ne.s32.totalorder %s9181_s8, %s7190_s22  ;;  %s54_s18 = int_to_ptr.vmem [resolvable:$true] %s53_s18 }
  0x14   :  { %p7194_p9 = scmp.lt.u32.totalorder %s7190_s22, %s9181_s8 }
  0x16   :  { %p7196_p10 = pnand %p7194_p9, %p7191_p8 }
  0x18   :  { %7199 = shalt.err (!%p7196_p10)
}
  0x19   :  { %s7200_s27 = scalar_lea.vmem %s54_s18, 6144  ;;  %p7205_p12 = scmp.lt.s32.totalorder %s54_s18, %s54_s18 }
  0x1a   :  { %p7201_p11 = scmp.ne.s32.totalorder %s54_s18, %s7200_s27  ;;  %p7206_p13 = scmp.lt.s32.totalorder %s7200_s27, %s7200_s27 }
  0x1c   :  { %p7207_p0 = por %p7206_p13, %p7205_p12 }
  0x1e   :  { %p7208_p1 = pnand %p7207_p0, %p7201_p11 }
  0x20   :  { %7211 = shalt.err (!%p7208_p1)
}
  0x21   :  { %s7220_s5 = smov 384   ;;  %s7221_s19 = smov 24  }
  0x22   :  { %59 = dma.hbm_to_vmem [thread:$0]  %s9181_s8, 6144, %s54_s18, [#allocation7], %s7220_s5, %s7220_s5, %s7221_s19  }
  0x23   :  { %7212 = dma.done.wait [#allocation5], 24576  }
  0x24   :  { %7213 = vsyncadd [#allocation5], 4294942720 }
  0x25   :  { %7214 = dma.done.wait [#allocation7], 6144  }
  0x26   :  { %7215 = vsyncadd [#allocation7], 4294961152  ;;  %vm103_vm0 = vcmask 261120   ;;  %v92_v0 = vld [vmem:[%s9175_s2] sm:$0xff]  ;;  %v93_v1 = vld [vmem:[%s9175_s2 + $0x8] sm:$0xff]  ;;  %v9189_v35 = vmov 0.0  }
  0x27   :  { %v94_v2 = vld [vmem:[%s9175_s2 + $0x10] sm:$0xff]  ;;  %v4919_v3 = vpack.c.bf16 %v93_v1, %v92_v0  ;;  %v95_v4 = vld [vmem:[%s9175_s2 + $0x18] sm:$0xff]  ;;  %v84_v5 = vld [vmem:[%s9173_s0] sm:$0xff]  ;;  %358 = vmatprep.mubr.f32.mxu1 %v9189_v35  ;;  %v7223_v39 = vmov 0   ;;  %vm7225_vm1 = vmmov 0   ;;  %vm4268_vm10 = vcmask 31744  }
  0x28   :  { %v4923_v6 = vpack.c.bf16 %v95_v4, %v94_v2  ;;  %4561 = vmatprep.mubr.msk.f32.mxu0 %vm103_vm0, %v84_v5  ;;  %v242_v7 = vld [vmem:[%s9177_s4 + $0x8] sm:$0xff]  ;;  %v245_v8 = vld [vmem:[%s9177_s4 + $0x20] sm:$0xff]  ;;  %v244_v11 = vld [vmem:[%s9177_s4 + $0x18] sm:$0xff]  ;;  %6999 = vset.pattern.permute.xlu0 %v7223_v39 }
  0x29   :  { %4920 = vmatprep.subr.bf16.mxu0 %v4919_v3  ;;  %v241_v9 = vld [vmem:[%s9177_s4] sm:$0xff]  ;;  %v4927_v10 = vpack.c.bf16 %v245_v8, %v242_v7  ;;  %v243_v12 = vld [vmem:[%s9177_s4 + $0x10] sm:$0xff]  ;;  %v246_v13 = vld [vmem:[%s9177_s4 + $0x28] sm:$0xff] }
  0x2a   :  { %4922 = vmatpush3.bf16.msra.mxu0 %v4919_v3  ;;  %v4929_v14 = vpack.c.bf16 %v244_v11, %v241_v9  ;;  %v4935_v15 = vpack.c.bf16 %v246_v13, %v243_v12  ;;  %v85_v16 = vld [vmem:[%s9173_s0 + $0x8] sm:$0xff]  ;;  %v86_v17 = vld [vmem:[%s9173_s0 + $0x10] sm:$0xff]  ;;  %v87_v18 = vld [vmem:[%s9173_s0 + $0x18] sm:$0xff] }
  0x2b   :  { %4924 = vmatprep.subr.bf16.mxu0 %v4923_v6  ;;  %4928 = vmatprep.subr.bf16.mxu1 %v4927_v10  ;;  %v88_v19 = vld [vmem:[%s9173_s0 + $0x20] sm:$0xff]  ;;  %v89_v20 = vld [vmem:[%s9173_s0 + $0x28] sm:$0xff]  ;;  %v90_v21 = vld [vmem:[%s9173_s0 + $0x30] sm:$0xff] }
  0x2c   :  { %4930 = vmatpush1.bf16.msra.mxu1 %v4929_v14  ;;  %v91_v22 = vld [vmem:[%s9173_s0 + $0x38] sm:$0xff]  ;;  %v251_v24 = vld [vmem:[%s9177_s4 + $0x50] sm:$0xff]  ;;  %v250_v27 = vld [vmem:[%s9177_s4 + $0x48] sm:$0xff] }
  0x2d   :  { %v248_v23 = vld [vmem:[%s9177_s4 + $0x38] sm:$0xff]  ;;  %v247_v26 = vld [vmem:[%s9177_s4 + $0x30] sm:$0xff]  ;;  %v249_v29 = vld [vmem:[%s9177_s4 + $0x40] sm:$0xff] }
  0x2e   :  { %4926 = vmatpush3.bf16.msra.mxu0 %v4923_v6  ;;  %v4931_v25 = vpack.c.bf16 %v251_v24, %v248_v23  ;;  %v4933_v28 = vpack.c.bf16 %v250_v27, %v247_v26  ;;  %v252_v30 = vld [vmem:[%s9177_s4 + $0x58] sm:$0xff]  ;;  %v541_v32 = vld [vmem:[#allocation4 + $0x8] sm:$0xff]  ;;  %v536_v40 = vld [vmem:[%s9174_s1] sm:$0xff] }
  0x2f   :  { %4936 = vmatprep.subr.bf16.mxu0 %v4935_v15  ;;  %v4939_v31 = vpack.c.bf16 %v252_v30, %v249_v29  ;;  %v547_v33 = vld [vmem:[#allocation4 + $0x38] sm:$0xff]  ;;  %v549_v37 = vld [vmem:[#allocation4 + $0x48] sm:$0xff]  ;;  %538 = vperm.xlu0 %6999, %v536_v40   ;;  %v7423_v41 = vld [vmem:[%s9176_s3] ss:$0 sm:$0xff] }
  0x30   :  { %4932 = vmatprep.subr.bf16.mxu1 %v4931_v25  ;;  %v7410_v34 = vpack.c.bf16 %v547_v33, %v541_v32  ;;  %v543_v36 = vld [vmem:[#allocation4 + $0x18] sm:$0xff]  ;;  %v540_v43 = vld [vmem:[#allocation4] sm:$0xff]  ;;  %v546_v44 = vld [vmem:[#allocation4 + $0x30] sm:$0xff] }
  0x31   :  { %4562 = vmatmul.mubr.msk.f32.vlgmr.msra.gmra.mrb[0].mxu0 %vm103_vm0, %v85_v16  ;;  %4934 = vmatpush1.bf16.msra.mxu1 %v4933_v28  ;;  %v7414_v38 = vpack.c.bf16 %v549_v37, %v543_v36  ;;  %v553_v47 = vld [vmem:[#allocation4 + $0x68] sm:$0xff]  ;;  %v559_v48 = vld [vmem:[#allocation4 + $0x98] sm:$0xff]  ;;  %v542_v50 = vld [vmem:[#allocation4 + $0x10] sm:$0xff]  ;;  %v7427_v52 = vpack.c.bf16 %v546_v44, %v540_v43 }
  0x32   :  { %4564 = vmatprep.mubr.msk.f32.mxu0 %vm103_vm0, %v86_v17  ;;  %4938 = vmatpush3.bf16.msra.mxu0 %v4935_v15  ;;  %9457 = vst [vmem:[#allocation10_spill] sm:$0xff] %v7410_v34  ;;  %v548_v51 = vld [vmem:[#allocation4 + $0x40] sm:$0xff]  ;;  %v555_v53 = vld [vmem:[#allocation4 + $0x78] sm:$0xff]  ;;  %v561_v54 = vld [vmem:[#allocation4 + $0xa8] sm:$0xff]  ;;  %v7429_v56 = vpack.c.bf16 %v559_v48, %v553_v47 }
  0x33   :  { %4940 = vmatprep.subr.bf16.mxu0 %v4939_v31  ;;  %4944 = vmatprep.subr.bf16.mxu1 %v7410_v34  ;;  %9458 = vst [vmem:[#allocation11_spill] sm:$0xff] %v7414_v38  ;;  %9459 = vst [vmem:[#allocation12_spill] sm:$0xff] %v7427_v52  ;;  %v552_v57 = vld [vmem:[#allocation4 + $0x60] sm:$0xff]  ;;  %v558_v58 = vld [vmem:[#allocation4 + $0x90] sm:$0xff]  ;;  %v7431_v63 = vpack.c.bf16 %v548_v51, %v542_v50  ;;  %v7435_v1 = vpack.c.bf16 %v561_v54, %v555_v53 }
  0x34   :  { %9460 = vst [vmem:[#allocation13_spill] sm:$0xff] %v7429_v56  ;;  %v565_v61 = vld [vmem:[#allocation4 + $0xc8] sm:$0xff]  ;;  %v571_v62 = vld [vmem:[#allocation4 + $0xf8] sm:$0xff]  ;;  %v554_v3 = vld [vmem:[#allocation4 + $0x70] sm:$0xff]  ;;  %v7440_v5 = vpack.c.bf16 %v558_v58, %v552_v57 }
  0x35   :  { %4565 = vmatmul.mubr.msk.f32.gmra.mrb[2].mxu0 %vm103_vm0, %v87_v18  ;;  %9461 = vst [vmem:[#allocation14_spill] sm:$0xff] %v7431_v63  ;;  %9462 = vst [vmem:[#allocation15_spill] sm:$0xff] %v7435_v1  ;;  %v560_v4 = vld [vmem:[#allocation4 + $0xa0] sm:$0xff]  ;;  %v567_v6 = vld [vmem:[#allocation4 + $0xd8] sm:$0xff]  ;;  %v7444_v8 = vpack.c.bf16 %v571_v62, %v565_v61 }
  0x36   :  { %4567 = vmatprep.mubr.msk.f32.mxu0 %vm103_vm0, %v88_v19  ;;  %4942 = vmatpush3.bf16.msra.mxu0 %v4939_v31  ;;  %9463 = vst [vmem:[#allocation16_spill] sm:$0xff] %v7440_v5  ;;  %v573_v7 = vld [vmem:[#allocation4 + $0x108] sm:$0xff]  ;;  %v564_v9 = vld [vmem:[#allocation4 + $0xc0] sm:$0xff]  ;;  %v570_v10 = vld [vmem:[#allocation4 + $0xf0] sm:$0xff]  ;;  %v7448_v15 = vpack.c.bf16 %v560_v4, %v554_v3 }
  0x37   :  { %5008 = vmatprep.subr.bf16.mxu0 %v7414_v38  ;;  %9464 = vst [vmem:[#allocation17_spill] sm:$0xff] %v7444_v8  ;;  %v577_v13 = vld [vmem:[#allocation4 + $0x128] sm:$0xff]  ;;  %v583_v14 = vld [vmem:[#allocation4 + $0x158] sm:$0xff]  ;;  %v7452_v18 = vpack.c.bf16 %v573_v7, %v567_v6  ;;  %v566_v19 = vld [vmem:[#allocation4 + $0xd0] sm:$0xff] }
  0x38   :  { %9465 = vst [vmem:[#allocation18_spill] sm:$0xff] %v7448_v15  ;;  %v585_v23 = vld [vmem:[#allocation4 + $0x168] sm:$0xff]  ;;  %v7460_v25 = vpack.c.bf16 %v583_v14, %v577_v13  ;;  %v576_v26 = vld [vmem:[#allocation4 + $0x120] sm:$0xff]  ;;  %v582_v27 = vld [vmem:[#allocation4 + $0x150] sm:$0xff] }
  0x39   :  { %4568 = vmatmul.mubr.msk.f32.gmra.mrb[4].mxu0 %vm103_vm0, %v89_v20  ;;  %9466 = vst [vmem:[#allocation19_spill] sm:$0xff] %v7452_v18  ;;  %v572_v20 = vld [vmem:[#allocation4 + $0x100] sm:$0xff]  ;;  %v589_v31 = vld [vmem:[#allocation4 + $0x188] sm:$0xff]  ;;  %v595_v32 = vld [vmem:[#allocation4 + $0x1b8] sm:$0xff] }
  0x3a   :  { %4570 = vmatprep.mubr.msk.f32.mxu0 %vm103_vm0, %v90_v21  ;;  %v7455_v21 = vpack.c.bf16 %v570_v10, %v564_v9  ;;  %9468 = vst [vmem:[#allocation21_spill] sm:$0xff] %v7460_v25  ;;  %v7467_v33 = vpack.c.bf16 %v572_v20, %v566_v19  ;;  %v578_v39 = vld [vmem:[#allocation4 + $0x130] sm:$0xff]  ;;  %v584_v40 = vld [vmem:[#allocation4 + $0x160] sm:$0xff]  ;;  %v591_v44 = vld [vmem:[#allocation4 + $0x198] sm:$0xff]  ;;  %v7481_v47 = vpack.c.bf16 %v595_v32, %v589_v31 }
  0x3b   :  { %v588_v48 = vld [vmem:[#allocation4 + $0x180] sm:$0xff]  ;;  %v601_v53 = vld [vmem:[#allocation4 + $0x1e8] sm:$0xff]  ;;  %v607_v54 = vld [vmem:[#allocation4 + $0x218] sm:$0xff] }
  0x3c   :  { %9467 = vst [vmem:[#allocation20_spill] sm:$0xff] %v7455_v21  ;;  %9469 = vst [vmem:[#allocation22_spill] sm:$0xff] %v7467_v33  ;;  %v590_v58 = vld [vmem:[#allocation4 + $0x190] sm:$0xff]  ;;  %v609_v61 = vld [vmem:[#allocation4 + $0x228] sm:$0xff] }
  0x3d   :  { %4571 = vmatmul.mubr.msk.f32.gmra.mrb[6].mxu0 %vm103_vm0, %v91_v22  ;;  %v579_v22 = vld [vmem:[#allocation4 + $0x138] sm:$0xff]  ;;  %9472 = vst [vmem:[#allocation25_spill] sm:$0xff] %v7481_v47  ;;  %v606_v3 = vld [vmem:[#allocation4 + $0x210] sm:$0xff]  ;;  %v613_v6 = vld [vmem:[#allocation4 + $0x248] sm:$0xff] }
  0x3e   :  { %v7471_v37 = vpack.c.bf16 %v585_v23, %v579_v22  ;;  %v619_v7 = vld [vmem:[#allocation4 + $0x278] sm:$0xff]  ;;  %v612_v19 = vld [vmem:[#allocation4 + $0x240] sm:$0xff]  ;;  %v618_v20 = vld [vmem:[#allocation4 + $0x270] sm:$0xff] }
  0x3f   :  { %v615_v14 = vld [vmem:[#allocation4 + $0x258] sm:$0xff]  ;;  %v625_v22 = vld [vmem:[#allocation4 + $0x2a8] sm:$0xff] }
  0x40   :  { %9470 = vst [vmem:[#allocation23_spill] sm:$0xff] %v7471_v37  ;;  %v631_v23 = vld [vmem:[#allocation4 + $0x2d8] sm:$0xff]  ;;  %v633_v31 = vld [vmem:[#allocation4 + $0x2e8] sm:$0xff] }
  0x41   :  { %v7537_v32 = vpack.c.bf16 %v631_v23, %v625_v22  ;;  %v650_v23 = vld [vmem:[#allocation4 + $0x370] sm:$0xff] }
  0x43   :  { %9484 = vst [vmem:[#allocation37_spill] sm:$0xff] %v7537_v32 }
 0x104   :  { %v4563_v42 = vpop.f32.mrb[0].mxu0 }
 0x105   :  { %v200_v45 = vadd.f32 %v4563_v42, %v7423_v41  ;;  %v194_v46 = vpop.f32.mrb[1].mxu0  ;;  %v7474_v42 = vpack.c.bf16 %v582_v27, %v576_v26  ;;  %v614_v27 = vld [vmem:[#allocation4 + $0x250] sm:$0xff] }
 0x106   :  { %v195_v49 = vadd.f32 %v7423_v41, %v194_v46 }
 0x107   :  { %v234_v60 = vmax.f32 %v200_v45, 0.0  ;;  %9471 = vst [vmem:[#allocation24_spill] sm:$0xff] %v7474_v42  ;;  %v597_v45 = vld [vmem:[#allocation4 + $0x1c8] sm:$0xff] }
 0x108   :  { %v233_v55 = vmax.f32 %v195_v49, 0.0  ;;  %v4566_v59 = vpop.f32.mrb[2].mxu0  ;;  %v594_v49 = vld [vmem:[#allocation4 + $0x1b0] sm:$0xff]  ;;  %v7494_v57 = vpack.c.bf16 %v597_v45, %v591_v44 }
 0x109   :  { %v204_v0 = vpop.f32.mrb[3].mxu0  ;;  %v210_v11 = vadd.f32 %v4566_v59, %v7423_v41  ;;  %v596_v59 = vld [vmem:[#allocation4 + $0x1c0] sm:$0xff] }
 0x10a   :  { %4304 = vmatmul.mubr.msk.f32.vlgmr.msra.gmra.mrb[0].mxu1 %vm103_vm0, %v233_v55  ;;  %4581 = vmatprep.mubr.msk.f32.mxu0 %vm103_vm0, %v233_v55  ;;  %v205_v2 = vadd.f32 %v7423_v41, %v204_v0  ;;  %v7489_v55 = vpack.c.bf16 %v584_v40, %v578_v39  ;;  %9474 = vst [vmem:[#allocation27_spill] sm:$0xff] %v7494_v57  ;;  %v630_v39 = vld [vmem:[#allocation4 + $0x2d0] sm:$0xff]  ;;  %v637_v40 = vld [vmem:[#allocation4 + $0x308] sm:$0xff] }
 0x10b   :  { %4946 = vmatpush1.bf16.msra.mxu1 %v7427_v52  ;;  %4582 = vmatmul.mubr.msk.f32.vlgmr.msra.gmra.mrb[8].mxu0 %vm103_vm0, %v234_v60  ;;  %v236_v28 = vmax.f32 %v210_v11, 0.0  ;;  %v7502_v0 = vpack.c.bf16 %v607_v54, %v601_v53  ;;  %v7507_v9 = vpack.c.bf16 %v596_v59, %v590_v58  ;;  %v602_v11 = vld [vmem:[#allocation4 + $0x1f0] sm:$0xff]  ;;  %v645_v53 = vld [vmem:[#allocation4 + $0x348] sm:$0xff]  ;;  %v636_v58 = vld [vmem:[#allocation4 + $0x300] sm:$0xff] }
 0x10c   :  { %364 = vmatprep.mubr.f32.mxu1 %v9189_v35  ;;  %4948 = vmatprep.subr.bf16.mxu1 %v7429_v56  ;;  %v4569_v12 = vpop.f32.mrb[4].mxu0  ;;  %v235_v17 = vmax.f32 %v205_v2, 0.0  ;;  %9473 = vst [vmem:[#allocation26_spill] sm:$0xff] %v7489_v55  ;;  %v600_v2 = vld [vmem:[#allocation4 + $0x1e0] sm:$0xff]  ;;  %v642_v59 = vld [vmem:[#allocation4 + $0x330] sm:$0xff] }
 0x10d   :  { %5010 = vmatpush1.bf16.msra.mxu0 %v7431_v63  ;;  %v214_v16 = vpop.f32.mrb[5].mxu0  ;;  %v7463_v29 = vadd.f32 %v4569_v12, %v7423_v41  ;;  %9476 = vst [vmem:[#allocation29_spill] sm:$0xff] %v7502_v0  ;;  %9477 = vst [vmem:[#allocation30_spill] sm:$0xff] %v7507_v9  ;;  %v608_v12 = vld [vmem:[#allocation4 + $0x220] sm:$0xff]  ;;  %v7515_v13 = vpack.c.bf16 %v606_v3, %v600_v2  ;;  %v638_v3 = vld [vmem:[#allocation4 + $0x310] sm:$0xff] }
 0x10e   :  { %4305 = vmatmul.mubr.msk.f32.gmra.mrb[2].mxu1 %vm103_vm0, %v234_v60  ;;  %5012 = vmatprep.subr.bf16.mxu0 %v7435_v1  ;;  %v215_v24 = vadd.f32 %v7423_v41, %v214_v16  ;;  %v603_v60 = vld [vmem:[#allocation4 + $0x1f8] sm:$0xff]  ;;  %v621_v16 = vld [vmem:[#allocation4 + $0x288] sm:$0xff] }
 0x10f   :  { %4950 = vmatpush1.bf16.msra.mxu1 %v7440_v5  ;;  %370 = vmatprep.mubr.f32.mxu1 %v9189_v35  ;;  %v238_v50 = vmax.f32 %v7463_v29, 0.0  ;;  %v7512_v10 = vpack.c.bf16 %v609_v61, %v603_v60  ;;  %9479 = vst [vmem:[#allocation32_spill] sm:$0xff] %v7515_v13  ;;  %v7530_v26 = vpack.c.bf16 %v621_v16, %v615_v14  ;;  %v649_v60 = vld [vmem:[#allocation4 + $0x368] sm:$0xff]  ;;  %v655_v61 = vld [vmem:[#allocation4 + $0x398] sm:$0xff]  ;;  %v648_v16 = vld [vmem:[#allocation4 + $0x360] sm:$0xff] }
 0x110   :  { %4952 = vmatprep.subr.bf16.mxu1 %v7444_v8  ;;  %4584 = vmatprep.mubr.msk.f32.mxu0 %vm103_vm0, %v235_v17  ;;  %v4572_v30 = vpop.f32.mrb[6].mxu0  ;;  %v237_v43 = vmax.f32 %v215_v24, 0.0  ;;  %v7525_v24 = vpack.c.bf16 %v608_v12, %v602_v11  ;;  %v7533_v29 = vpack.c.bf16 %v618_v20, %v612_v19  ;;  %v651_v11 = vld [vmem:[#allocation4 + $0x378] sm:$0xff]  ;;  %v657_v12 = vld [vmem:[#allocation4 + $0x3a8] sm:$0xff]  ;;  %v7567_v14 = vpack.c.bf16 %v655_v61, %v649_v60 }
 0x111   :  { %5014 = vmatpush1.bf16.msra.mxu0 %v7448_v15  ;;  %v224_v36 = vpop.f32.mrb[7].mxu0  ;;  %v7486_v51 = vadd.f32 %v4572_v30, %v7423_v41  ;;  %9478 = vst [vmem:[#allocation31_spill] sm:$0xff] %v7512_v10  ;;  %9482 = vst [vmem:[#allocation35_spill] sm:$0xff] %v7530_v26  ;;  %v627_v30 = vld [vmem:[#allocation4 + $0x2b8] sm:$0xff]  ;;  %v661_v19 = vld [vmem:[#allocation4 + $0x3c8] sm:$0xff]  ;;  %v7573_v22 = vpack.c.bf16 %v657_v12, %v651_v11 }
 0x112   :  { %5016 = vmatprep.subr.bf16.mxu0 %v7452_v18  ;;  %4306 = vmatmul.mubr.msk.f32.gmra.mrb[4].mxu1 %vm103_vm0, %v235_v17  ;;  %v7478_v46 = vadd.f32 %v7423_v41, %v224_v36  ;;  %v7497_v41 = vpack.c.bf16 %v594_v49, %v588_v48  ;;  %v7519_v17 = vpack.c.bf16 %v619_v7, %v613_v6  ;;  %v624_v36 = vld [vmem:[#allocation4 + $0x2a0] sm:$0xff]  ;;  %v675_v60 = vld [vmem:[#allocation4 + $0x438] sm:$0xff]  ;;  %v681_v61 = vld [vmem:[#allocation4 + $0x468] sm:$0xff] }
 0x113   :  { %4954 = vmatpush1.bf16.msra.mxu1 %v7455_v21  ;;  %376 = vmatprep.mubr.f32.mxu1 %v9189_v35  ;;  %v240_v4 = vmax.f32 %v7486_v51, 0.0  ;;  %9481 = vst [vmem:[#allocation34_spill] sm:$0xff] %v7525_v24  ;;  %9483 = vst [vmem:[#allocation36_spill] sm:$0xff] %v7533_v29  ;;  %v7544_v45 = vpack.c.bf16 %v633_v31, %v627_v30  ;;  %v632_v48 = vld [vmem:[#allocation4 + $0x2e0] sm:$0xff]  ;;  %v7547_v49 = vpack.c.bf16 %v630_v39, %v624_v36  ;;  %v654_v51 = vld [vmem:[#allocation4 + $0x390] sm:$0xff] }
 0x114   :  { %4956 = vmatprep.subr.bf16.mxu1 %v7460_v25  ;;  %4585 = vmatmul.mubr.msk.f32.gmra.mrb[10].mxu0 %vm103_vm0, %v236_v28  ;;  %9475 = vst [vmem:[#allocation28_spill] sm:$0xff] %v7497_v41  ;;  %v239_v62 = vmax.f32 %v7478_v46, 0.0  ;;  %9480 = vst [vmem:[#allocation33_spill] sm:$0xff] %v7519_v17  ;;  %v626_v46 = vld [vmem:[#allocation4 + $0x2b0] sm:$0xff]  ;;  %v644_v6 = vld [vmem:[#allocation4 + $0x340] sm:$0xff]  ;;  %v7563_v7 = vpack.c.bf16 %v642_v59, %v636_v58 }
 0x115   :  { %5018 = vmatpush1.bf16.msra.mxu0 %v7467_v33  ;;  %4587 = vmatprep.mubr.msk.f32.mxu0 %vm103_vm0, %v237_v43  ;;  %9486 = vst [vmem:[#allocation39_spill] sm:$0xff] %v7544_v45  ;;  %9487 = vst [vmem:[#allocation40_spill] sm:$0xff] %v7547_v49  ;;  %v7570_v20 = vpack.c.bf16 %v644_v6, %v638_v3  ;;  %v663_v30 = vld [vmem:[#allocation4 + $0x3d8] sm:$0xff]  ;;  %v669_v31 = vld [vmem:[#allocation4 + $0x408] sm:$0xff] }
 0x116   :  { %5020 = vmatprep.subr.bf16.mxu0 %v7471_v37  ;;  %4307 = vmatmul.mubr.msk.f32.gmra.mrb[6].mxu1 %vm103_vm0, %v236_v28  ;;  %v620_v28 = vld [vmem:[#allocation4 + $0x280] sm:$0xff]  ;;  %9491 = vst [vmem:[#allocation44_spill] sm:$0xff] %v7563_v7  ;;  %9492 = vst [vmem:[#allocation45_spill] sm:$0xff] %v7567_v14  ;;  %v678_v11 = vld [vmem:[#allocation4 + $0x450] sm:$0xff] }
 0x117   :  { %4958 = vmatpush1.bf16.msra.mxu1 %v7474_v42  ;;  %382 = vmatprep.mubr.f32.mxu1 %v9189_v35  ;;  %v7540_v44 = vpack.c.bf16 %v620_v28, %v614_v27  ;;  %9493 = vst [vmem:[#allocation46_spill] sm:$0xff] %v7570_v20  ;;  %9494 = vst [vmem:[#allocation47_spill] sm:$0xff] %v7573_v22  ;;  %v656_v27 = vld [vmem:[#allocation4 + $0x3a0] sm:$0xff]  ;;  %v7576_v28 = vpack.c.bf16 %v654_v51, %v648_v16  ;;  %v685_v12 = vld [vmem:[#allocation4 + $0x488] sm:$0xff] }
 0x118   :  { %4960 = vmatprep.subr.bf16.mxu1 %v7481_v47  ;;  %4588 = vmatmul.mubr.msk.f32.gmra.mrb[12].mxu0 %vm103_vm0, %v238_v50  ;;  %v660_v39 = vld [vmem:[#allocation4 + $0x3c0] sm:$0xff]  ;;  %v691_v16 = vld [vmem:[#allocation4 + $0x4b8] sm:$0xff] }
 0x119   :  { %5022 = vmatpush1.bf16.msra.mxu0 %v7489_v55  ;;  %4590 = vmatprep.mubr.msk.f32.mxu0 %vm103_vm0, %v239_v62  ;;  %9485 = vst [vmem:[#allocation38_spill] sm:$0xff] %v7540_v44  ;;  %9495 = vst [vmem:[#allocation48_spill] sm:$0xff] %v7576_v28  ;;  %v668_v58 = vld [vmem:[#allocation4 + $0x400] sm:$0xff] }
 0x11a   :  { %5024 = vmatprep.subr.bf16.mxu0 %v7494_v57  ;;  %4308 = vmatmul.mubr.msk.f32.gmra.mrb[8].mxu1 %vm103_vm0, %v237_v43  ;;  %v643_v43 = vld [vmem:[#allocation4 + $0x338] sm:$0xff]  ;;  %v672_v6 = vld [vmem:[#allocation4 + $0x420] sm:$0xff] }
 0x11b   :  { %4962 = vmatpush1.bf16.msra.mxu1 %v7497_v41  ;;  %388 = vmatprep.mubr.f32.mxu1 %v9189_v35  ;;  %v7551_v54 = vpack.c.bf16 %v643_v43, %v637_v40  ;;  %v666_v40 = vld [vmem:[#allocation4 + $0x3f0] sm:$0xff]  ;;  %v673_v43 = vld [vmem:[#allocation4 + $0x428] sm:$0xff] }
 0x11c   :  { %4964 = vmatprep.subr.bf16.mxu1 %v7502_v0  ;;  %4591 = vmatmul.mubr.msk.f32.gmra.mrb[14].mxu0 %vm103_vm0, %v240_v4  ;;  %v7588_v59 = vpack.c.bf16 %v666_v40, %v660_v39  ;;  %v7603_v39 = vpack.c.bf16 %v691_v16, %v685_v12  ;;  %v684_v40 = vld [vmem:[#allocation4 + $0x480] sm:$0xff]  ;;  %v699_v12 = vld [vmem:[#allocation4 + $0x4f8] sm:$0xff]  ;;  %v705_v16 = vld [vmem:[#allocation4 + $0x528] sm:$0xff] }
 0x11d   :  { %5026 = vmatpush1.bf16.msra.mxu0 %v7507_v9  ;;  %955 = vmatprep.mubr.f32.mxu0 %v9189_v35  ;;  %9488 = vst [vmem:[#allocation41_spill] sm:$0xff] %v7551_v54 }
 0x11e   :  { %5028 = vmatprep.subr.bf16.mxu0 %v7512_v10  ;;  %4309 = vmatmul.mubr.msk.f32.gmra.mrb[10].mxu1 %vm103_vm0, %v238_v50  ;;  %v639_v50 = vld [vmem:[#allocation4 + $0x318] sm:$0xff]  ;;  %9499 = vst [vmem:[#allocation52_spill] sm:$0xff] %v7588_v59  ;;  %9504 = vst [vmem:[#allocation57_spill] sm:$0xff] %v7603_v39 }
 0x11f   :  { %4966 = vmatpush1.bf16.msra.mxu1 %v7515_v13  ;;  %394 = vmatprep.mubr.f32.mxu1 %v9189_v35  ;;  %v7560_v2 = vpack.c.bf16 %v645_v53, %v639_v50  ;;  %v7585_v50 = vpack.c.bf16 %v669_v31, %v663_v30  ;;  %v662_v53 = vld [vmem:[#allocation4 + $0x3d0] sm:$0xff]  ;;  %v687_v30 = vld [vmem:[#allocation4 + $0x498] sm:$0xff]  ;;  %v693_v31 = vld [vmem:[#allocation4 + $0x4c8] sm:$0xff] }
 0x120   :  { %4968 = vmatprep.subr.bf16.mxu1 %v7519_v17  ;;  %v7594_v51 = vpack.c.bf16 %v668_v58, %v662_v53  ;;  %v703_v53 = vld [vmem:[#allocation4 + $0x518] sm:$0xff] }
 0x121   :  { %5030 = vmatpush1.bf16.msra.mxu0 %v7525_v24  ;;  %9490 = vst [vmem:[#allocation43_spill] sm:$0xff] %v7560_v2  ;;  %9498 = vst [vmem:[#allocation51_spill] sm:$0xff] %v7585_v50 }
 0x122   :  { %5032 = vmatprep.subr.bf16.mxu0 %v7530_v26  ;;  %4310 = vmatmul.mubr.msk.f32.gmra.mrb[12].mxu1 %vm103_vm0, %v239_v62  ;;  %v7554_v62 = vpack.c.bf16 %v632_v48, %v626_v46  ;;  %v679_v46 = vld [vmem:[#allocation4 + $0x458] sm:$0xff]  ;;  %v7582_v48 = vpack.c.bf16 %v656_v27, %v650_v23  ;;  %9501 = vst [vmem:[#allocation54_spill] sm:$0xff] %v7594_v51  ;;  %v680_v23 = vld [vmem:[#allocation4 + $0x460] sm:$0xff] }
 0x123   :  { %4970 = vmatpush1.bf16.msra.mxu1 %v7533_v29  ;;  %400 = vmatprep.mubr.f32.mxu1 %v9189_v35  ;;  %v7591_v3 = vpack.c.bf16 %v679_v46, %v673_v43  ;;  %v7600_v27 = vpack.c.bf16 %v678_v11, %v672_v6  ;;  %v690_v43 = vld [vmem:[#allocation4 + $0x4b0] sm:$0xff]  ;;  %v697_v46 = vld [vmem:[#allocation4 + $0x4e8] sm:$0xff]  ;;  %v692_v6 = vld [vmem:[#allocation4 + $0x4c0] sm:$0xff] }
 0x124   :  { %4972 = vmatprep.subr.bf16.mxu1 %v7537_v32  ;;  %9489 = vst [vmem:[#allocation42_spill] sm:$0xff] %v7554_v62  ;;  %9497 = vst [vmem:[#allocation50_spill] sm:$0xff] %v7582_v48  ;;  %v7612_v11 = vpack.c.bf16 %v690_v43, %v684_v40  ;;  %v698_v40 = vld [vmem:[#allocation4 + $0x4f0] sm:$0xff]  ;;  %v704_v43 = vld [vmem:[#allocation4 + $0x520] sm:$0xff] }
 0x125   :  { %5034 = vmatpush1.bf16.msra.mxu0 %v7540_v44  ;;  %9500 = vst [vmem:[#allocation53_spill] sm:$0xff] %v7591_v3  ;;  %9503 = vst [vmem:[#allocation56_spill] sm:$0xff] %v7600_v27 }
 0x126   :  { %5036 = vmatprep.subr.bf16.mxu0 %v7544_v45  ;;  %4311 = vmatmul.mubr.msk.f32.gmra.mrb[14].mxu1 %vm103_vm0, %v240_v4  ;;  %v667_v4 = vld [vmem:[#allocation4 + $0x3f8] sm:$0xff]  ;;  %9507 = vst [vmem:[#allocation60_spill] sm:$0xff] %v7612_v11 }
 0x127   :  { %4974 = vmatpush1.bf16.msra.mxu1 %v7547_v49  ;;  %884 = vmatprep.mubr.f32.mxu1 %v9189_v35  ;;  %v7579_v36 = vpack.c.bf16 %v667_v4, %v661_v19  ;;  %v7597_v19 = vpack.c.bf16 %v681_v61, %v675_v60  ;;  %v674_v4 = vld [vmem:[#allocation4 + $0x430] sm:$0xff]  ;;  %v7609_v60 = vpack.c.bf16 %v693_v31, %v687_v30 }
 0x128   :  { %4976 = vmatprep.subr.bf16.mxu1 %v7551_v54  ;;  %v7606_v58 = vpack.c.bf16 %v680_v23, %v674_v4  ;;  %v686_v61 = vld [vmem:[#allocation4 + $0x490] sm:$0xff]  ;;  %v7615_v35 = vpack.c.bf16 %v703_v53, %v697_v46  ;;  %v709_v4 = vld [vmem:[#allocation4 + $0x548] sm:$0xff]  ;;  %v715_v23 = vld [vmem:[#allocation4 + $0x578] sm:$0xff]  ;;  %v7621_v31 = vpack.c.bf16 %v705_v16, %v699_v12  ;;  %v7630_v12 = vpack.c.bf16 %v704_v43, %v698_v40 }
 0x129   :  { %5038 = vmatpush1.bf16.msra.mxu0 %v7554_v62  ;;  %9496 = vst [vmem:[#allocation49_spill] sm:$0xff] %v7579_v36  ;;  %9502 = vst [vmem:[#allocation55_spill] sm:$0xff] %v7597_v19  ;;  %v7618_v30 = vpack.c.bf16 %v692_v6, %v686_v61  ;;  %v711_v46 = vld [vmem:[#allocation4 + $0x558] sm:$0xff]  ;;  %v717_v53 = vld [vmem:[#allocation4 + $0x588] sm:$0xff] }
 0x12a   :  { %5040 = vmatprep.subr.bf16.mxu0 %v7560_v2  ;;  %9505 = vst [vmem:[#allocation58_spill] sm:$0xff] %v7606_v58  ;;  %9506 = vst [vmem:[#allocation59_spill] sm:$0xff] %v7609_v60  ;;  %v721_v61 = vld [vmem:[#allocation4 + $0x5a8] sm:$0xff]  ;;  %v727_v6 = vld [vmem:[#allocation4 + $0x5d8] sm:$0xff]  ;;  %v7633_v16 = vpack.c.bf16 %v717_v53, %v711_v46 }
 0x12b   :  { %4978 = vmatpush1.bf16.msra.mxu1 %v7563_v7  ;;  %9508 = vst [vmem:[#allocation61_spill] sm:$0xff] %v7615_v35  ;;  %9509 = vst [vmem:[#allocation62_spill] sm:$0xff] %v7618_v30  ;;  %v720_v2 = vld [vmem:[#allocation4 + $0x5a0] sm:$0xff]  ;;  %v722_v46 = vld [vmem:[#allocation4 + $0x5b0] sm:$0xff] }
 0x12c   :  { %4980 = vmatprep.subr.bf16.mxu1 %v7567_v14  ;;  %9510 = vst [vmem:[#allocation63_spill] sm:$0xff] %v7621_v31  ;;  %9513 = vst [vmem:[#allocation66_spill] sm:$0xff] %v7630_v12  ;;  %v728_v53 = vld [vmem:[#allocation4 + $0x5e0] sm:$0xff]  ;;  %v735_v62 = vld [vmem:[#allocation6 + $0x18] sm:$0xff] }
 0x12d   :  { %5042 = vmatpush1.bf16.msra.mxu0 %v7570_v20  ;;  %9514 = vst [vmem:[#allocation67_spill] sm:$0xff] %v7633_v16  ;;  %v7639_v20 = vpack.c.bf16 %v727_v6, %v721_v61  ;;  %v9521_v61 = vmov 0.0   ;;  %v544_v6 = vld [vmem:[#allocation4 + $0x20] sm:$0xff] }
 0x12e   :  { %5044 = vmatprep.subr.bf16.mxu0 %v7573_v22  ;;  %v708_v22 = vld [vmem:[#allocation4 + $0x540] sm:$0xff] }
 0x12f   :  { %4982 = vmatpush1.bf16.msra.mxu1 %v7576_v28  ;;  %9516 = vst [vmem:[#allocation69_spill] sm:$0xff] %v7639_v20 }
 0x130   :  { %4984 = vmatprep.subr.bf16.mxu1 %v7579_v36 }
 0x131   :  { %5046 = vmatpush1.bf16.msra.mxu0 %v7582_v48  ;;  %v7627_v48 = vpack.c.bf16 %v715_v23, %v709_v4  ;;  %v723_v4 = vld [vmem:[#allocation4 + $0x5b8] sm:$0xff]  ;;  %v729_v23 = vld [vmem:[#allocation4 + $0x5e8] sm:$0xff] }
 0x132   :  { %5048 = vmatprep.subr.bf16.mxu0 %v7585_v50  ;;  %v696_v50 = vld [vmem:[#allocation4 + $0x4e0] sm:$0xff]  ;;  %v7645_v43 = vpack.c.bf16 %v729_v23, %v723_v4  ;;  %v557_v23 = vld [vmem:[#allocation4 + $0x88] sm:$0xff] }
 0x133   :  { %4986 = vmatpush1.bf16.msra.mxu1 %v7588_v59  ;;  %9512 = vst [vmem:[#allocation65_spill] sm:$0xff] %v7627_v48 }
 0x134   :  { %4988 = vmatprep.subr.bf16.mxu1 %v7591_v3  ;;  %9518 = vst [vmem:[#allocation71_spill] sm:$0xff] %v7645_v43 }
 0x135   :  { %5050 = vmatpush1.bf16.msra.mxu0 %v7594_v51  ;;  %v702_v51 = vld [vmem:[#allocation4 + $0x510] sm:$0xff] }
 0x136   :  { %5052 = vmatprep.subr.bf16.mxu0 %v7597_v19  ;;  %v7624_v19 = vpack.c.bf16 %v702_v51, %v696_v50  ;;  %v710_v50 = vld [vmem:[#allocation4 + $0x550] sm:$0xff]  ;;  %v716_v51 = vld [vmem:[#allocation4 + $0x580] sm:$0xff] }
 0x137   :  { %4990 = vmatpush1.bf16.msra.mxu1 %v7600_v27  ;;  %v7642_v40 = vpack.c.bf16 %v716_v51, %v710_v50  ;;  %v550_v51 = vld [vmem:[#allocation4 + $0x50] sm:$0xff] }
 0x138   :  { %4992 = vmatprep.subr.bf16.mxu1 %v7603_v39  ;;  %9511 = vst [vmem:[#allocation64_spill] sm:$0xff] %v7624_v19  ;;  %v7663_v4 = vpack.c.bf16 %v550_v51, %v544_v6  ;;  %v581_v6 = vld [vmem:[#allocation4 + $0x148] sm:$0xff]  ;;  %v587_v51 = vld [vmem:[#allocation4 + $0x178] sm:$0xff] }
 0x139   :  { %5054 = vmatpush1.bf16.msra.mxu0 %v7606_v58  ;;  %v714_v58 = vld [vmem:[#allocation4 + $0x570] sm:$0xff]  ;;  %9517 = vst [vmem:[#allocation70_spill] sm:$0xff] %v7642_v40 }
 0x13a   :  { %5056 = vmatprep.subr.bf16.mxu0 %v7609_v60  ;;  %v7636_v60 = vpack.c.bf16 %v714_v58, %v708_v22  ;;  %v7652_v58 = vpack.c.bf16 %v728_v53, %v722_v46  ;;  %9523 = vst [vmem:[#allocation75_spill] sm:$0xff] %v7663_v4  ;;  %v563_v46 = vld [vmem:[#allocation4 + $0xb8] sm:$0xff]  ;;  %v556_v53 = vld [vmem:[#allocation4 + $0x80] sm:$0xff] }
 0x13b   :  { %4994 = vmatpush1.bf16.msra.mxu1 %v7612_v11 }
 0x13c   :  { %4996 = vmatprep.subr.bf16.mxu1 %v7615_v35  ;;  %9515 = vst [vmem:[#allocation68_spill] sm:$0xff] %v7636_v60  ;;  %9520 = vst [vmem:[#allocation73_spill] sm:$0xff] %v7652_v58 }
 0x13d   :  { %5058 = vmatpush1.bf16.msra.mxu0 %v7618_v30  ;;  %v726_v30 = vld [vmem:[#allocation4 + $0x5d0] sm:$0xff] }
 0x13e   :  { %5060 = vmatprep.subr.bf16.mxu0 %v7621_v31  ;;  %v7648_v22 = vpack.c.bf16 %v726_v30, %v720_v2  ;;  %v545_v2 = vld [vmem:[#allocation4 + $0x28] sm:$0xff]  ;;  %v551_v30 = vld [vmem:[#allocation4 + $0x58] sm:$0xff] }
 0x13f   :  { %4998 = vmatpush1.bf16.msra.mxu1 %v7624_v19  ;;  %v7661_v50 = vpack.c.bf16 %v551_v30, %v545_v2  ;;  %v568_v2 = vld [vmem:[#allocation4 + $0xe0] sm:$0xff]  ;;  %v574_v30 = vld [vmem:[#allocation4 + $0x110] sm:$0xff] }
 0x140   :  { %5000 = vmatprep.subr.bf16.mxu1 %v7627_v48  ;;  %9519 = vst [vmem:[#allocation72_spill] sm:$0xff] %v7648_v22 }
 0x141   :  { %5062 = vmatpush1.bf16.msra.mxu0 %v7630_v12  ;;  %9522 = vst [vmem:[#allocation74_spill] sm:$0xff] %v7661_v50 }
 0x142   :  { %5064 = vmatprep.subr.bf16.mxu0 %v7633_v16  ;;  %v575_v16 = vld [vmem:[#allocation4 + $0x118] sm:$0xff] }
 0x143   :  { %5002 = vmatpush1.bf16.msra.mxu1 %v7636_v60 }
 0x144   :  { %5004 = vmatprep.subr.bf16.mxu1 %v7639_v20 }
 0x145   :  { %5066 = vmatpush1.bf16.msra.mxu0 %v7642_v40  ;;  %v569_v40 = vld [vmem:[#allocation4 + $0xe8] sm:$0xff] }
 0x146   :  { %5068 = vmatprep.subr.bf16.mxu0 %v7645_v43  ;;  %v562_v43 = vld [vmem:[#allocation4 + $0xb0] sm:$0xff]  ;;  %v7671_v31 = vpack.c.bf16 %v575_v16, %v569_v40  ;;  %v580_v16 = vld [vmem:[#allocation4 + $0x140] sm:$0xff] }
 0x147   :  { %5006 = vmatpush1.bf16.msra.mxu1 %v7648_v22  ;;  %v7669_v12 = vpack.c.bf16 %v562_v43, %v556_v53  ;;  %v586_v40 = vld [vmem:[#allocation4 + $0x170] sm:$0xff]  ;;  %v599_v53 = vld [vmem:[#allocation4 + $0x1d8] sm:$0xff] }
 0x148   :  { %5072 = vmatprep.subr.bf16.mxu1 %v7661_v50  ;;  %9526 = vst [vmem:[#allocation78_spill] sm:$0xff] %v7671_v31  ;;  %v7682_v43 = vpack.c.bf16 %v586_v40, %v580_v16  ;;  %v604_v16 = vld [vmem:[#allocation4 + $0x200] sm:$0xff]  ;;  %v610_v40 = vld [vmem:[#allocation4 + $0x230] sm:$0xff] }
 0x149   :  { %5070 = vmatpush1.bf16.msra.mxu0 %v7652_v58  ;;  %v7667_v58 = vpack.c.bf16 %v563_v46, %v557_v23  ;;  %9525 = vst [vmem:[#allocation77_spill] sm:$0xff] %v7669_v12  ;;  %v7678_v23 = vpack.c.bf16 %v587_v51, %v581_v6  ;;  %v593_v46 = vld [vmem:[#allocation4 + $0x1a8] sm:$0xff]  ;;  %v611_v51 = vld [vmem:[#allocation4 + $0x238] sm:$0xff] }
 0x14a   :  { %885 = vmatmul.mubr.f32.vlgmr.msra.gmra.mrb[0].mxu1 %v9521_v61  ;;  %9529 = vst [vmem:[#allocation81_spill] sm:$0xff] %v7682_v43  ;;  %v605_v6 = vld [vmem:[#allocation4 + $0x208] sm:$0xff] }
 0x14b   :  { %1026 = vmatprep.mubr.f32.mxu1 %v9521_v61  ;;  %5074 = vmatpush1.bf16.msra.mxu1 %v7663_v4  ;;  %9524 = vst [vmem:[#allocation76_spill] sm:$0xff] %v7667_v58  ;;  %v7675_v4 = vpack.c.bf16 %v574_v30, %v568_v2  ;;  %9528 = vst [vmem:[#allocation80_spill] sm:$0xff] %v7678_v23  ;;  %v592_v2 = vld [vmem:[#allocation4 + $0x1a0] sm:$0xff]  ;;  %v598_v30 = vld [vmem:[#allocation4 + $0x1d0] sm:$0xff] }
 0x14c   :  { %956 = vmatmul.mubr.f32.vlgmr.msra.gmra.mrb[16].mxu0 %v9521_v61  ;;  %5076 = vmatprep.subr.bf16.mxu1 %v7667_v58  ;;  %v7685_v58 = vpack.c.bf16 %v599_v53, %v593_v46  ;;  %v617_v46 = vld [vmem:[#allocation4 + $0x268] sm:$0xff]  ;;  %v623_v53 = vld [vmem:[#allocation4 + $0x298] sm:$0xff] }
 0x14d   :  { %1119 = vmatprep.mubr.f32.mxu0 %v9521_v61  ;;  %9527 = vst [vmem:[#allocation79_spill] sm:$0xff] %v7675_v4 }
 0x14e   :  { %9530 = vst [vmem:[#allocation82_spill] sm:$0xff] %v7685_v58 }
 0x14f   :  { %5078 = vmatpush1.bf16.msra.mxu1 %v7669_v12  ;;  %v7687_v12 = vpack.c.bf16 %v598_v30, %v592_v2  ;;  %v7697_v2 = vpack.c.bf16 %v623_v53, %v617_v46  ;;  %v616_v30 = vld [vmem:[#allocation4 + $0x260] sm:$0xff] }
 0x150   :  { %5080 = vmatprep.subr.bf16.mxu1 %v7671_v31  ;;  %v732_v53 = vld [vmem:[#allocation6] sm:$0xff] }
 0x151   :  { %9531 = vst [vmem:[#allocation83_spill] sm:$0xff] %v7687_v12  ;;  %9534 = vst [vmem:[#allocation86_spill] sm:$0xff] %v7697_v2 }
 0x153   :  { %5082 = vmatpush1.bf16.msra.mxu1 %v7675_v4  ;;  %v7693_v4 = vpack.c.bf16 %v610_v40, %v604_v16  ;;  %v733_v16 = vld [vmem:[#allocation6 + $0x8] sm:$0xff] }
 0x154   :  { %5084 = vmatprep.subr.bf16.mxu1 %v7678_v23  ;;  %v7691_v23 = vpack.c.bf16 %v611_v51, %v605_v6  ;;  %v629_v6 = vld [vmem:[#allocation4 + $0x2c8] sm:$0xff]  ;;  %v635_v51 = vld [vmem:[#allocation4 + $0x2f8] sm:$0xff] }
 0x155   :  { %9533 = vst [vmem:[#allocation85_spill] sm:$0xff] %v7693_v4  ;;  %v7703_v40 = vpack.c.bf16 %v635_v51, %v629_v6  ;;  %v647_v6 = vld [vmem:[#allocation4 + $0x358] sm:$0xff] }
 0x156   :  { %9532 = vst [vmem:[#allocation84_spill] sm:$0xff] %v7691_v23  ;;  %v739_v51 = vld [vmem:[#allocation6 + $0x38] sm:$0xff] }
 0x157   :  { %5086 = vmatpush1.bf16.msra.mxu1 %v7682_v43  ;;  %9536 = vst [vmem:[#allocation88_spill] sm:$0xff] %v7703_v40 }
 0x158   :  { %5088 = vmatprep.subr.bf16.mxu1 %v7685_v58  ;;  %v622_v58 = vld [vmem:[#allocation4 + $0x290] sm:$0xff] }
 0x159   :  { %v7699_v43 = vpack.c.bf16 %v622_v58, %v616_v30  ;;  %v7710_v58 = vpack.c.bf16 %v735_v62, %v732_v53  ;;  %v641_v30 = vld [vmem:[#allocation4 + $0x328] sm:$0xff]  ;;  %v738_v62 = vld [vmem:[#allocation6 + $0x30] sm:$0xff] }
 0x15a   :  { %v741_v53 = vld [vmem:[#allocation6 + $0x48] sm:$0xff] }
 0x15b   :  { %5090 = vmatpush1.bf16.msra.mxu1 %v7687_v12  ;;  %9535 = vst [vmem:[#allocation87_spill] sm:$0xff] %v7699_v43  ;;  %v628_v12 = vld [vmem:[#allocation4 + $0x2c0] sm:$0xff]  ;;  %9539 = vst [vmem:[#allocation91_spill] sm:$0xff] %v7710_v58 }
 0x15c   :  { %5092 = vmatprep.subr.bf16.mxu1 %v7691_v23  ;;  %v736_v23 = vld [vmem:[#allocation6 + $0x20] sm:$0xff] }
 0x15d   :  { %v7705_v31 = vpack.c.bf16 %v736_v23, %v733_v16  ;;  %v742_v23 = vld [vmem:[#allocation6 + $0x50] sm:$0xff] }
 0x15e   :  { %v7717_v16 = vpack.c.bf16 %v742_v23, %v739_v51  ;;  %v748_v51 = vld [vmem:[#allocation6 + $0x80] sm:$0xff] }
 0x15f   :  { %5094 = vmatpush1.bf16.msra.mxu1 %v7693_v4  ;;  %v634_v4 = vld [vmem:[#allocation4 + $0x2f0] sm:$0xff]  ;;  %9537 = vst [vmem:[#allocation89_spill] sm:$0xff] %v7705_v31  ;;  %5136 = vmatprep.subr.bf16.mxu0 %v7705_v31  ;;  %v652_v23 = vld [vmem:[#allocation4 + $0x380] sm:$0xff] }
 0x160   :  { %5096 = vmatprep.subr.bf16.mxu1 %v7697_v2  ;;  %v7707_v46 = vpack.c.bf16 %v634_v4, %v628_v12  ;;  %5138 = vmatpush1.bf16.msra.mxu0 %v7710_v58  ;;  %v640_v12 = vld [vmem:[#allocation4 + $0x320] sm:$0xff]  ;;  %v646_v4 = vld [vmem:[#allocation4 + $0x350] sm:$0xff]  ;;  %9541 = vst [vmem:[#allocation93_spill] sm:$0xff] %v7717_v16 }
 0x161   :  { %v7719_v2 = vpack.c.bf16 %v646_v4, %v640_v12  ;;  %5140 = vmatprep.subr.bf16.mxu0 %v7717_v16  ;;  %v658_v12 = vld [vmem:[#allocation4 + $0x3b0] sm:$0xff] }
 0x162   :  { %9538 = vst [vmem:[#allocation90_spill] sm:$0xff] %v7707_v46  ;;  %v7731_v31 = vpack.c.bf16 %v658_v12, %v652_v23  ;;  %v670_v23 = vld [vmem:[#allocation4 + $0x410] sm:$0xff] }
 0x163   :  { %5098 = vmatpush1.bf16.msra.mxu1 %v7699_v43  ;;  %v7715_v43 = vpack.c.bf16 %v647_v6, %v641_v30  ;;  %9542 = vst [vmem:[#allocation94_spill] sm:$0xff] %v7719_v2  ;;  %v659_v30 = vld [vmem:[#allocation4 + $0x3b8] sm:$0xff]  ;;  %v745_v6 = vld [vmem:[#allocation6 + $0x68] sm:$0xff] }
 0x164   :  { %5100 = vmatprep.subr.bf16.mxu1 %v7703_v40  ;;  %v7722_v40 = vpack.c.bf16 %v741_v53, %v738_v62  ;;  %v7729_v4 = vpack.c.bf16 %v748_v51, %v745_v6  ;;  %9546 = vst [vmem:[#allocation98_spill] sm:$0xff] %v7731_v31  ;;  %v744_v62 = vld [vmem:[#allocation6 + $0x60] sm:$0xff]  ;;  %v747_v53 = vld [vmem:[#allocation6 + $0x78] sm:$0xff]  ;;  %v754_v6 = vld [vmem:[#allocation6 + $0xb0] sm:$0xff] }
 0x165   :  { %9540 = vst [vmem:[#allocation92_spill] sm:$0xff] %v7715_v43  ;;  %v664_v51 = vld [vmem:[#allocation4 + $0x3e0] sm:$0xff] }
 0x166   :  { %9543 = vst [vmem:[#allocation95_spill] sm:$0xff] %v7722_v40  ;;  %5142 = vmatpush1.bf16.msra.mxu0 %v7722_v40  ;;  %9545 = vst [vmem:[#allocation97_spill] sm:$0xff] %v7729_v4  ;;  %v7743_v16 = vpack.c.bf16 %v670_v23, %v664_v51  ;;  %v682_v51 = vld [vmem:[#allocation4 + $0x470] sm:$0xff] }
 0x167   :  { %5102 = vmatpush1.bf16.msra.mxu1 %v7707_v46  ;;  %v653_v46 = vld [vmem:[#allocation4 + $0x388] sm:$0xff]  ;;  %5144 = vmatprep.subr.bf16.mxu0 %v7729_v4 }
 0x168   :  { %5104 = vmatprep.subr.bf16.mxu1 %v7715_v43  ;;  %v7727_v58 = vpack.c.bf16 %v659_v30, %v653_v46  ;;  %v7734_v43 = vpack.c.bf16 %v747_v53, %v744_v62  ;;  %v671_v46 = vld [vmem:[#allocation4 + $0x418] sm:$0xff]  ;;  %9550 = vst [vmem:[#allocation102_spill] sm:$0xff] %v7743_v16  ;;  %v750_v62 = vld [vmem:[#allocation6 + $0x90] sm:$0xff]  ;;  %v753_v53 = vld [vmem:[#allocation6 + $0xa8] sm:$0xff] }
 0x169   :  { %v751_v30 = vld [vmem:[#allocation6 + $0x98] sm:$0xff] }
 0x16a   :  { %9544 = vst [vmem:[#allocation96_spill] sm:$0xff] %v7727_v58  ;;  %9547 = vst [vmem:[#allocation99_spill] sm:$0xff] %v7734_v43  ;;  %5146 = vmatpush1.bf16.msra.mxu0 %v7734_v43  ;;  %v7741_v12 = vpack.c.bf16 %v754_v6, %v751_v30  ;;  %v760_v30 = vld [vmem:[#allocation6 + $0xe0] sm:$0xff] }
 0x16b   :  { %5106 = vmatpush1.bf16.msra.mxu1 %v7719_v2  ;;  %v665_v2 = vld [vmem:[#allocation4 + $0x3e8] sm:$0xff]  ;;  %v676_v6 = vld [vmem:[#allocation4 + $0x440] sm:$0xff] }
 0x16c   :  { %5108 = vmatprep.subr.bf16.mxu1 %v7727_v58  ;;  %v7739_v40 = vpack.c.bf16 %v671_v46, %v665_v2  ;;  %9549 = vst [vmem:[#allocation101_spill] sm:$0xff] %v7741_v12  ;;  %v7746_v58 = vpack.c.bf16 %v753_v53, %v750_v62  ;;  %5148 = vmatprep.subr.bf16.mxu0 %v7741_v12  ;;  %v683_v2 = vld [vmem:[#allocation4 + $0x478] sm:$0xff]  ;;  %v757_v46 = vld [vmem:[#allocation6 + $0xc8] sm:$0xff]  ;;  %v756_v62 = vld [vmem:[#allocation6 + $0xc0] sm:$0xff] }
 0x16d   :  { %v7753_v23 = vpack.c.bf16 %v760_v30, %v757_v46  ;;  %v7755_v4 = vpack.c.bf16 %v682_v51, %v676_v6  ;;  %v759_v53 = vld [vmem:[#allocation6 + $0xd8] sm:$0xff]  ;;  %v766_v46 = vld [vmem:[#allocation6 + $0x110] sm:$0xff]  ;;  %v688_v30 = vld [vmem:[#allocation4 + $0x4a0] sm:$0xff] }
 0x16e   :  { %9548 = vst [vmem:[#allocation100_spill] sm:$0xff] %v7739_v40  ;;  %9551 = vst [vmem:[#allocation103_spill] sm:$0xff] %v7746_v58  ;;  %5150 = vmatpush1.bf16.msra.mxu0 %v7746_v58  ;;  %v694_v6 = vld [vmem:[#allocation4 + $0x4d0] sm:$0xff] }
 0x16f   :  { %5110 = vmatpush1.bf16.msra.mxu1 %v7731_v31  ;;  %v677_v31 = vld [vmem:[#allocation4 + $0x448] sm:$0xff]  ;;  %9553 = vst [vmem:[#allocation105_spill] sm:$0xff] %v7753_v23  ;;  %9554 = vst [vmem:[#allocation106_spill] sm:$0xff] %v7755_v4  ;;  %5152 = vmatprep.subr.bf16.mxu0 %v7753_v23  ;;  %v7767_v12 = vpack.c.bf16 %v694_v6, %v688_v30  ;;  %v706_v30 = vld [vmem:[#allocation4 + $0x530] sm:$0xff] }
 0x170   :  { %5112 = vmatprep.subr.bf16.mxu1 %v7739_v40  ;;  %v7751_v43 = vpack.c.bf16 %v683_v2, %v677_v31  ;;  %v7758_v40 = vpack.c.bf16 %v759_v53, %v756_v62  ;;  %v695_v31 = vld [vmem:[#allocation4 + $0x4d8] sm:$0xff]  ;;  %v762_v62 = vld [vmem:[#allocation6 + $0xf0] sm:$0xff]  ;;  %v765_v53 = vld [vmem:[#allocation6 + $0x108] sm:$0xff] }
 0x171   :  { %v763_v2 = vld [vmem:[#allocation6 + $0xf8] sm:$0xff]  ;;  %9558 = vst [vmem:[#allocation110_spill] sm:$0xff] %v7767_v12 }
 0x172   :  { %9552 = vst [vmem:[#allocation104_spill] sm:$0xff] %v7751_v43  ;;  %9555 = vst [vmem:[#allocation107_spill] sm:$0xff] %v7758_v40  ;;  %5154 = vmatpush1.bf16.msra.mxu0 %v7758_v40  ;;  %v7765_v51 = vpack.c.bf16 %v766_v46, %v763_v2  ;;  %v772_v2 = vld [vmem:[#allocation6 + $0x140] sm:$0xff] }
 0x173   :  { %5114 = vmatpush1.bf16.msra.mxu1 %v7743_v16  ;;  %v689_v16 = vld [vmem:[#allocation4 + $0x4a8] sm:$0xff]  ;;  %v700_v46 = vld [vmem:[#allocation4 + $0x500] sm:$0xff] }
 0x174   :  { %5116 = vmatprep.subr.bf16.mxu1 %v7751_v43  ;;  %v7763_v58 = vpack.c.bf16 %v695_v31, %v689_v16  ;;  %9557 = vst [vmem:[#allocation109_spill] sm:$0xff] %v7765_v51  ;;  %v7770_v43 = vpack.c.bf16 %v765_v53, %v762_v62  ;;  %5156 = vmatprep.subr.bf16.mxu0 %v7765_v51  ;;  %v707_v16 = vld [vmem:[#allocation4 + $0x538] sm:$0xff]  ;;  %v769_v31 = vld [vmem:[#allocation6 + $0x128] sm:$0xff]  ;;  %v768_v62 = vld [vmem:[#allocation6 + $0x120] sm:$0xff] }
 0x175   :  { %v7777_v6 = vpack.c.bf16 %v772_v2, %v769_v31  ;;  %v7779_v23 = vpack.c.bf16 %v706_v30, %v700_v46  ;;  %v771_v53 = vld [vmem:[#allocation6 + $0x138] sm:$0xff]  ;;  %v778_v31 = vld [vmem:[#allocation6 + $0x170] sm:$0xff]  ;;  %v712_v2 = vld [vmem:[#allocation4 + $0x560] sm:$0xff] }
 0x176   :  { %9556 = vst [vmem:[#allocation108_spill] sm:$0xff] %v7763_v58  ;;  %9559 = vst [vmem:[#allocation111_spill] sm:$0xff] %v7770_v43  ;;  %5158 = vmatpush1.bf16.msra.mxu0 %v7770_v43  ;;  %v718_v46 = vld [vmem:[#allocation4 + $0x590] sm:$0xff] }
 0x177   :  { %5118 = vmatpush1.bf16.msra.mxu1 %v7755_v4  ;;  %v701_v4 = vld [vmem:[#allocation4 + $0x508] sm:$0xff]  ;;  %9561 = vst [vmem:[#allocation113_spill] sm:$0xff] %v7777_v6  ;;  %9562 = vst [vmem:[#allocation114_spill] sm:$0xff] %v7779_v23  ;;  %5160 = vmatprep.subr.bf16.mxu0 %v7777_v6  ;;  %v7791_v51 = vpack.c.bf16 %v718_v46, %v712_v2  ;;  %v255_v46 = vlaneseq }
 0x178   :  { %5120 = vmatprep.subr.bf16.mxu1 %v7763_v58  ;;  %v7775_v40 = vpack.c.bf16 %v707_v16, %v701_v4  ;;  %v7782_v58 = vpack.c.bf16 %v771_v53, %v768_v62  ;;  %v719_v4 = vld [vmem:[#allocation4 + $0x598] sm:$0xff]  ;;  %v774_v62 = vld [vmem:[#allocation6 + $0x150] sm:$0xff]  ;;  %v777_v53 = vld [vmem:[#allocation6 + $0x168] sm:$0xff] }
 0x179   :  { %v775_v16 = vld [vmem:[#allocation6 + $0x158] sm:$0xff]  ;;  %9566 = vst [vmem:[#allocation118_spill] sm:$0xff] %v7791_v51 }
 0x17a   :  { %9560 = vst [vmem:[#allocation112_spill] sm:$0xff] %v7775_v40  ;;  %9563 = vst [vmem:[#allocation115_spill] sm:$0xff] %v7782_v58  ;;  %5162 = vmatpush1.bf16.msra.mxu0 %v7782_v58  ;;  %v7789_v30 = vpack.c.bf16 %v778_v31, %v775_v16  ;;  %v730_v16 = vld [vmem:[#allocation4 + $0x5f0] sm:$0xff]  ;;  %v9305_v31 = vmov 0.0|0.0  }
 0x17b   :  { %5122 = vmatpush1.bf16.msra.mxu1 %v7767_v12  ;;  %v713_v12 = vld [vmem:[#allocation4 + $0x568] sm:$0xff] }
 0x17c   :  { %5124 = vmatprep.subr.bf16.mxu1 %v7775_v40  ;;  %v7787_v43 = vpack.c.bf16 %v719_v4, %v713_v12  ;;  %9565 = vst [vmem:[#allocation117_spill] sm:$0xff] %v7789_v30  ;;  %v7794_v40 = vpack.c.bf16 %v777_v53, %v774_v62  ;;  %5164 = vmatprep.subr.bf16.mxu0 %v7789_v30  ;;  %v731_v12 = vld [vmem:[#allocation4 + $0x5f8] sm:$0xff]  ;;  %v724_v4 = vld [vmem:[#allocation4 + $0x5c0] sm:$0xff] }
 0x17d   :  { %v7802_v2 = vpack.c.bf16 %v730_v16, %v724_v4  ;;  %v253_v53 = vld [vmem:[%s9179_s6] sm:$0x7] }
 0x17e   :  { %9564 = vst [vmem:[#allocation116_spill] sm:$0xff] %v7787_v43  ;;  %9567 = vst [vmem:[#allocation119_spill] sm:$0xff] %v7794_v40  ;;  %5166 = vmatpush1.bf16.msra.mxu0 %v7794_v40 }
 0x17f   :  { %5126 = vmatpush1.bf16.msra.mxu1 %v7779_v23  ;;  %v725_v23 = vld [vmem:[#allocation4 + $0x5c8] sm:$0xff]  ;;  %5167 = vmatprep.subr.bf16.mxu0 %v9305_v31  ;;  %9569 = vst [vmem:[#allocation121_spill] sm:$0xff] %v7802_v2 }
 0x180   :  { %5128 = vmatprep.subr.bf16.mxu1 %v7787_v43  ;;  %v7799_v58 = vpack.c.bf16 %v731_v12, %v725_v23  ;;  %v7810_v23 = vshrl.u32 %v255_v46, 7 }
 0x182   :  { %9568 = vst [vmem:[#allocation120_spill] sm:$0xff] %v7799_v58  ;;  %v9307_v62 = vsub.s32 2, %v7810_v23 }
 0x183   :  { %5130 = vmatpush1.bf16.msra.mxu1 %v7791_v51 }
 0x184   :  { %5132 = vmatprep.subr.bf16.mxu1 %v7799_v58  ;;  %v7822_v12 = vrot.slane %v253_v53, %v9307_v62 }
 0x187   :  { %5134 = vmatpush1.bf16.msra.mxu1 %v7802_v2 }
 0x188   :  { %5192 = vmatprep.subr.bf16.mxu1 %v7410_v34 }
 0x18a   :  { %1027 = vmatmul.mubr.f32.vlgmr.msra.gmra.mrb[16].mxu1 %v9521_v61 }
 0x18b   :  { %5194 = vmatpush1.bf16.msra.mxu1 %v7427_v52 }
 0x18c   :  { %5196 = vmatprep.subr.bf16.mxu1 %v7429_v56 }
 0x18f   :  { %5198 = vmatpush1.bf16.msra.mxu1 %v7440_v5 }
 0x190   :  { %5200 = vmatprep.subr.bf16.mxu1 %v7444_v8 }
 0x193   :  { %5202 = vmatpush1.bf16.msra.mxu1 %v7455_v21 }
 0x194   :  { %5204 = vmatprep.subr.bf16.mxu1 %v7460_v25 }
 0x197   :  { %5206 = vmatpush1.bf16.msra.mxu1 %v7474_v42 }
 0x198   :  { %5208 = vmatprep.subr.bf16.mxu1 %v7481_v47 }
 0x19b   :  { %5210 = vmatpush1.bf16.msra.mxu1 %v7497_v41 }
 0x19c   :  { %5212 = vmatprep.subr.bf16.mxu1 %v7502_v0 }
 0x19f   :  { %5214 = vmatpush1.bf16.msra.mxu1 %v7515_v13 }
 0x1a0   :  { %5216 = vmatprep.subr.bf16.mxu1 %v7519_v17 }
 0x1a3   :  { %5218 = vmatpush1.bf16.msra.mxu1 %v7533_v29 }
 0x1a4   :  { %5220 = vmatprep.subr.bf16.mxu1 %v7537_v32 }
 0x1a7   :  { %5222 = vmatpush1.bf16.msra.mxu1 %v7547_v49 }
 0x1a8   :  { %5224 = vmatprep.subr.bf16.mxu1 %v7551_v54 }
 0x1ab   :  { %5226 = vmatpush1.bf16.msra.mxu1 %v7563_v7 }
 0x1ac   :  { %5228 = vmatprep.subr.bf16.mxu1 %v7567_v14 }
 0x1af   :  { %5230 = vmatpush1.bf16.msra.mxu1 %v7576_v28 }
 0x1b0   :  { %5232 = vmatprep.subr.bf16.mxu1 %v7579_v36 }
 0x1b3   :  { %5234 = vmatpush1.bf16.msra.mxu1 %v7588_v59 }
 0x1b4   :  { %5236 = vmatprep.subr.bf16.mxu1 %v7591_v3 }
 0x1b7   :  { %5238 = vmatpush1.bf16.msra.mxu1 %v7600_v27 }
 0x1b8   :  { %5240 = vmatprep.subr.bf16.mxu1 %v7603_v39 }
 0x1bb   :  { %5242 = vmatpush1.bf16.msra.mxu1 %v7612_v11 }
 0x1bc   :  { %5244 = vmatprep.subr.bf16.mxu1 %v7615_v35 }
 0x1bf   :  { %5246 = vmatpush1.bf16.msra.mxu1 %v7624_v19 }
 0x1c0   :  { %5248 = vmatprep.subr.bf16.mxu1 %v7627_v48 }
 0x1c3   :  { %5250 = vmatpush1.bf16.msra.mxu1 %v7636_v60 }
 0x1c4   :  { %5252 = vmatprep.subr.bf16.mxu1 %v7639_v20 }
 0x1c7   :  { %5254 = vmatpush1.bf16.msra.mxu1 %v7648_v22 }
 0x1c8   :  { %5320 = vmatprep.subr.bf16.mxu1 %v7661_v50 }
 0x1de   :  { %v4583_v4 = vpop.f32.mrb[8].mxu0 }
 0x1df   :  { %v7827_v16 = vadd.f32 %v4583_v4, %v7822_v12  ;;  %v473_v46 = vpop.f32.mrb[9].mxu0 }
 0x1e1   :  { %9570 = vst [vmem:[#allocation122_spill] sm:$0xff] %v7827_v16 }
 0x1e7   :  { %v4586_v31 = vpop.f32.mrb[10].mxu0 }
 0x1e8   :  { %v7834_v62 = vadd.f32 %v4586_v31, %v7822_v12  ;;  %v483_v42 = vpop.f32.mrb[11].mxu0 }
 0x1e9   :  { %v7837_v25 = vadd.f32 %v483_v42, %v7822_v12 }
 0x1ea   :  { %9571 = vst [vmem:[#allocation123_spill] sm:$0xff] %v7834_v62 }
 0x1eb   :  { %9572 = vst [vmem:[#allocation124_spill] sm:$0xff] %v7837_v25  ;;  %v4589_v4 = vpop.f32.mrb[12].mxu0 }
 0x1ec   :  { %v7842_v16 = vadd.f32 %v4589_v4, %v7822_v12  ;;  %v493_v0 = vpop.f32.mrb[13].mxu0 }
 0x1ed   :  { %v7845_v13 = vadd.f32 %v493_v0, %v7822_v12  ;;  %v9326_v0 = vsub.s32 0, %v7810_v23 }
 0x1ee   :  { %9573 = vst [vmem:[#allocation125_spill] sm:$0xff] %v7842_v16 }
 0x1ef   :  { %9574 = vst [vmem:[#allocation126_spill] sm:$0xff] %v7845_v13  ;;  %v4592_v31 = vpop.f32.mrb[14].mxu0  ;;  %v7875_v4 = vrot.slane %v253_v53, %v9326_v0 }
 0x1f0   :  { %v7850_v42 = vadd.f32 %v4592_v31, %v7822_v12  ;;  %v503_v62 = vpop.f32.mrb[15].mxu0 }
 0x1f1   :  { %v7853_v25 = vadd.f32 %v503_v62, %v7822_v12  ;;  %v9329_v62 = vsub.s32 1, %v7810_v23  ;;  %9577 = vst [vmem:[#allocation129_spill] sm:$0xff] %v7875_v4 }
 0x1f2   :  { %9575 = vst [vmem:[#allocation127_spill] sm:$0xff] %v7850_v42 }
 0x1f3   :  { %9576 = vst [vmem:[#allocation128_spill] sm:$0xff] %v7853_v25  ;;  %v7879_v42 = vrot.slane %v253_v53, %v9329_v62  ;;  %v7888_v53 = vld [vmem:[%s9180_s7] ss:$0 sm:$0xff] }
 0x1f5   :  { %9578 = vst [vmem:[#allocation130_spill] sm:$0xff] %v7879_v42 }
 0x21d   :  { %v886_v31 = vpop.f32.mrb[0].mxu1 }
 0x21e   :  { %v6957_v25 = vadd.f32 %v886_v31, %v7875_v4  ;;  %v888_v16 = vpop.f32.mrb[1].mxu1  ;;  %v474_v4 = vadd.f32 %v473_v46, %v7822_v12  ;;  %v9580_v46 = vmov 0.0|0.0  }
 0x21f   :  { %v957_v13 = vpop.f32.mrb[16].mxu0  ;;  %v6958_v50 = vadd.f32 %v888_v16, %v7879_v42 }
 0x220   :  { %v4322_v22 = vmul.f32 -1.442695, %v6957_v25  ;;  %v7882_v20 = vpop.f32.mrb[17].mxu0  ;;  %v1047_v62 = vadd.f32 %v7888_v53, %v957_v13  ;;  %v743_v13 = vld [vmem:[#allocation6 + $0x58] sm:$0xff] }
 0x221   :  { %v4323_v60 = vmul.f32 -1.442695, %v6958_v50 }
 0x222   :  { %7000 = vpow2.f32 %v4322_v22 }
 0x223   :  { %7002 = vpow2.f32 %v4323_v60 }
 0x22c   :  { %v7001_v48 = vpop.eup %7000 }
 0x22d   :  { %v1041_v0 = vadd.f32 1.0, %v7001_v48  ;;  %v7003_v19 = vpop.eup %7002  ;;  %v734_v48 = vld [vmem:[#allocation6 + $0x10] sm:$0xff] }
 0x22e   :  { %v1042_v31 = vadd.f32 1.0, %v7003_v19  ;;  %v740_v19 = vld [vmem:[#allocation6 + $0x40] sm:$0xff] }
 0x22f   :  { %7004 = vrcp.f32 %v1041_v0  ;;  %v737_v0 = vld [vmem:[#allocation6 + $0x28] sm:$0xff]  ;;  %v7898_v12 = vpack.c.bf16 %v743_v13, %v740_v19 }
 0x230   :  { %7006 = vrcp.f32 %v1042_v31  ;;  %v7892_v39 = vpack.c.bf16 %v737_v0, %v734_v48  ;;  %v770_v0 = vld [vmem:[#allocation6 + $0x130] sm:$0xff]  ;;  %v773_v19 = vld [vmem:[#allocation6 + $0x148] sm:$0xff] }
 0x231   :  { %9579 = vst [vmem:[#allocation131_spill] sm:$0xff] %v7898_v12  ;;  %v7920_v13 = vpack.c.bf16 %v773_v19, %v770_v0  ;;  %v9592_v0 = vld [vmem:[#allocation51_spill] sm:$0xff]  ;;  %v9593_v19 = vld [vmem:[#allocation54_spill] sm:$0xff] }
 0x233   :  { %9585 = vst [vmem:[#allocation136_spill] sm:$0xff] %v7920_v13 }
 0x239   :  { %v7005_v25 = vpop.eup %7004 }
 0x23a   :  { %v1048_v16 = vmul.f32 %v7005_v25, %v1047_v62  ;;  %v7007_v60 = vpop.eup %7006  ;;  %v746_v62 = vld [vmem:[#allocation6 + $0x70] sm:$0xff] }
 0x23b   :  { %v1051_v50 = vsub.f32 1.0, %v7007_v60  ;;  %v1053_v35 = vmul.f32 0.0, %v7007_v60  ;;  %v758_v25 = vld [vmem:[#allocation6 + $0xd0] sm:$0xff]  ;;  %v764_v60 = vld [vmem:[#allocation6 + $0x100] sm:$0xff] }
 0x23c   :  { %v1049_v22 = vadd.f32 %v1048_v16, %v474_v4  ;;  %v755_v4 = vld [vmem:[#allocation6 + $0xb8] sm:$0xff]  ;;  %v761_v16 = vld [vmem:[#allocation6 + $0xe8] sm:$0xff] }
 0x23e   :  { %7008 = vtanh.f32 %v1049_v22  ;;  %v7912_v22 = vpack.c.bf16 %v761_v16, %v758_v25  ;;  %v9588_v25 = vld [vmem:[#allocation43_spill] sm:$0xff]  ;;  %v9589_v16 = vld [vmem:[#allocation46_spill] sm:$0xff] }
 0x240   :  { %9583 = vst [vmem:[#allocation134_spill] sm:$0xff] %v7912_v22 }
 0x248   :  { %v7009_v42 = vpop.eup %7008 }
 0x249   :  { %v1052_v11 = vmul.f32 %v7009_v42, %v1051_v50  ;;  %v749_v42 = vld [vmem:[#allocation6 + $0x88] sm:$0xff]  ;;  %v767_v50 = vld [vmem:[#allocation6 + $0x118] sm:$0xff] }
 0x24a   :  { %v7916_v48 = vpack.c.bf16 %v767_v50, %v764_v60  ;;  %v9590_v60 = vld [vmem:[#allocation47_spill] sm:$0xff]  ;;  %v9591_v50 = vld [vmem:[#allocation50_spill] sm:$0xff] }
 0x24b   :  { %v7894_v27 = vadd.f32 %v1053_v35, %v1052_v11  ;;  %v7904_v35 = vpack.c.bf16 %v749_v42, %v746_v62  ;;  %v752_v11 = vld [vmem:[#allocation6 + $0xa0] sm:$0xff]  ;;  %v779_v42 = vld [vmem:[#allocation6 + $0x178] sm:$0xff] }
 0x24c   :  { %v7908_v31 = vpack.c.bf16 %v755_v4, %v752_v11  ;;  %9584 = vst [vmem:[#allocation135_spill] sm:$0xff] %v7916_v48  ;;  %v776_v62 = vld [vmem:[#allocation6 + $0x160] sm:$0xff] }
 0x24d   :  { %1120 = vmatmul.mubr.f32.vlgmr.msra.gmra.mrb[18].mxu0 %v7894_v27  ;;  %9581 = vst [vmem:[#allocation132_spill] sm:$0xff] %v7904_v35  ;;  %v7924_v11 = vpack.c.bf16 %v779_v42, %v776_v62  ;;  %v9587_v4 = vld [vmem:[#allocation42_spill] sm:$0xff]  ;;  %v9594_v62 = vld [vmem:[#allocation55_spill] sm:$0xff] }
 0x24e   :  { %5169 = vmatpush3.bf16.msra.mxu0 %v7892_v39  ;;  %4625 = vmatprep.mubr.msk.f32.mxu0 %vm7225_vm1, %v9521_v61  ;;  %9582 = vst [vmem:[#allocation133_spill] sm:$0xff] %v7908_v31  ;;  %v9595_v42 = vld [vmem:[#allocation58_spill] sm:$0xff] }
 0x24f   :  { %5170 = vmatprep.subr.bf16.mxu0 %v9580_v46  ;;  %9586 = vst [vmem:[#allocation137_spill] sm:$0xff] %v7924_v11 }
 0x252   :  { %5172 = vmatpush3.bf16.msra.mxu0 %v7898_v12 }
 0x253   :  { %5173 = vmatprep.subr.bf16.mxu0 %v9580_v46 }
 0x256   :  { %5175 = vmatpush3.bf16.msra.mxu0 %v7904_v35 }
 0x257   :  { %5176 = vmatprep.subr.bf16.mxu0 %v9580_v46 }
 0x25a   :  { %5178 = vmatpush3.bf16.msra.mxu0 %v7908_v31 }
 0x25b   :  { %5179 = vmatprep.subr.bf16.mxu0 %v9580_v46 }
 0x25e   :  { %5181 = vmatpush3.bf16.msra.mxu0 %v7912_v22 }
 0x25f   :  { %5182 = vmatprep.subr.bf16.mxu0 %v9580_v46 }
 0x262   :  { %5184 = vmatpush3.bf16.msra.mxu0 %v7916_v48 }
 0x263   :  { %5185 = vmatprep.subr.bf16.mxu0 %v9580_v46 }
 0x266   :  { %5187 = vmatpush3.bf16.msra.mxu0 %v7920_v13 }
 0x267   :  { %5188 = vmatprep.subr.bf16.mxu0 %v9580_v46 }
 0x26a   :  { %5190 = vmatpush3.bf16.msra.mxu0 %v7924_v11 }
 0x26b   :  { %5256 = vmatprep.subr.bf16.mxu0 %v7414_v38 }
 0x26d   :  { %4626 = vmatmul.mubr.f32.vlgmr.msra.gmra.mrb[20].mxu0 %v7894_v27 }
 0x26e   :  { %5258 = vmatpush1.bf16.msra.mxu0 %v7431_v63 }
 0x26f   :  { %5260 = vmatprep.subr.bf16.mxu0 %v7435_v1 }
 0x272   :  { %5262 = vmatpush1.bf16.msra.mxu0 %v7448_v15 }
 0x273   :  { %5264 = vmatprep.subr.bf16.mxu0 %v7452_v18 }
 0x276   :  { %5266 = vmatpush1.bf16.msra.mxu0 %v7467_v33 }
 0x277   :  { %5268 = vmatprep.subr.bf16.mxu0 %v7471_v37 }
 0x27a   :  { %5270 = vmatpush1.bf16.msra.mxu0 %v7489_v55 }
 0x27b   :  { %5272 = vmatprep.subr.bf16.mxu0 %v7494_v57 }
 0x27e   :  { %5274 = vmatpush1.bf16.msra.mxu0 %v7507_v9 }
 0x27f   :  { %5276 = vmatprep.subr.bf16.mxu0 %v7512_v10 }
 0x282   :  { %5278 = vmatpush1.bf16.msra.mxu0 %v7525_v24 }
 0x283   :  { %5280 = vmatprep.subr.bf16.mxu0 %v7530_v26 }
 0x286   :  { %5282 = vmatpush1.bf16.msra.mxu0 %v7540_v44  ;;  %v9596_v44 = vld [vmem:[#allocation59_spill] sm:$0xff] }
 0x287   :  { %5284 = vmatprep.subr.bf16.mxu0 %v7544_v45  ;;  %v9597_v45 = vld [vmem:[#allocation62_spill] sm:$0xff] }
 0x28a   :  { %5286 = vmatpush1.bf16.msra.mxu0 %v9587_v4  ;;  %v9598_v4 = vld [vmem:[#allocation63_spill] sm:$0xff] }
 0x28b   :  { %5288 = vmatprep.subr.bf16.mxu0 %v9588_v25  ;;  %v9599_v25 = vld [vmem:[#allocation66_spill] sm:$0xff] }
 0x28e   :  { %5290 = vmatpush1.bf16.msra.mxu0 %v9589_v16  ;;  %v9600_v16 = vld [vmem:[#allocation67_spill] sm:$0xff] }
 0x28f   :  { %5292 = vmatprep.subr.bf16.mxu0 %v9590_v60  ;;  %v1028_v60 = vpop.f32.mrb[16].mxu1 }
 0x292   :  { %5294 = vmatpush1.bf16.msra.mxu0 %v9591_v50  ;;  %v9601_v50 = vld [vmem:[#allocation70_spill] sm:$0xff] }
 0x293   :  { %5296 = vmatprep.subr.bf16.mxu0 %v9592_v0  ;;  %v9602_v0 = vld [vmem:[#allocation71_spill] sm:$0xff] }
 0x296   :  { %5298 = vmatpush1.bf16.msra.mxu0 %v9593_v19  ;;  %v9603_v19 = vld [vmem:[#allocation73_spill] sm:$0xff] }
 0x297   :  { %5300 = vmatprep.subr.bf16.mxu0 %v9594_v62  ;;  %v9604_v62 = vld [vmem:[#allocation89_spill] sm:$0xff] }
 0x29a   :  { %5302 = vmatpush1.bf16.msra.mxu0 %v9595_v42  ;;  %v1030_v42 = vpop.f32.mrb[17].mxu1 }
 0x29b   :  { %5304 = vmatprep.subr.bf16.mxu0 %v9596_v44 }
 0x29e   :  { %5306 = vmatpush1.bf16.msra.mxu0 %v9597_v45  ;;  %v780_v45 = vld [vmem:[%s9182_s9] sm:$0x7] }
 0x29f   :  { %5308 = vmatprep.subr.bf16.mxu0 %v9598_v4  ;;  %v9605_v4 = vsub.s32 0, %v7810_v23 }
 0x2a1   :  { %v7967_v44 = vrot.slane %v780_v45, %v9605_v4 }
 0x2a2   :  { %5310 = vmatpush1.bf16.msra.mxu0 %v9599_v25 }
 0x2a3   :  { %5312 = vmatprep.subr.bf16.mxu0 %v9600_v16  ;;  %9606 = vst [vmem:[#allocation138_spill] sm:$0xff] %v7967_v44  ;;  %v9607_v16 = vsub.s32 1, %v7810_v23 }
 0x2a5   :  { %v7971_v25 = vrot.slane %v780_v45, %v9607_v16  ;;  %v7979_v16 = vld [vmem:[%s9183_s10] ss:$0 sm:$0xff] }
 0x2a6   :  { %5314 = vmatpush1.bf16.msra.mxu0 %v9601_v50  ;;  %9609 = vst [vmem:[#allocation140_spill] sm:$0xff] %v7979_v16 }
 0x2a7   :  { %5316 = vmatprep.subr.bf16.mxu0 %v9602_v0  ;;  %9608 = vst [vmem:[#allocation139_spill] sm:$0xff] %v7971_v25 }
 0x2aa   :  { %5318 = vmatpush1.bf16.msra.mxu0 %v9603_v19 }
 0x2ab   :  { %5384 = vmatprep.subr.bf16.mxu0 %v9604_v62 }
 0x320   :  { %v1121_v50 = vpop.f32.mrb[18].mxu0 }
 0x321   :  { %v1122_v0 = vadd.f32 %v1121_v50, %v7967_v44  ;;  %v1123_v26 = vpop.f32.mrb[19].mxu0  ;;  %v1210_v44 = vadd.f32 %v7979_v16, %v1030_v42 }
 0x322   :  { %v1124_v19 = vadd.f32 %v1123_v26, %v7971_v25  ;;  %v9610_v26 = vsub.s32 2, %v7810_v23  ;;  %v7987_v25 = vpop.permute.xlu0 %538  ;;  %v9613_v23 = vld [vmem:[#allocation91_spill] sm:$0xff] }
 0x323   :  { %v1196_v62 = vadd.f32 %v1122_v0, %v7882_v20  ;;  %vm4326_vm2 = vcmp.gt.s32.totalorder %v7987_v25, 0  ;;  %vm4331_vm3 = vcmp.gt.s32.totalorder %v7987_v25, 1  ;;  %vm4336_vm4 = vcmp.gt.s32.totalorder %v7987_v25, 2 }
 0x324   :  { %v1197_v24 = vadd.f32 %v1124_v19, %v1028_v60  ;;  %v7984_v20 = vrot.slane %v780_v45, %v9610_v26  ;;  %v9612_v45 = vld [vmem:[#allocation76_spill] sm:$0xff]  ;;  %v9615_v26 = vld [vmem:[#allocation77_spill] sm:$0xff]  ;;  %vm4341_vm5 = vcmp.gt.s32.totalorder %v7987_v25, 3  ;;  %vm4346_vm6 = vcmp.gt.s32.totalorder %v7987_v25, 4 }
 0x325   :  { %v4324_v10 = vmul.f32 -1.442695, %v1196_v62  ;;  %vm4351_vm7 = vcmp.gt.s32.totalorder %v7987_v25, 5  ;;  %vm4356_vm8 = vcmp.gt.s32.totalorder %v7987_v25, 6  ;;  %vm4361_vm9 = vcmp.gt.s32.totalorder %v7987_v25, 7 }
 0x326   :  { %v4325_v9 = vmul.f32 -1.442695, %v1197_v24 }
 0x327   :  { %7010 = vpow2.f32 %v4324_v10 }
 0x328   :  { %7012 = vpow2.f32 %v4325_v9 }
 0x331   :  { %v7011_v57 = vpop.eup %7010 }
 0x332   :  { %v1204_v4 = vadd.f32 1.0, %v7011_v57  ;;  %v7013_v55 = vpop.eup %7012 }
 0x333   :  { %v1205_v50 = vadd.f32 1.0, %v7013_v55 }
 0x334   :  { %7014 = vrcp.f32 %v1204_v4 }
 0x335   :  { %7016 = vrcp.f32 %v1205_v50  ;;  %v9614_v50 = vld [vmem:[#allocation93_spill] sm:$0xff] }
 0x33e   :  { %v7015_v60 = vpop.eup %7014 }
 0x33f   :  { %v1211_v10 = vmul.f32 %v7015_v60, %v1210_v44  ;;  %v7017_v19 = vpop.eup %7016  ;;  %v9611_v44 = vld [vmem:[#allocation75_spill] sm:$0xff]  ;;  %v9616_v60 = vld [vmem:[#allocation78_spill] sm:$0xff] }
 0x340   :  { %v1192_v24 = vpop.f32.mrb[20].mxu0  ;;  %v1214_v62 = vsub.f32 1.0, %v7017_v19  ;;  %v1216_v42 = vmul.f32 0.0, %v7017_v19  ;;  %v9622_v19 = vld [vmem:[#allocation101_spill] sm:$0xff] }
 0x341   :  { %v1193_v57 = vadd.f32 %v1192_v24, %v7984_v20  ;;  %v4627_v9 = vpop.f32.mrb[21].mxu0  ;;  %v9618_v24 = vld [vmem:[#allocation97_spill] sm:$0xff] }
 0x342   :  { %v9620_v9 = vld [vmem:[#allocation80_spill] sm:$0xff] }
 0x343   :  { %v1212_v0 = vadd.f32 %v1211_v10, %v1193_v57  ;;  %v9617_v10 = vld [vmem:[#allocation95_spill] sm:$0xff] }
 0x344   :  { %v9619_v57 = vld [vmem:[#allocation79_spill] sm:$0xff] }
 0x345   :  { %7018 = vtanh.f32 %v1212_v0  ;;  %v9621_v0 = vld [vmem:[#allocation99_spill] sm:$0xff] }
 0x34f   :  { %v7019_v4 = vpop.eup %7018 }
 0x350   :  { %v1215_v55 = vmul.f32 %v7019_v4, %v1214_v62  ;;  %v9623_v62 = vld [vmem:[#allocation81_spill] sm:$0xff]  ;;  %v9624_v4 = vld [vmem:[#allocation82_spill] sm:$0xff] }
 0x352   :  { %v7989_v16 = vadd.f32 %v1216_v42, %v1215_v55  ;;  %v9625_v55 = vld [vmem:[#allocation103_spill] sm:$0xff]  ;;  %v9626_v42 = vld [vmem:[#allocation105_spill] sm:$0xff] }
 0x354   :  { %4365 = vmatprep.mubr.msk.f32.mxu1 %vm4326_vm2, %v7989_v16  ;;  %4367 = vmatprep.mubr.msk.f32.mxu0 %vm4326_vm2, %v7989_v16 }
 0x355   :  { %4366 = vmatmul.mubr.msk.f32.vlgmr.msra.gmra.mrb[2].mxu1 %vm4326_vm2, %v7894_v27  ;;  %4368 = vmatmul.mubr.msk.f32.vlgmr.msra.gmra.mrb[22].mxu0 %vm4326_vm2, %v7894_v27 }
 0x356   :  { %5322 = vmatpush1.bf16.msra.mxu1 %v9611_v44  ;;  %4369 = vmatprep.mubr.msk.f32.mxu1 %vm4326_vm2, %v7989_v16 }
 0x357   :  { %5324 = vmatprep.subr.bf16.mxu1 %v9612_v45  ;;  %5386 = vmatpush1.bf16.msra.mxu0 %v9613_v23 }
 0x358   :  { %5388 = vmatprep.subr.bf16.mxu0 %v9614_v50  ;;  %1527 = vmatprep.mubr.f32.mxu0 %v9521_v61 }
 0x35a   :  { %5326 = vmatpush1.bf16.msra.mxu1 %v9615_v26 }
 0x35b   :  { %5328 = vmatprep.subr.bf16.mxu1 %v9616_v60  ;;  %5390 = vmatpush1.bf16.msra.mxu0 %v9617_v10  ;;  %v9627_v60 = vld [vmem:[#allocation83_spill] sm:$0xff]  ;;  %v9628_v10 = vld [vmem:[#allocation84_spill] sm:$0xff] }
 0x35c   :  { %5392 = vmatprep.subr.bf16.mxu0 %v9618_v24  ;;  %v9629_v24 = vld [vmem:[#allocation107_spill] sm:$0xff] }
 0x35e   :  { %5330 = vmatpush1.bf16.msra.mxu1 %v9619_v57  ;;  %v9630_v57 = vld [vmem:[#allocation109_spill] sm:$0xff] }
 0x35f   :  { %5332 = vmatprep.subr.bf16.mxu1 %v9620_v9  ;;  %5394 = vmatpush1.bf16.msra.mxu0 %v9621_v0  ;;  %v9631_v9 = vld [vmem:[#allocation85_spill] sm:$0xff]  ;;  %v9632_v0 = vld [vmem:[#allocation86_spill] sm:$0xff] }
 0x360   :  { %5396 = vmatprep.subr.bf16.mxu0 %v9622_v19  ;;  %v9633_v19 = vld [vmem:[#allocation111_spill] sm:$0xff] }
 0x362   :  { %5334 = vmatpush1.bf16.msra.mxu1 %v9623_v62 }
 0x363   :  { %5336 = vmatprep.subr.bf16.mxu1 %v9624_v4  ;;  %5398 = vmatpush1.bf16.msra.mxu0 %v9625_v55  ;;  %v9634_v4 = vld [vmem:[#allocation87_spill] sm:$0xff]  ;;  %v9635_v55 = vld [vmem:[#allocation88_spill] sm:$0xff] }
 0x364   :  { %5400 = vmatprep.subr.bf16.mxu0 %v9626_v42  ;;  %v9636_v42 = vld [vmem:[#allocation115_spill] sm:$0xff] }
 0x366   :  { %5338 = vmatpush1.bf16.msra.mxu1 %v9627_v60 }
 0x367   :  { %5340 = vmatprep.subr.bf16.mxu1 %v9628_v10  ;;  %5402 = vmatpush1.bf16.msra.mxu0 %v9629_v24  ;;  %v9637_v10 = vld [vmem:[#allocation90_spill] sm:$0xff]  ;;  %v9638_v24 = vld [vmem:[#allocation92_spill] sm:$0xff] }
 0x368   :  { %5404 = vmatprep.subr.bf16.mxu0 %v9630_v57 }
 0x36a   :  { %5342 = vmatpush1.bf16.msra.mxu1 %v9631_v9  ;;  %v9649_v9 = vld [vmem:[#allocation114_spill] sm:$0xff] }
 0x36b   :  { %5344 = vmatprep.subr.bf16.mxu1 %v9632_v0  ;;  %5406 = vmatpush1.bf16.msra.mxu0 %v9633_v19  ;;  %v9639_v0 = vld [vmem:[#allocation94_spill] sm:$0xff]  ;;  %v9640_v19 = vld [vmem:[#allocation96_spill] sm:$0xff] }
 0x36c   :  { %5408 = vmatprep.subr.bf16.mxu0 %v7777_v6  ;;  %v9641_v6 = vld [vmem:[#allocation98_spill] sm:$0xff] }
 0x36e   :  { %5346 = vmatpush1.bf16.msra.mxu1 %v9634_v4  ;;  %v9642_v4 = vld [vmem:[#allocation100_spill] sm:$0xff] }
 0x36f   :  { %5348 = vmatprep.subr.bf16.mxu1 %v9635_v55  ;;  %5410 = vmatpush1.bf16.msra.mxu0 %v9636_v42  ;;  %v9643_v55 = vld [vmem:[#allocation102_spill] sm:$0xff]  ;;  %v9644_v42 = vld [vmem:[#allocation104_spill] sm:$0xff] }
 0x370   :  { %5412 = vmatprep.subr.bf16.mxu0 %v7789_v30  ;;  %v9645_v30 = vld [vmem:[#allocation106_spill] sm:$0xff] }
 0x372   :  { %5350 = vmatpush1.bf16.msra.mxu1 %v9637_v10  ;;  %v9646_v10 = vld [vmem:[#allocation108_spill] sm:$0xff] }
 0x373   :  { %5352 = vmatprep.subr.bf16.mxu1 %v9638_v24  ;;  %5414 = vmatpush1.bf16.msra.mxu0 %v7794_v40  ;;  %v9647_v24 = vld [vmem:[#allocation110_spill] sm:$0xff]  ;;  %v9648_v40 = vld [vmem:[#allocation112_spill] sm:$0xff] }
 0x374   :  { %5415 = vmatprep.subr.bf16.mxu0 %v9580_v46 }
 0x376   :  { %5354 = vmatpush1.bf16.msra.mxu1 %v9639_v0 }
 0x377   :  { %5356 = vmatprep.subr.bf16.mxu1 %v9640_v19 }
 0x37a   :  { %5358 = vmatpush1.bf16.msra.mxu1 %v9641_v6 }
 0x37b   :  { %5360 = vmatprep.subr.bf16.mxu1 %v9642_v4 }
 0x37e   :  { %5362 = vmatpush1.bf16.msra.mxu1 %v9643_v55 }
 0x37f   :  { %5364 = vmatprep.subr.bf16.mxu1 %v9644_v42 }
 0x382   :  { %5366 = vmatpush1.bf16.msra.mxu1 %v9645_v30 }
 0x383   :  { %5368 = vmatprep.subr.bf16.mxu1 %v9646_v10 }
 0x386   :  { %5370 = vmatpush1.bf16.msra.mxu1 %v9647_v24 }
 0x387   :  { %5372 = vmatprep.subr.bf16.mxu1 %v9648_v40 }
 0x38a   :  { %5374 = vmatpush1.bf16.msra.mxu1 %v9649_v9 }
 0x38b   :  { %5376 = vmatprep.subr.bf16.mxu1 %v7787_v43 }
 0x38e   :  { %5378 = vmatpush1.bf16.msra.mxu1 %v7791_v51  ;;  %v9650_v51 = vld [vmem:[#allocation21_spill] sm:$0xff] }
 0x38f   :  { %5380 = vmatprep.subr.bf16.mxu1 %v7799_v58  ;;  %v9651_v58 = vld [vmem:[#allocation24_spill] sm:$0xff] }
 0x392   :  { %5382 = vmatpush1.bf16.msra.mxu1 %v7802_v2  ;;  %v9653_v2 = vld [vmem:[#allocation32_spill] sm:$0xff] }
 0x393   :  { %5440 = vmatprep.subr.bf16.mxu1 %v7410_v34  ;;  %v9652_v34 = vld [vmem:[#allocation29_spill] sm:$0xff] }
 0x395   :  { %4370 = vmatmul.mubr.msk.f32.vlgmr.msra.gmra.mrb[18].mxu1 %vm4326_vm2, %v7894_v27 }
 0x396   :  { %5442 = vmatpush1.bf16.msra.mxu1 %v7427_v52 }
 0x397   :  { %5444 = vmatprep.subr.bf16.mxu1 %v7429_v56 }
 0x39a   :  { %5446 = vmatpush1.bf16.msra.mxu1 %v7440_v5 }
 0x39b   :  { %5448 = vmatprep.subr.bf16.mxu1 %v7444_v8 }
 0x39e   :  { %5450 = vmatpush1.bf16.msra.mxu1 %v7455_v21 }
 0x39f   :  { %5452 = vmatprep.subr.bf16.mxu1 %v9650_v51 }
 0x3a2   :  { %5454 = vmatpush1.bf16.msra.mxu1 %v9651_v58 }
 0x3a3   :  { %5456 = vmatprep.subr.bf16.mxu1 %v7481_v47 }
 0x3a6   :  { %5458 = vmatpush1.bf16.msra.mxu1 %v7497_v41  ;;  %v9665_v41 = vld [vmem:[#allocation130_spill] sm:$0xff] }
 0x3a7   :  { %5460 = vmatprep.subr.bf16.mxu1 %v9652_v34 }
 0x3aa   :  { %5462 = vmatpush1.bf16.msra.mxu1 %v9653_v2  ;;  %v9664_v2 = vld [vmem:[#allocation129_spill] sm:$0xff] }
 0x3ab   :  { %5464 = vmatprep.subr.bf16.mxu1 %v7519_v17  ;;  %v9654_v17 = vld [vmem:[#allocation56_spill] sm:$0xff] }
 0x3ae   :  { %5466 = vmatpush1.bf16.msra.mxu1 %v7533_v29  ;;  %v9655_v29 = vld [vmem:[#allocation57_spill] sm:$0xff] }
 0x3af   :  { %5468 = vmatprep.subr.bf16.mxu1 %v7537_v32  ;;  %v9656_v32 = vld [vmem:[#allocation60_spill] sm:$0xff] }
 0x3b2   :  { %5470 = vmatpush1.bf16.msra.mxu1 %v7547_v49  ;;  %v9657_v49 = vld [vmem:[#allocation61_spill] sm:$0xff] }
 0x3b3   :  { %5472 = vmatprep.subr.bf16.mxu1 %v7551_v54  ;;  %v9658_v54 = vld [vmem:[#allocation64_spill] sm:$0xff] }
 0x3b6   :  { %5474 = vmatpush1.bf16.msra.mxu1 %v7563_v7  ;;  %v9659_v7 = vld [vmem:[#allocation65_spill] sm:$0xff] }
 0x3b7   :  { %5476 = vmatprep.subr.bf16.mxu1 %v7567_v14  ;;  %v9660_v14 = vld [vmem:[#allocation68_spill] sm:$0xff] }
 0x3ba   :  { %5478 = vmatpush1.bf16.msra.mxu1 %v7576_v28  ;;  %v9661_v28 = vld [vmem:[#allocation69_spill] sm:$0xff] }
 0x3bb   :  { %5480 = vmatprep.subr.bf16.mxu1 %v7579_v36  ;;  %v9662_v36 = vld [vmem:[#allocation72_spill] sm:$0xff] }
 0x3be   :  { %5482 = vmatpush1.bf16.msra.mxu1 %v7588_v59  ;;  %v9663_v59 = vld [vmem:[#allocation74_spill] sm:$0xff] }
 0x3bf   :  { %5484 = vmatprep.subr.bf16.mxu1 %v7591_v3 }
 0x3c2   :  { %5486 = vmatpush1.bf16.msra.mxu1 %v9654_v17 }
 0x3c3   :  { %5488 = vmatprep.subr.bf16.mxu1 %v9655_v29 }
 0x3c6   :  { %5490 = vmatpush1.bf16.msra.mxu1 %v9656_v32 }
 0x3c7   :  { %5492 = vmatprep.subr.bf16.mxu1 %v9657_v49 }
 0x3ca   :  { %5494 = vmatpush1.bf16.msra.mxu1 %v9658_v54 }
 0x3cb   :  { %5496 = vmatprep.subr.bf16.mxu1 %v9659_v7 }
 0x3ce   :  { %5498 = vmatpush1.bf16.msra.mxu1 %v9660_v14 }
 0x3cf   :  { %5500 = vmatprep.subr.bf16.mxu1 %v9661_v28 }
 0x3d2   :  { %5502 = vmatpush1.bf16.msra.mxu1 %v9662_v36 }
 0x3d3   :  { %5568 = vmatprep.subr.bf16.mxu1 %v9663_v59 }
 0x428   :  { %v1294_v3 = vpop.f32.mrb[2].mxu1  ;;  %v1365_v17 = vpop.f32.mrb[22].mxu0 }
 0x429   :  { %v6959_v29 = vadd.f32 %v1294_v3, %v9664_v2  ;;  %v1296_v34 = vpop.f32.mrb[3].mxu1  ;;  %v8092_v32 = vpop.f32.mrb[23].mxu0  ;;  %v1455_v59 = vadd.f32 %v7888_v53, %v1365_v17  ;;  %v9666_v3 = vld [vmem:[#allocation122_spill] sm:$0xff] }
 0x42a   :  { %v6960_v54 = vadd.f32 %v1296_v34, %v9665_v41  ;;  %v1220_v34 = vsel %vm4326_vm2, %v7894_v27, 0.0  ;;  %v9672_v27 = vld [vmem:[#allocation35_spill] sm:$0xff] }
 0x42b   :  { %v4327_v49 = vmul.f32 -1.442695, %v6959_v29 }
 0x42c   :  { %v4328_v7 = vmul.f32 -1.442695, %v6960_v54 }
 0x42d   :  { %7020 = vpow2.f32 %v4327_v49 }
 0x42e   :  { %7022 = vpow2.f32 %v4328_v7  ;;  %v9667_v7 = vld [vmem:[#allocation26_spill] sm:$0xff] }
 0x437   :  { %v7021_v14 = vpop.eup %7020 }
 0x438   :  { %v1449_v47 = vadd.f32 1.0, %v7021_v14  ;;  %v7023_v28 = vpop.eup %7022  ;;  %v9668_v14 = vld [vmem:[#allocation27_spill] sm:$0xff] }
 0x439   :  { %v1450_v36 = vadd.f32 1.0, %v7023_v28  ;;  %v9669_v28 = vld [vmem:[#allocation30_spill] sm:$0xff] }
 0x43a   :  { %7024 = vrcp.f32 %v1449_v47 }
 0x43b   :  { %7026 = vrcp.f32 %v1450_v36  ;;  %v9670_v36 = vld [vmem:[#allocation31_spill] sm:$0xff] }
 0x444   :  { %v7025_v58 = vpop.eup %7024 }
 0x445   :  { %v1456_v51 = vmul.f32 %v7025_v58, %v1455_v59  ;;  %v7027_v21 = vpop.eup %7026  ;;  %v9671_v59 = vld [vmem:[#allocation34_spill] sm:$0xff] }
 0x446   :  { %v1459_v29 = vsub.f32 1.0, %v7027_v21  ;;  %v1461_v54 = vmul.f32 %v7027_v21, %v1220_v34  ;;  %v9673_v58 = vld [vmem:[#allocation38_spill] sm:$0xff] }
 0x447   :  { %v1457_v2 = vadd.f32 %v1456_v51, %v9666_v3  ;;  %v9674_v51 = vld [vmem:[#allocation39_spill] sm:$0xff] }
 0x448   :  { %v9676_v3 = vld [vmem:[#allocation43_spill] sm:$0xff] }
 0x449   :  { %7028 = vtanh.f32 %v1457_v2  ;;  %v9675_v2 = vld [vmem:[#allocation42_spill] sm:$0xff] }
 0x453   :  { %v7029_v8 = vpop.eup %7028 }
 0x454   :  { %v1460_v49 = vmul.f32 %v7029_v8, %v1459_v29  ;;  %v9677_v29 = vld [vmem:[#allocation46_spill] sm:$0xff] }
 0x456   :  { %v1462_v47 = vadd.f32 %v1461_v54, %v1460_v49  ;;  %v9679_v49 = vld [vmem:[#allocation50_spill] sm:$0xff]  ;;  %v9680_v54 = vld [vmem:[#allocation51_spill] sm:$0xff] }
 0x458   :  { %1528 = vmatmul.mubr.f32.vlgmr.msra.gmra.mrb[24].mxu0 %v1462_v47  ;;  %v8103_v17 = vsel %vm4331_vm3, %v1462_v47, %v1220_v34  ;;  %v9678_v34 = vld [vmem:[#allocation47_spill] sm:$0xff] }
 0x459   :  { %5417 = vmatpush3.bf16.msra.mxu0 %v7892_v39  ;;  %4660 = vmatprep.mubr.msk.f32.mxu0 %vm7225_vm1, %v9521_v61 }
 0x45a   :  { %5418 = vmatprep.subr.bf16.mxu0 %v9580_v46 }
 0x45d   :  { %5420 = vmatpush3.bf16.msra.mxu0 %v7898_v12 }
 0x45e   :  { %5421 = vmatprep.subr.bf16.mxu0 %v9580_v46 }
 0x461   :  { %5423 = vmatpush3.bf16.msra.mxu0 %v7904_v35 }
 0x462   :  { %5424 = vmatprep.subr.bf16.mxu0 %v9580_v46 }
 0x465   :  { %5426 = vmatpush3.bf16.msra.mxu0 %v7908_v31 }
 0x466   :  { %5427 = vmatprep.subr.bf16.mxu0 %v9580_v46 }
 0x468   :  { %v1436_v8 = vpop.f32.mrb[18].mxu1 }
 0x469   :  { %v1438_v21 = vpop.f32.mrb[19].mxu1  ;;  %5429 = vmatpush3.bf16.msra.mxu0 %v7912_v22 }
 0x46a   :  { %5430 = vmatprep.subr.bf16.mxu0 %v9580_v46 }
 0x46d   :  { %5432 = vmatpush3.bf16.msra.mxu0 %v7916_v48 }
 0x46e   :  { %5433 = vmatprep.subr.bf16.mxu0 %v9580_v46 }
 0x471   :  { %5435 = vmatpush3.bf16.msra.mxu0 %v7920_v13 }
 0x472   :  { %5436 = vmatprep.subr.bf16.mxu0 %v9580_v46 }
 0x475   :  { %5438 = vmatpush3.bf16.msra.mxu0 %v7924_v11 }
 0x476   :  { %5504 = vmatprep.subr.bf16.mxu0 %v7414_v38 }
 0x478   :  { %4661 = vmatmul.mubr.f32.vlgmr.msra.gmra.mrb[26].mxu0 %v1462_v47  ;;  %v9681_v47 = vld [vmem:[#allocation54_spill] sm:$0xff] }
 0x479   :  { %5506 = vmatpush1.bf16.msra.mxu0 %v7431_v63 }
 0x47a   :  { %5508 = vmatprep.subr.bf16.mxu0 %v7435_v1 }
 0x47d   :  { %5510 = vmatpush1.bf16.msra.mxu0 %v7448_v15 }
 0x47e   :  { %5512 = vmatprep.subr.bf16.mxu0 %v7452_v18 }
 0x481   :  { %5514 = vmatpush1.bf16.msra.mxu0 %v7467_v33 }
 0x482   :  { %5516 = vmatprep.subr.bf16.mxu0 %v7471_v37 }
 0x485   :  { %5518 = vmatpush1.bf16.msra.mxu0 %v9667_v7 }
 0x486   :  { %5520 = vmatprep.subr.bf16.mxu0 %v9668_v14 }
 0x489   :  { %5522 = vmatpush1.bf16.msra.mxu0 %v9669_v28  ;;  %v9694_v28 = vld [vmem:[#allocation139_spill] sm:$0xff] }
 0x48a   :  { %5524 = vmatprep.subr.bf16.mxu0 %v9670_v36 }
 0x48d   :  { %5526 = vmatpush1.bf16.msra.mxu0 %v9671_v59  ;;  %v9682_v59 = vld [vmem:[#allocation55_spill] sm:$0xff] }
 0x48e   :  { %5528 = vmatprep.subr.bf16.mxu0 %v9672_v27  ;;  %v9683_v27 = vld [vmem:[#allocation58_spill] sm:$0xff] }
 0x491   :  { %5530 = vmatpush1.bf16.msra.mxu0 %v9673_v58  ;;  %v9684_v58 = vld [vmem:[#allocation59_spill] sm:$0xff] }
 0x492   :  { %5532 = vmatprep.subr.bf16.mxu0 %v9674_v51  ;;  %v9685_v51 = vld [vmem:[#allocation62_spill] sm:$0xff] }
 0x495   :  { %5534 = vmatpush1.bf16.msra.mxu0 %v9675_v2  ;;  %v9686_v2 = vld [vmem:[#allocation63_spill] sm:$0xff] }
 0x496   :  { %5536 = vmatprep.subr.bf16.mxu0 %v9676_v3  ;;  %v9687_v3 = vld [vmem:[#allocation66_spill] sm:$0xff] }
 0x499   :  { %5538 = vmatpush1.bf16.msra.mxu0 %v9677_v29  ;;  %v9688_v29 = vld [vmem:[#allocation67_spill] sm:$0xff] }
 0x49a   :  { %5540 = vmatprep.subr.bf16.mxu0 %v9678_v34  ;;  %v9689_v34 = vld [vmem:[#allocation70_spill] sm:$0xff] }
 0x49d   :  { %5542 = vmatpush1.bf16.msra.mxu0 %v9679_v49  ;;  %v9690_v49 = vld [vmem:[#allocation71_spill] sm:$0xff] }
 0x49e   :  { %5544 = vmatprep.subr.bf16.mxu0 %v9680_v54  ;;  %v9691_v54 = vld [vmem:[#allocation73_spill] sm:$0xff] }
 0x4a1   :  { %5546 = vmatpush1.bf16.msra.mxu0 %v9681_v47  ;;  %v9692_v47 = vld [vmem:[#allocation89_spill] sm:$0xff] }
 0x4a2   :  { %5548 = vmatprep.subr.bf16.mxu0 %v9682_v59 }
 0x4a5   :  { %5550 = vmatpush1.bf16.msra.mxu0 %v9683_v27  ;;  %v9693_v27 = vld [vmem:[#allocation138_spill] sm:$0xff] }
 0x4a6   :  { %5552 = vmatprep.subr.bf16.mxu0 %v9684_v58 }
 0x4a9   :  { %5554 = vmatpush1.bf16.msra.mxu0 %v9685_v51 }
 0x4aa   :  { %5556 = vmatprep.subr.bf16.mxu0 %v9686_v2 }
 0x4ad   :  { %5558 = vmatpush1.bf16.msra.mxu0 %v9687_v3 }
 0x4ae   :  { %5560 = vmatprep.subr.bf16.mxu0 %v9688_v29 }
 0x4b1   :  { %5562 = vmatpush1.bf16.msra.mxu0 %v9689_v34 }
 0x4b2   :  { %5564 = vmatprep.subr.bf16.mxu0 %v9690_v49 }
 0x4b5   :  { %5566 = vmatpush1.bf16.msra.mxu0 %v9691_v54 }
 0x4b6   :  { %5632 = vmatprep.subr.bf16.mxu0 %v9692_v47  ;;  %v9695_v47 = vld [vmem:[#allocation140_spill] sm:$0xff] }
 0x4b7   :  { %v1618_v54 = vadd.f32 %v9695_v47, %v1438_v21 }
 0x52b   :  { %v1529_v59 = vpop.f32.mrb[24].mxu0 }
 0x52c   :  { %v1530_v36 = vadd.f32 %v1529_v59, %v9693_v27  ;;  %v1531_v58 = vpop.f32.mrb[25].mxu0 }
 0x52d   :  { %v1532_v51 = vadd.f32 %v1531_v58, %v9694_v28 }
 0x52e   :  { %v1604_v2 = vadd.f32 %v1530_v36, %v8092_v32  ;;  %v1221_v32 = vsel %vm4326_vm2, %v7989_v16, 0.0  ;;  %v9697_v16 = vld [vmem:[#allocation95_spill] sm:$0xff] }
 0x52f   :  { %v1605_v14 = vadd.f32 %v1532_v51, %v1436_v8 }
 0x530   :  { %v4329_v3 = vmul.f32 -1.442695, %v1604_v2 }
 0x531   :  { %v4330_v7 = vmul.f32 -1.442695, %v1605_v14 }
 0x532   :  { %7030 = vpow2.f32 %v4329_v3 }
 0x533   :  { %7032 = vpow2.f32 %v4330_v7 }
 0x53c   :  { %v7031_v34 = vpop.eup %7030 }
 0x53d   :  { %v7033_v29 = vpop.eup %7032  ;;  %v1612_v49 = vadd.f32 1.0, %v7031_v34  ;;  %v9700_v34 = vld [vmem:[#allocation80_spill] sm:$0xff] }
 0x53e   :  { %v1613_v37 = vadd.f32 1.0, %v7033_v29  ;;  %v9699_v29 = vld [vmem:[#allocation79_spill] sm:$0xff] }
 0x53f   :  { %7034 = vrcp.f32 %v1612_v49  ;;  %v9701_v49 = vld [vmem:[#allocation99_spill] sm:$0xff] }
 0x540   :  { %7036 = vrcp.f32 %v1613_v37 }
 0x549   :  { %v7035_v33 = vpop.eup %7034 }
 0x54a   :  { %v7037_v59 = vpop.eup %7036  ;;  %v1619_v27 = vmul.f32 %v7035_v33, %v1618_v54  ;;  %v9696_v33 = vld [vmem:[#allocation78_spill] sm:$0xff]  ;;  %v9702_v54 = vld [vmem:[#allocation101_spill] sm:$0xff] }
 0x54b   :  { %v1600_v8 = vpop.f32.mrb[26].mxu0  ;;  %v1624_v36 = vmul.f32 %v7037_v59, %v1221_v32  ;;  %v1622_v51 = vsub.f32 1.0, %v7037_v59  ;;  %v9703_v59 = vld [vmem:[#allocation82_spill] sm:$0xff] }
 0x54c   :  { %v1601_v14 = vadd.f32 %v1600_v8, %v7984_v20  ;;  %v4662_v7 = vpop.f32.mrb[27].mxu0  ;;  %v9705_v8 = vld [vmem:[#allocation105_spill] sm:$0xff] }
 0x54d   :  { %v9708_v7 = vld [vmem:[#allocation85_spill] sm:$0xff] }
 0x54e   :  { %v1620_v58 = vadd.f32 %v1619_v27, %v1601_v14  ;;  %v9698_v27 = vld [vmem:[#allocation97_spill] sm:$0xff]  ;;  %v9707_v14 = vld [vmem:[#allocation107_spill] sm:$0xff] }
 0x550   :  { %7038 = vtanh.f32 %v1620_v58  ;;  %v9709_v58 = vld [vmem:[#allocation86_spill] sm:$0xff] }
 0x55a   :  { %v7039_v2 = vpop.eup %7038 }
 0x55b   :  { %v1623_v3 = vmul.f32 %v7039_v2, %v1622_v51  ;;  %v9710_v51 = vld [vmem:[#allocation111_spill] sm:$0xff]  ;;  %v9711_v2 = vld [vmem:[#allocation113_spill] sm:$0xff] }
 0x55d   :  { %v1625_v37 = vadd.f32 %v1624_v36, %v1623_v3  ;;  %v9706_v36 = vld [vmem:[#allocation84_spill] sm:$0xff]  ;;  %v9712_v3 = vld [vmem:[#allocation87_spill] sm:$0xff] }
 0x55f   :  { %v8165_v21 = vsel %vm4331_vm3, %v1625_v37, %v1221_v32  ;;  %v9704_v32 = vld [vmem:[#allocation103_spill] sm:$0xff]  ;;  %v9713_v37 = vld [vmem:[#allocation88_spill] sm:$0xff] }
 0x560   :  { %1701 = vmatprep.mubr.f32.mxu1 %v8165_v21  ;;  %1772 = vmatprep.mubr.f32.mxu0 %v8165_v21 }
 0x561   :  { %1702 = vmatmul.mubr.f32.vlgmr.msra.gmra.mrb[4].mxu1 %v8103_v17  ;;  %1773 = vmatmul.mubr.f32.vlgmr.msra.gmra.mrb[28].mxu0 %v8103_v17 }
 0x562   :  { %5570 = vmatpush1.bf16.msra.mxu1 %v9611_v44  ;;  %1843 = vmatprep.mubr.f32.mxu1 %v8165_v21 }
 0x563   :  { %5572 = vmatprep.subr.bf16.mxu1 %v9612_v45  ;;  %5634 = vmatpush1.bf16.msra.mxu0 %v9613_v23 }
 0x564   :  { %5636 = vmatprep.subr.bf16.mxu0 %v9614_v50  ;;  %1936 = vmatprep.mubr.f32.mxu0 %v9521_v61 }
 0x566   :  { %5574 = vmatpush1.bf16.msra.mxu1 %v9615_v26 }
 0x567   :  { %5576 = vmatprep.subr.bf16.mxu1 %v9696_v33  ;;  %5638 = vmatpush1.bf16.msra.mxu0 %v9697_v16 }
 0x568   :  { %5640 = vmatprep.subr.bf16.mxu0 %v9698_v27 }
 0x56a   :  { %5578 = vmatpush1.bf16.msra.mxu1 %v9699_v29 }
 0x56b   :  { %5580 = vmatprep.subr.bf16.mxu1 %v9700_v34  ;;  %5642 = vmatpush1.bf16.msra.mxu0 %v9701_v49 }
 0x56c   :  { %5644 = vmatprep.subr.bf16.mxu0 %v9702_v54 }
 0x56e   :  { %5582 = vmatpush1.bf16.msra.mxu1 %v9623_v62 }
 0x56f   :  { %5584 = vmatprep.subr.bf16.mxu1 %v9703_v59  ;;  %5646 = vmatpush1.bf16.msra.mxu0 %v9704_v32 }
 0x570   :  { %5648 = vmatprep.subr.bf16.mxu0 %v9705_v8  ;;  %v9714_v8 = vld [vmem:[#allocation115_spill] sm:$0xff] }
 0x572   :  { %5586 = vmatpush1.bf16.msra.mxu1 %v9627_v60  ;;  %v9715_v60 = vld [vmem:[#allocation117_spill] sm:$0xff] }
 0x573   :  { %5588 = vmatprep.subr.bf16.mxu1 %v9706_v36  ;;  %5650 = vmatpush1.bf16.msra.mxu0 %v9707_v14  ;;  %v9716_v36 = vld [vmem:[#allocation90_spill] sm:$0xff]  ;;  %v9717_v14 = vld [vmem:[#allocation92_spill] sm:$0xff] }
 0x574   :  { %5652 = vmatprep.subr.bf16.mxu0 %v9630_v57  ;;  %v9718_v57 = vld [vmem:[#allocation119_spill] sm:$0xff] }
 0x576   :  { %5590 = vmatpush1.bf16.msra.mxu1 %v9708_v7 }
 0x577   :  { %5592 = vmatprep.subr.bf16.mxu1 %v9709_v58  ;;  %5654 = vmatpush1.bf16.msra.mxu0 %v9710_v51 }
 0x578   :  { %5656 = vmatprep.subr.bf16.mxu0 %v9711_v2 }
 0x57a   :  { %5594 = vmatpush1.bf16.msra.mxu1 %v9712_v3 }
 0x57b   :  { %5596 = vmatprep.subr.bf16.mxu1 %v9713_v37  ;;  %5658 = vmatpush1.bf16.msra.mxu0 %v9714_v8 }
 0x57c   :  { %5660 = vmatprep.subr.bf16.mxu0 %v9715_v60 }
 0x57e   :  { %5598 = vmatpush1.bf16.msra.mxu1 %v9716_v36 }
 0x57f   :  { %5600 = vmatprep.subr.bf16.mxu1 %v9717_v14  ;;  %5662 = vmatpush1.bf16.msra.mxu0 %v9718_v57 }
 0x580   :  { %5663 = vmatprep.subr.bf16.mxu0 %v9580_v46 }
 0x582   :  { %5602 = vmatpush1.bf16.msra.mxu1 %v9639_v0 }
 0x583   :  { %5604 = vmatprep.subr.bf16.mxu1 %v9640_v19  ;;  %v9719_v19 = vld [vmem:[#allocation118_spill] sm:$0xff] }
 0x586   :  { %5606 = vmatpush1.bf16.msra.mxu1 %v9641_v6  ;;  %v9720_v6 = vld [vmem:[#allocation120_spill] sm:$0xff] }
 0x587   :  { %5608 = vmatprep.subr.bf16.mxu1 %v9642_v4  ;;  %v9721_v4 = vld [vmem:[#allocation121_spill] sm:$0xff] }
 0x58a   :  { %5610 = vmatpush1.bf16.msra.mxu1 %v9643_v55  ;;  %v9722_v55 = vld [vmem:[#allocation10_spill] sm:$0xff] }
 0x58b   :  { %5612 = vmatprep.subr.bf16.mxu1 %v9644_v42 }
 0x58e   :  { %5614 = vmatpush1.bf16.msra.mxu1 %v9645_v30 }
 0x58f   :  { %5616 = vmatprep.subr.bf16.mxu1 %v9646_v10  ;;  %v9752_v10 = vld [vmem:[#allocation129_spill] sm:$0xff] }
 0x592   :  { %5618 = vmatpush1.bf16.msra.mxu1 %v9647_v24  ;;  %v9730_v24 = vld [vmem:[#allocation32_spill] sm:$0xff] }
 0x593   :  { %5620 = vmatprep.subr.bf16.mxu1 %v9648_v40  ;;  %v9723_v40 = vld [vmem:[#allocation17_spill] sm:$0xff] }
 0x596   :  { %5622 = vmatpush1.bf16.msra.mxu1 %v9649_v9  ;;  %v9724_v9 = vld [vmem:[#allocation20_spill] sm:$0xff] }
 0x597   :  { %5624 = vmatprep.subr.bf16.mxu1 %v7787_v43  ;;  %v9725_v43 = vld [vmem:[#allocation21_spill] sm:$0xff] }
 0x59a   :  { %5626 = vmatpush1.bf16.msra.mxu1 %v9719_v19  ;;  %v9726_v19 = vld [vmem:[#allocation24_spill] sm:$0xff] }
 0x59b   :  { %5628 = vmatprep.subr.bf16.mxu1 %v9720_v6  ;;  %v9727_v6 = vld [vmem:[#allocation25_spill] sm:$0xff] }
 0x59e   :  { %5630 = vmatpush1.bf16.msra.mxu1 %v9721_v4  ;;  %v9728_v4 = vld [vmem:[#allocation28_spill] sm:$0xff] }
 0x59f   :  { %5688 = vmatprep.subr.bf16.mxu1 %v9722_v55  ;;  %v9729_v55 = vld [vmem:[#allocation29_spill] sm:$0xff] }
 0x5a1   :  { %1844 = vmatmul.mubr.f32.vlgmr.msra.gmra.mrb[20].mxu1 %v8103_v17 }
 0x5a2   :  { %5690 = vmatpush1.bf16.msra.mxu1 %v7427_v52  ;;  %v9731_v52 = vld [vmem:[#allocation33_spill] sm:$0xff] }
 0x5a3   :  { %5692 = vmatprep.subr.bf16.mxu1 %v7429_v56  ;;  %v9732_v56 = vld [vmem:[#allocation36_spill] sm:$0xff] }
 0x5a6   :  { %5694 = vmatpush1.bf16.msra.mxu1 %v7440_v5  ;;  %v9733_v5 = vld [vmem:[#allocation37_spill] sm:$0xff] }
 0x5a7   :  { %5696 = vmatprep.subr.bf16.mxu1 %v9723_v40  ;;  %v9734_v40 = vld [vmem:[#allocation40_spill] sm:$0xff] }
 0x5aa   :  { %5698 = vmatpush1.bf16.msra.mxu1 %v9724_v9  ;;  %v9735_v9 = vld [vmem:[#allocation41_spill] sm:$0xff] }
 0x5ab   :  { %5700 = vmatprep.subr.bf16.mxu1 %v9725_v43  ;;  %v9736_v43 = vld [vmem:[#allocation44_spill] sm:$0xff] }
 0x5ae   :  { %5702 = vmatpush1.bf16.msra.mxu1 %v9726_v19  ;;  %v9737_v19 = vld [vmem:[#allocation45_spill] sm:$0xff] }
 0x5af   :  { %5704 = vmatprep.subr.bf16.mxu1 %v9727_v6  ;;  %v9738_v6 = vld [vmem:[#allocation48_spill] sm:$0xff] }
 0x5b2   :  { %5706 = vmatpush1.bf16.msra.mxu1 %v9728_v4  ;;  %v9739_v4 = vld [vmem:[#allocation49_spill] sm:$0xff] }
 0x5b3   :  { %5708 = vmatprep.subr.bf16.mxu1 %v9729_v55  ;;  %v9740_v55 = vld [vmem:[#allocation52_spill] sm:$0xff] }
 0x5b6   :  { %5710 = vmatpush1.bf16.msra.mxu1 %v9730_v24  ;;  %v9741_v24 = vld [vmem:[#allocation53_spill] sm:$0xff] }
 0x5b7   :  { %5712 = vmatprep.subr.bf16.mxu1 %v9731_v52  ;;  %v9742_v52 = vld [vmem:[#allocation56_spill] sm:$0xff] }
 0x5ba   :  { %5714 = vmatpush1.bf16.msra.mxu1 %v9732_v56  ;;  %v9743_v56 = vld [vmem:[#allocation57_spill] sm:$0xff] }
 0x5bb   :  { %5716 = vmatprep.subr.bf16.mxu1 %v9733_v5  ;;  %v9744_v5 = vld [vmem:[#allocation60_spill] sm:$0xff] }
 0x5be   :  { %5718 = vmatpush1.bf16.msra.mxu1 %v9734_v40  ;;  %v9745_v40 = vld [vmem:[#allocation61_spill] sm:$0xff] }
 0x5bf   :  { %5720 = vmatprep.subr.bf16.mxu1 %v9735_v9  ;;  %v9746_v9 = vld [vmem:[#allocation64_spill] sm:$0xff] }
 0x5c2   :  { %5722 = vmatpush1.bf16.msra.mxu1 %v9736_v43  ;;  %v9747_v43 = vld [vmem:[#allocation65_spill] sm:$0xff] }
 0x5c3   :  { %5724 = vmatprep.subr.bf16.mxu1 %v9737_v19  ;;  %v9748_v19 = vld [vmem:[#allocation68_spill] sm:$0xff] }
 0x5c6   :  { %5726 = vmatpush1.bf16.msra.mxu1 %v9738_v6  ;;  %v9749_v6 = vld [vmem:[#allocation69_spill] sm:$0xff] }
 0x5c7   :  { %5728 = vmatprep.subr.bf16.mxu1 %v9739_v4  ;;  %v9750_v4 = vld [vmem:[#allocation72_spill] sm:$0xff] }
 0x5ca   :  { %5730 = vmatpush1.bf16.msra.mxu1 %v9740_v55  ;;  %v9751_v55 = vld [vmem:[#allocation74_spill] sm:$0xff] }
 0x5cb   :  { %5732 = vmatprep.subr.bf16.mxu1 %v9741_v24 }
 0x5ce   :  { %5734 = vmatpush1.bf16.msra.mxu1 %v9742_v52 }
 0x5cf   :  { %5736 = vmatprep.subr.bf16.mxu1 %v9743_v56 }
 0x5d2   :  { %5738 = vmatpush1.bf16.msra.mxu1 %v9744_v5 }
 0x5d3   :  { %5740 = vmatprep.subr.bf16.mxu1 %v9745_v40 }
 0x5d6   :  { %5742 = vmatpush1.bf16.msra.mxu1 %v9746_v9 }
 0x5d7   :  { %5744 = vmatprep.subr.bf16.mxu1 %v9747_v43 }
 0x5da   :  { %5746 = vmatpush1.bf16.msra.mxu1 %v9748_v19 }
 0x5db   :  { %5748 = vmatprep.subr.bf16.mxu1 %v9749_v6 }
 0x5de   :  { %5750 = vmatpush1.bf16.msra.mxu1 %v9750_v4 }
 0x5df   :  { %5816 = vmatprep.subr.bf16.mxu1 %v9751_v55 }
 0x634   :  { %v1703_v24 = vpop.f32.mrb[4].mxu1  ;;  %v1774_v52 = vpop.f32.mrb[28].mxu0 }
 0x635   :  { %v6961_v56 = vadd.f32 %v1703_v24, %v9752_v10  ;;  %v1705_v30 = vpop.f32.mrb[5].mxu1  ;;  %v8255_v5 = vpop.f32.mrb[29].mxu0  ;;  %v1864_v55 = vadd.f32 %v7888_v53, %v1774_v52  ;;  %v9753_v24 = vld [vmem:[#allocation124_spill] sm:$0xff]  ;;  %v9754_v53 = vld [vmem:[#allocation22_spill] sm:$0xff] }
 0x636   :  { %v6962_v9 = vadd.f32 %v1705_v30, %v9665_v41 }
 0x637   :  { %v4332_v40 = vmul.f32 -1.442695, %v6961_v56 }
 0x638   :  { %v4333_v43 = vmul.f32 -1.442695, %v6962_v9  ;;  %v9757_v9 = vld [vmem:[#allocation27_spill] sm:$0xff] }
 0x639   :  { %7040 = vpow2.f32 %v4332_v40 }
 0x63a   :  { %7042 = vpow2.f32 %v4333_v43 }
 0x643   :  { %v7041_v19 = vpop.eup %7040 }
 0x644   :  { %v1858_v42 = vadd.f32 1.0, %v7041_v19  ;;  %v7043_v6 = vpop.eup %7042  ;;  %v9759_v19 = vld [vmem:[#allocation31_spill] sm:$0xff] }
 0x645   :  { %v1859_v4 = vadd.f32 1.0, %v7043_v6 }
 0x646   :  { %7044 = vrcp.f32 %v1858_v42  ;;  %v9762_v42 = vld [vmem:[#allocation38_spill] sm:$0xff] }
 0x647   :  { %7046 = vrcp.f32 %v1859_v4  ;;  %v9760_v4 = vld [vmem:[#allocation34_spill] sm:$0xff] }
 0x650   :  { %v7045_v0 = vpop.eup %7044 }
 0x651   :  { %v1865_v57 = vmul.f32 %v7045_v0, %v1864_v55  ;;  %v7047_v14 = vpop.eup %7046  ;;  %v9758_v0 = vld [vmem:[#allocation30_spill] sm:$0xff]  ;;  %v9761_v55 = vld [vmem:[#allocation35_spill] sm:$0xff] }
 0x652   :  { %v1868_v56 = vsub.f32 1.0, %v7047_v14  ;;  %v1870_v40 = vmul.f32 %v7047_v14, %v8103_v17  ;;  %v9764_v14 = vld [vmem:[#allocation42_spill] sm:$0xff] }
 0x653   :  { %v1866_v10 = vadd.f32 %v1865_v57, %v9753_v24  ;;  %v9756_v57 = vld [vmem:[#allocation26_spill] sm:$0xff]  ;;  %v9765_v24 = vld [vmem:[#allocation43_spill] sm:$0xff] }
 0x655   :  { %7048 = vtanh.f32 %v1866_v10  ;;  %v9755_v10 = vld [vmem:[#allocation23_spill] sm:$0xff] }
 0x65f   :  { %v7049_v36 = vpop.eup %7048 }
 0x660   :  { %v1869_v30 = vmul.f32 %v7049_v36, %v1868_v56  ;;  %v9763_v36 = vld [vmem:[#allocation39_spill] sm:$0xff]  ;;  %v9766_v56 = vld [vmem:[#allocation46_spill] sm:$0xff] }
 0x662   :  { %v8261_v43 = vadd.f32 %v1870_v40, %v1869_v30  ;;  %v9767_v30 = vld [vmem:[#allocation47_spill] sm:$0xff]  ;;  %v9768_v40 = vld [vmem:[#allocation50_spill] sm:$0xff] }
 0x664   :  { %1937 = vmatmul.mubr.f32.vlgmr.msra.gmra.mrb[30].mxu0 %v8261_v43 }
 0x665   :  { %5665 = vmatpush3.bf16.msra.mxu0 %v7892_v39  ;;  %4695 = vmatprep.mubr.msk.f32.mxu0 %vm7225_vm1, %v9521_v61 }
 0x666   :  { %5666 = vmatprep.subr.bf16.mxu0 %v9580_v46 }
 0x669   :  { %5668 = vmatpush3.bf16.msra.mxu0 %v7898_v12 }
 0x66a   :  { %5669 = vmatprep.subr.bf16.mxu0 %v9580_v46 }
 0x66d   :  { %5671 = vmatpush3.bf16.msra.mxu0 %v7904_v35 }
 0x66e   :  { %5672 = vmatprep.subr.bf16.mxu0 %v9580_v46 }
 0x671   :  { %5674 = vmatpush3.bf16.msra.mxu0 %v7908_v31 }
 0x672   :  { %5675 = vmatprep.subr.bf16.mxu0 %v9580_v46 }
 0x674   :  { %v1845_v52 = vpop.f32.mrb[20].mxu1 }
 0x675   :  { %v1847_v6 = vpop.f32.mrb[21].mxu1  ;;  %5677 = vmatpush3.bf16.msra.mxu0 %v7912_v22 }
 0x676   :  { %5678 = vmatprep.subr.bf16.mxu0 %v9580_v46 }
 0x679   :  { %5680 = vmatpush3.bf16.msra.mxu0 %v7916_v48 }
 0x67a   :  { %5681 = vmatprep.subr.bf16.mxu0 %v9580_v46 }
 0x67d   :  { %5683 = vmatpush3.bf16.msra.mxu0 %v7920_v13 }
 0x67e   :  { %5684 = vmatprep.subr.bf16.mxu0 %v9580_v46 }
 0x681   :  { %5686 = vmatpush3.bf16.msra.mxu0 %v7924_v11 }
 0x682   :  { %5752 = vmatprep.subr.bf16.mxu0 %v7414_v38 }
 0x684   :  { %4696 = vmatmul.mubr.f32.vlgmr.msra.gmra.mrb[32].mxu0 %v8261_v43 }
 0x685   :  { %5754 = vmatpush1.bf16.msra.mxu0 %v7431_v63 }
 0x686   :  { %5756 = vmatprep.subr.bf16.mxu0 %v7435_v1 }
 0x689   :  { %5758 = vmatpush1.bf16.msra.mxu0 %v7448_v15 }
 0x68a   :  { %5760 = vmatprep.subr.bf16.mxu0 %v7452_v18 }
 0x68d   :  { %5762 = vmatpush1.bf16.msra.mxu0 %v9754_v53 }
 0x68e   :  { %5764 = vmatprep.subr.bf16.mxu0 %v9755_v10 }
 0x691   :  { %5766 = vmatpush1.bf16.msra.mxu0 %v9756_v57 }
 0x692   :  { %5768 = vmatprep.subr.bf16.mxu0 %v9757_v9 }
 0x695   :  { %5770 = vmatpush1.bf16.msra.mxu0 %v9758_v0  ;;  %v9769_v0 = vld [vmem:[#allocation51_spill] sm:$0xff] }
 0x696   :  { %5772 = vmatprep.subr.bf16.mxu0 %v9759_v19  ;;  %v9770_v19 = vld [vmem:[#allocation54_spill] sm:$0xff] }
 0x699   :  { %5774 = vmatpush1.bf16.msra.mxu0 %v9760_v4  ;;  %v9771_v4 = vld [vmem:[#allocation55_spill] sm:$0xff] }
 0x69a   :  { %5776 = vmatprep.subr.bf16.mxu0 %v9761_v55  ;;  %v9772_v55 = vld [vmem:[#allocation58_spill] sm:$0xff] }
 0x69d   :  { %5778 = vmatpush1.bf16.msra.mxu0 %v9762_v42  ;;  %v9773_v42 = vld [vmem:[#allocation59_spill] sm:$0xff] }
 0x69e   :  { %5780 = vmatprep.subr.bf16.mxu0 %v9763_v36  ;;  %v9774_v36 = vld [vmem:[#allocation62_spill] sm:$0xff] }
 0x6a1   :  { %5782 = vmatpush1.bf16.msra.mxu0 %v9764_v14  ;;  %v9775_v14 = vld [vmem:[#allocation63_spill] sm:$0xff] }
 0x6a2   :  { %5784 = vmatprep.subr.bf16.mxu0 %v9765_v24  ;;  %v9776_v24 = vld [vmem:[#allocation66_spill] sm:$0xff] }
 0x6a5   :  { %5786 = vmatpush1.bf16.msra.mxu0 %v9766_v56  ;;  %v9777_v56 = vld [vmem:[#allocation67_spill] sm:$0xff] }
 0x6a6   :  { %5788 = vmatprep.subr.bf16.mxu0 %v9767_v30  ;;  %v9778_v30 = vld [vmem:[#allocation70_spill] sm:$0xff] }
 0x6a9   :  { %5790 = vmatpush1.bf16.msra.mxu0 %v9768_v40  ;;  %v9779_v40 = vld [vmem:[#allocation71_spill] sm:$0xff] }
 0x6aa   :  { %5792 = vmatprep.subr.bf16.mxu0 %v9769_v0  ;;  %v9780_v0 = vld [vmem:[#allocation73_spill] sm:$0xff] }
 0x6ad   :  { %5794 = vmatpush1.bf16.msra.mxu0 %v9770_v19  ;;  %v9781_v19 = vld [vmem:[#allocation89_spill] sm:$0xff] }
 0x6ae   :  { %5796 = vmatprep.subr.bf16.mxu0 %v9771_v4 }
 0x6b1   :  { %5798 = vmatpush1.bf16.msra.mxu0 %v9772_v55  ;;  %v9782_v55 = vld [vmem:[#allocation138_spill] sm:$0xff] }
 0x6b2   :  { %5800 = vmatprep.subr.bf16.mxu0 %v9773_v42 }
 0x6b5   :  { %5802 = vmatpush1.bf16.msra.mxu0 %v9774_v36 }
 0x6b6   :  { %5804 = vmatprep.subr.bf16.mxu0 %v9775_v14 }
 0x6b9   :  { %5806 = vmatpush1.bf16.msra.mxu0 %v9776_v24 }
 0x6ba   :  { %5808 = vmatprep.subr.bf16.mxu0 %v9777_v56 }
 0x6bd   :  { %5810 = vmatpush1.bf16.msra.mxu0 %v9778_v30 }
 0x6be   :  { %5812 = vmatprep.subr.bf16.mxu0 %v9779_v40 }
 0x6c1   :  { %5814 = vmatpush1.bf16.msra.mxu0 %v9780_v0  ;;  %v2027_v0 = vadd.f32 %v9695_v47, %v1847_v6  ;;  %v9787_v6 = vld [vmem:[#allocation109_spill] sm:$0xff] }
 0x6c2   :  { %5880 = vmatprep.subr.bf16.mxu0 %v9781_v19 }
 0x737   :  { %v1938_v4 = vpop.f32.mrb[30].mxu0 }
 0x738   :  { %v1939_v9 = vadd.f32 %v1938_v4, %v9782_v55  ;;  %v1940_v42 = vpop.f32.mrb[31].mxu0 }
 0x739   :  { %v1941_v36 = vadd.f32 %v1940_v42, %v9694_v28 }
 0x73a   :  { %v2013_v14 = vadd.f32 %v1939_v9, %v8255_v5 }
 0x73b   :  { %v2014_v57 = vadd.f32 %v1941_v36, %v1845_v52 }
 0x73c   :  { %v4334_v24 = vmul.f32 -1.442695, %v2013_v14 }
 0x73d   :  { %v4335_v56 = vmul.f32 -1.442695, %v2014_v57 }
 0x73e   :  { %7050 = vpow2.f32 %v4334_v24  ;;  %v9791_v24 = vld [vmem:[#allocation94_spill] sm:$0xff] }
 0x73f   :  { %7052 = vpow2.f32 %v4335_v56  ;;  %v9792_v56 = vld [vmem:[#allocation96_spill] sm:$0xff] }
 0x748   :  { %v7051_v30 = vpop.eup %7050 }
 0x749   :  { %v2021_v10 = vadd.f32 1.0, %v7051_v30  ;;  %v7053_v40 = vpop.eup %7052  ;;  %v9793_v30 = vld [vmem:[#allocation98_spill] sm:$0xff] }
 0x74a   :  { %v2022_v19 = vadd.f32 1.0, %v7053_v40  ;;  %v9794_v40 = vld [vmem:[#allocation100_spill] sm:$0xff] }
 0x74b   :  { %7054 = vrcp.f32 %v2021_v10 }
 0x74c   :  { %7056 = vrcp.f32 %v2022_v19  ;;  %v9790_v19 = vld [vmem:[#allocation119_spill] sm:$0xff] }
 0x755   :  { %v7055_v53 = vpop.eup %7054 }
 0x756   :  { %v2028_v18 = vmul.f32 %v7055_v53, %v2027_v0  ;;  %v7057_v52 = vpop.eup %7056  ;;  %v9788_v53 = vld [vmem:[#allocation90_spill] sm:$0xff]  ;;  %v9789_v0 = vld [vmem:[#allocation92_spill] sm:$0xff] }
 0x757   :  { %v2009_v4 = vpop.f32.mrb[32].mxu0  ;;  %v2031_v9 = vsub.f32 1.0, %v7057_v52  ;;  %v2033_v14 = vmul.f32 %v7057_v52, %v8165_v21  ;;  %v9798_v52 = vld [vmem:[#allocation108_spill] sm:$0xff] }
 0x758   :  { %v2010_v42 = vadd.f32 %v2009_v4, %v7984_v20  ;;  %v4697_v28 = vpop.f32.mrb[33].mxu0  ;;  %v9795_v4 = vld [vmem:[#allocation102_spill] sm:$0xff] }
 0x759   :  { %v9784_v28 = vld [vmem:[#allocation83_spill] sm:$0xff] }
 0x75a   :  { %v2029_v5 = vadd.f32 %v2028_v18, %v2010_v42  ;;  %v8329_v18 = vsel %vm4336_vm4, %v8261_v43, %v8103_v17  ;;  %v9783_v17 = vld [vmem:[#allocation105_spill] sm:$0xff]  ;;  %v9786_v43 = vld [vmem:[#allocation107_spill] sm:$0xff]  ;;  %v9796_v42 = vld [vmem:[#allocation104_spill] sm:$0xff] }
 0x75c   :  { %7058 = vtanh.f32 %v2029_v5  ;;  %v9797_v5 = vld [vmem:[#allocation106_spill] sm:$0xff] }
 0x766   :  { %v7059_v57 = vpop.eup %7058 }
 0x767   :  { %v2032_v36 = vmul.f32 %v7059_v57, %v2031_v9  ;;  %v9799_v9 = vld [vmem:[#allocation110_spill] sm:$0xff]  ;;  %v9800_v57 = vld [vmem:[#allocation112_spill] sm:$0xff] }
 0x769   :  { %v2034_v10 = vadd.f32 %v2033_v14, %v2032_v36  ;;  %v9801_v36 = vld [vmem:[#allocation114_spill] sm:$0xff]  ;;  %v9802_v14 = vld [vmem:[#allocation116_spill] sm:$0xff] }
 0x76b   :  { %v8323_v47 = vsel %vm4336_vm4, %v2034_v10, %v8165_v21  ;;  %v9785_v21 = vld [vmem:[#allocation84_spill] sm:$0xff]  ;;  %v9803_v10 = vld [vmem:[#allocation118_spill] sm:$0xff] }
 0x76c   :  { %2110 = vmatprep.mubr.f32.mxu1 %v8323_v47  ;;  %2181 = vmatprep.mubr.f32.mxu0 %v8323_v47 }
 0x76d   :  { %2111 = vmatmul.mubr.f32.vlgmr.msra.gmra.mrb[6].mxu1 %v8329_v18  ;;  %2182 = vmatmul.mubr.f32.vlgmr.msra.gmra.mrb[34].mxu0 %v8329_v18 }
 0x76e   :  { %5818 = vmatpush1.bf16.msra.mxu1 %v9611_v44  ;;  %2252 = vmatprep.mubr.f32.mxu1 %v8323_v47 }
 0x76f   :  { %5820 = vmatprep.subr.bf16.mxu1 %v9612_v45  ;;  %5882 = vmatpush1.bf16.msra.mxu0 %v9613_v23 }
 0x770   :  { %5884 = vmatprep.subr.bf16.mxu0 %v9614_v50  ;;  %2345 = vmatprep.mubr.f32.mxu0 %v9521_v61 }
 0x772   :  { %5822 = vmatpush1.bf16.msra.mxu1 %v9615_v26 }
 0x773   :  { %5824 = vmatprep.subr.bf16.mxu1 %v9696_v33  ;;  %5886 = vmatpush1.bf16.msra.mxu0 %v9697_v16 }
 0x774   :  { %5888 = vmatprep.subr.bf16.mxu0 %v9698_v27 }
 0x776   :  { %5826 = vmatpush1.bf16.msra.mxu1 %v9699_v29 }
 0x777   :  { %5828 = vmatprep.subr.bf16.mxu1 %v9700_v34  ;;  %5890 = vmatpush1.bf16.msra.mxu0 %v9701_v49 }
 0x778   :  { %5892 = vmatprep.subr.bf16.mxu0 %v9702_v54 }
 0x77a   :  { %5830 = vmatpush1.bf16.msra.mxu1 %v9623_v62 }
 0x77b   :  { %5832 = vmatprep.subr.bf16.mxu1 %v9703_v59  ;;  %5894 = vmatpush1.bf16.msra.mxu0 %v9704_v32 }
 0x77c   :  { %5896 = vmatprep.subr.bf16.mxu0 %v9783_v17 }
 0x77e   :  { %5834 = vmatpush1.bf16.msra.mxu1 %v9784_v28 }
 0x77f   :  { %5836 = vmatprep.subr.bf16.mxu1 %v9785_v21  ;;  %5898 = vmatpush1.bf16.msra.mxu0 %v9786_v43 }
 0x780   :  { %5900 = vmatprep.subr.bf16.mxu0 %v9787_v6 }
 0x782   :  { %5838 = vmatpush1.bf16.msra.mxu1 %v9708_v7 }
 0x783   :  { %5840 = vmatprep.subr.bf16.mxu1 %v9709_v58  ;;  %5902 = vmatpush1.bf16.msra.mxu0 %v9710_v51 }
 0x784   :  { %5904 = vmatprep.subr.bf16.mxu0 %v9711_v2 }
 0x786   :  { %5842 = vmatpush1.bf16.msra.mxu1 %v9712_v3 }
 0x787   :  { %5844 = vmatprep.subr.bf16.mxu1 %v9713_v37  ;;  %5906 = vmatpush1.bf16.msra.mxu0 %v9714_v8 }
 0x788   :  { %5908 = vmatprep.subr.bf16.mxu0 %v9715_v60 }
 0x78a   :  { %5846 = vmatpush1.bf16.msra.mxu1 %v9788_v53 }
 0x78b   :  { %5848 = vmatprep.subr.bf16.mxu1 %v9789_v0  ;;  %5910 = vmatpush1.bf16.msra.mxu0 %v9790_v19 }
 0x78c   :  { %5911 = vmatprep.subr.bf16.mxu0 %v9580_v46 }
 0x78e   :  { %5850 = vmatpush1.bf16.msra.mxu1 %v9791_v24 }
 0x78f   :  { %5852 = vmatprep.subr.bf16.mxu1 %v9792_v56  ;;  %v9839_v56 = vld [vmem:[#allocation129_spill] sm:$0xff] }
 0x792   :  { %5854 = vmatpush1.bf16.msra.mxu1 %v9793_v30  ;;  %v9804_v30 = vld [vmem:[#allocation120_spill] sm:$0xff] }
 0x793   :  { %5856 = vmatprep.subr.bf16.mxu1 %v9794_v40  ;;  %v9805_v40 = vld [vmem:[#allocation121_spill] sm:$0xff] }
 0x796   :  { %5858 = vmatpush1.bf16.msra.mxu1 %v9795_v4  ;;  %v9806_v4 = vld [vmem:[#allocation10_spill] sm:$0xff] }
 0x797   :  { %5860 = vmatprep.subr.bf16.mxu1 %v9796_v42  ;;  %v9817_v42 = vld [vmem:[#allocation32_spill] sm:$0xff] }
 0x79a   :  { %5862 = vmatpush1.bf16.msra.mxu1 %v9797_v5  ;;  %v9807_v5 = vld [vmem:[#allocation12_spill] sm:$0xff] }
 0x79b   :  { %5864 = vmatprep.subr.bf16.mxu1 %v9798_v52  ;;  %v9808_v52 = vld [vmem:[#allocation13_spill] sm:$0xff] }
 0x79e   :  { %5866 = vmatpush1.bf16.msra.mxu1 %v9799_v9  ;;  %v9809_v9 = vld [vmem:[#allocation16_spill] sm:$0xff] }
 0x79f   :  { %5868 = vmatprep.subr.bf16.mxu1 %v9800_v57  ;;  %v9810_v57 = vld [vmem:[#allocation17_spill] sm:$0xff] }
 0x7a2   :  { %5870 = vmatpush1.bf16.msra.mxu1 %v9801_v36  ;;  %v9811_v36 = vld [vmem:[#allocation20_spill] sm:$0xff] }
 0x7a3   :  { %5872 = vmatprep.subr.bf16.mxu1 %v9802_v14  ;;  %v9812_v14 = vld [vmem:[#allocation21_spill] sm:$0xff] }
 0x7a6   :  { %5874 = vmatpush1.bf16.msra.mxu1 %v9803_v10  ;;  %v9813_v10 = vld [vmem:[#allocation24_spill] sm:$0xff] }
 0x7a7   :  { %5876 = vmatprep.subr.bf16.mxu1 %v9804_v30  ;;  %v9814_v30 = vld [vmem:[#allocation25_spill] sm:$0xff] }
 0x7aa   :  { %5878 = vmatpush1.bf16.msra.mxu1 %v9805_v40  ;;  %v9815_v40 = vld [vmem:[#allocation28_spill] sm:$0xff] }
 0x7ab   :  { %5936 = vmatprep.subr.bf16.mxu1 %v9806_v4  ;;  %v9816_v4 = vld [vmem:[#allocation29_spill] sm:$0xff] }
 0x7ad   :  { %2253 = vmatmul.mubr.f32.vlgmr.msra.gmra.mrb[22].mxu1 %v8329_v18 }
 0x7ae   :  { %5938 = vmatpush1.bf16.msra.mxu1 %v9807_v5  ;;  %v9818_v5 = vld [vmem:[#allocation33_spill] sm:$0xff] }
 0x7af   :  { %5940 = vmatprep.subr.bf16.mxu1 %v9808_v52  ;;  %v9819_v52 = vld [vmem:[#allocation36_spill] sm:$0xff] }
 0x7b2   :  { %5942 = vmatpush1.bf16.msra.mxu1 %v9809_v9  ;;  %v9820_v9 = vld [vmem:[#allocation37_spill] sm:$0xff] }
 0x7b3   :  { %5944 = vmatprep.subr.bf16.mxu1 %v9810_v57  ;;  %v9821_v57 = vld [vmem:[#allocation40_spill] sm:$0xff] }
 0x7b6   :  { %5946 = vmatpush1.bf16.msra.mxu1 %v9811_v36  ;;  %v9822_v36 = vld [vmem:[#allocation41_spill] sm:$0xff] }
 0x7b7   :  { %5948 = vmatprep.subr.bf16.mxu1 %v9812_v14  ;;  %v9823_v14 = vld [vmem:[#allocation44_spill] sm:$0xff] }
 0x7ba   :  { %5950 = vmatpush1.bf16.msra.mxu1 %v9813_v10  ;;  %v9824_v10 = vld [vmem:[#allocation45_spill] sm:$0xff] }
 0x7bb   :  { %5952 = vmatprep.subr.bf16.mxu1 %v9814_v30  ;;  %v9825_v30 = vld [vmem:[#allocation48_spill] sm:$0xff] }
 0x7be   :  { %5954 = vmatpush1.bf16.msra.mxu1 %v9815_v40  ;;  %v9826_v40 = vld [vmem:[#allocation49_spill] sm:$0xff] }
 0x7bf   :  { %5956 = vmatprep.subr.bf16.mxu1 %v9816_v4  ;;  %v9827_v4 = vld [vmem:[#allocation52_spill] sm:$0xff] }
 0x7c2   :  { %5958 = vmatpush1.bf16.msra.mxu1 %v9817_v42  ;;  %v9828_v42 = vld [vmem:[#allocation53_spill] sm:$0xff] }
 0x7c3   :  { %5960 = vmatprep.subr.bf16.mxu1 %v9818_v5  ;;  %v9829_v5 = vld [vmem:[#allocation56_spill] sm:$0xff] }
 0x7c6   :  { %5962 = vmatpush1.bf16.msra.mxu1 %v9819_v52  ;;  %v9830_v52 = vld [vmem:[#allocation57_spill] sm:$0xff] }
 0x7c7   :  { %5964 = vmatprep.subr.bf16.mxu1 %v9820_v9  ;;  %v9831_v9 = vld [vmem:[#allocation60_spill] sm:$0xff] }
 0x7ca   :  { %5966 = vmatpush1.bf16.msra.mxu1 %v9821_v57  ;;  %v9832_v57 = vld [vmem:[#allocation61_spill] sm:$0xff] }
 0x7cb   :  { %5968 = vmatprep.subr.bf16.mxu1 %v9822_v36  ;;  %v9833_v36 = vld [vmem:[#allocation64_spill] sm:$0xff] }
 0x7ce   :  { %5970 = vmatpush1.bf16.msra.mxu1 %v9823_v14  ;;  %v9834_v14 = vld [vmem:[#allocation65_spill] sm:$0xff] }
 0x7cf   :  { %5972 = vmatprep.subr.bf16.mxu1 %v9824_v10  ;;  %v9835_v10 = vld [vmem:[#allocation68_spill] sm:$0xff] }
 0x7d2   :  { %5974 = vmatpush1.bf16.msra.mxu1 %v9825_v30  ;;  %v9836_v30 = vld [vmem:[#allocation69_spill] sm:$0xff] }
 0x7d3   :  { %5976 = vmatprep.subr.bf16.mxu1 %v9826_v40  ;;  %v9837_v40 = vld [vmem:[#allocation72_spill] sm:$0xff] }
 0x7d6   :  { %5978 = vmatpush1.bf16.msra.mxu1 %v9827_v4  ;;  %v9838_v4 = vld [vmem:[#allocation74_spill] sm:$0xff] }
 0x7d7   :  { %5980 = vmatprep.subr.bf16.mxu1 %v9828_v42 }
 0x7da   :  { %5982 = vmatpush1.bf16.msra.mxu1 %v9829_v5 }
 0x7db   :  { %5984 = vmatprep.subr.bf16.mxu1 %v9830_v52 }
 0x7de   :  { %5986 = vmatpush1.bf16.msra.mxu1 %v9831_v9 }
 0x7df   :  { %5988 = vmatprep.subr.bf16.mxu1 %v9832_v57 }
 0x7e2   :  { %5990 = vmatpush1.bf16.msra.mxu1 %v9833_v36 }
 0x7e3   :  { %5992 = vmatprep.subr.bf16.mxu1 %v9834_v14 }
 0x7e6   :  { %5994 = vmatpush1.bf16.msra.mxu1 %v9835_v10 }
 0x7e7   :  { %5996 = vmatprep.subr.bf16.mxu1 %v9836_v30 }
 0x7ea   :  { %5998 = vmatpush1.bf16.msra.mxu1 %v9837_v40 }
 0x7eb   :  { %6064 = vmatprep.subr.bf16.mxu1 %v9838_v4  ;;  %v8423_v4 = vld [vmem:[%s9180_s7] ss:$0 sm:$0xff] }
 0x840   :  { %v2112_v42 = vpop.f32.mrb[6].mxu1  ;;  %v2183_v5 = vpop.f32.mrb[34].mxu0 }
 0x841   :  { %v6963_v52 = vadd.f32 %v2112_v42, %v9839_v56  ;;  %v2114_v24 = vpop.f32.mrb[7].mxu1  ;;  %v8417_v9 = vpop.f32.mrb[35].mxu0  ;;  %v2273_v42 = vadd.f32 %v8423_v4, %v2183_v5  ;;  %v9842_v5 = vld [vmem:[#allocation22_spill] sm:$0xff] }
 0x842   :  { %v6964_v36 = vadd.f32 %v2114_v24, %v9665_v41 }
 0x843   :  { %v4337_v57 = vmul.f32 -1.442695, %v6963_v52  ;;  %v9840_v52 = vld [vmem:[#allocation123_spill] sm:$0xff] }
 0x844   :  { %v4338_v14 = vmul.f32 -1.442695, %v6964_v36 }
 0x845   :  { %7060 = vpow2.f32 %v4337_v57 }
 0x846   :  { %7062 = vpow2.f32 %v4338_v14 }
 0x84f   :  { %v7061_v10 = vpop.eup %7060 }
 0x850   :  { %v2267_v19 = vadd.f32 1.0, %v7061_v10  ;;  %v7063_v30 = vpop.eup %7062 }
 0x851   :  { %v2268_v40 = vadd.f32 1.0, %v7063_v30 }
 0x852   :  { %7064 = vrcp.f32 %v2267_v19 }
 0x853   :  { %7066 = vrcp.f32 %v2268_v40  ;;  %v9841_v40 = vld [vmem:[#allocation19_spill] sm:$0xff] }
 0x85c   :  { %v7065_v56 = vpop.eup %7064 }
 0x85d   :  { %v2274_v0 = vmul.f32 %v7065_v56, %v2273_v42  ;;  %v7067_v57 = vpop.eup %7066  ;;  %v9843_v42 = vld [vmem:[#allocation23_spill] sm:$0xff] }
 0x85e   :  { %v2277_v36 = vsub.f32 1.0, %v7067_v57  ;;  %v2279_v19 = vmul.f32 %v7067_v57, %v8329_v18  ;;  %v9846_v57 = vld [vmem:[#allocation30_spill] sm:$0xff] }
 0x85f   :  { %v2275_v24 = vadd.f32 %v2274_v0, %v9840_v52  ;;  %v9844_v52 = vld [vmem:[#allocation26_spill] sm:$0xff] }
 0x861   :  { %7068 = vtanh.f32 %v2275_v24  ;;  %v9845_v24 = vld [vmem:[#allocation27_spill] sm:$0xff] }
 0x86b   :  { %v7069_v14 = vpop.eup %7068 }
 0x86c   :  { %v2278_v10 = vmul.f32 %v7069_v14, %v2277_v36  ;;  %v9847_v36 = vld [vmem:[#allocation31_spill] sm:$0xff]  ;;  %v9848_v14 = vld [vmem:[#allocation34_spill] sm:$0xff] }
 0x86e   :  { %v8428_v30 = vadd.f32 %v2279_v19, %v2278_v10  ;;  %v9849_v10 = vld [vmem:[#allocation35_spill] sm:$0xff]  ;;  %v9850_v19 = vld [vmem:[#allocation38_spill] sm:$0xff] }
 0x870   :  { %2346 = vmatmul.mubr.f32.vlgmr.msra.gmra.mrb[36].mxu0 %v8428_v30 }
 0x871   :  { %5913 = vmatpush3.bf16.msra.mxu0 %v7892_v39  ;;  %4730 = vmatprep.mubr.msk.f32.mxu0 %vm7225_vm1, %v9521_v61 }
 0x872   :  { %5914 = vmatprep.subr.bf16.mxu0 %v9580_v46 }
 0x875   :  { %5916 = vmatpush3.bf16.msra.mxu0 %v7898_v12 }
 0x876   :  { %5917 = vmatprep.subr.bf16.mxu0 %v9580_v46 }
 0x879   :  { %5919 = vmatpush3.bf16.msra.mxu0 %v7904_v35 }
 0x87a   :  { %5920 = vmatprep.subr.bf16.mxu0 %v9580_v46 }
 0x87d   :  { %5922 = vmatpush3.bf16.msra.mxu0 %v7908_v31 }
 0x87e   :  { %5923 = vmatprep.subr.bf16.mxu0 %v9580_v46 }
 0x880   :  { %v2254_v0 = vpop.f32.mrb[22].mxu1 }
 0x881   :  { %v2256_v56 = vpop.f32.mrb[23].mxu1  ;;  %5925 = vmatpush3.bf16.msra.mxu0 %v7912_v22 }
 0x882   :  { %5926 = vmatprep.subr.bf16.mxu0 %v9580_v46 }
 0x885   :  { %5928 = vmatpush3.bf16.msra.mxu0 %v7916_v48 }
 0x886   :  { %5929 = vmatprep.subr.bf16.mxu0 %v9580_v46 }
 0x889   :  { %5931 = vmatpush3.bf16.msra.mxu0 %v7920_v13 }
 0x88a   :  { %5932 = vmatprep.subr.bf16.mxu0 %v9580_v46 }
 0x88d   :  { %5934 = vmatpush3.bf16.msra.mxu0 %v7924_v11 }
 0x88e   :  { %6000 = vmatprep.subr.bf16.mxu0 %v7414_v38 }
 0x890   :  { %4731 = vmatmul.mubr.f32.vlgmr.msra.gmra.mrb[38].mxu0 %v8428_v30 }
 0x891   :  { %6002 = vmatpush1.bf16.msra.mxu0 %v7431_v63 }
 0x892   :  { %6004 = vmatprep.subr.bf16.mxu0 %v7435_v1  ;;  %v9870_v1 = vld [vmem:[#allocation139_spill] sm:$0xff] }
 0x895   :  { %6006 = vmatpush1.bf16.msra.mxu0 %v7448_v15  ;;  %v9851_v15 = vld [vmem:[#allocation39_spill] sm:$0xff] }
 0x896   :  { %6008 = vmatprep.subr.bf16.mxu0 %v9841_v40  ;;  %v9852_v40 = vld [vmem:[#allocation42_spill] sm:$0xff] }
 0x899   :  { %6010 = vmatpush1.bf16.msra.mxu0 %v9842_v5  ;;  %v9853_v5 = vld [vmem:[#allocation43_spill] sm:$0xff] }
 0x89a   :  { %6012 = vmatprep.subr.bf16.mxu0 %v9843_v42  ;;  %v9854_v42 = vld [vmem:[#allocation46_spill] sm:$0xff] }
 0x89d   :  { %6014 = vmatpush1.bf16.msra.mxu0 %v9844_v52  ;;  %v9855_v52 = vld [vmem:[#allocation47_spill] sm:$0xff] }
 0x89e   :  { %6016 = vmatprep.subr.bf16.mxu0 %v9845_v24  ;;  %v9856_v24 = vld [vmem:[#allocation50_spill] sm:$0xff] }
 0x8a1   :  { %6018 = vmatpush1.bf16.msra.mxu0 %v9846_v57  ;;  %v9857_v57 = vld [vmem:[#allocation51_spill] sm:$0xff] }
 0x8a2   :  { %6020 = vmatprep.subr.bf16.mxu0 %v9847_v36  ;;  %v9858_v36 = vld [vmem:[#allocation54_spill] sm:$0xff] }
 0x8a5   :  { %6022 = vmatpush1.bf16.msra.mxu0 %v9848_v14  ;;  %v9859_v14 = vld [vmem:[#allocation55_spill] sm:$0xff] }
 0x8a6   :  { %6024 = vmatprep.subr.bf16.mxu0 %v9849_v10  ;;  %v9860_v10 = vld [vmem:[#allocation58_spill] sm:$0xff] }
 0x8a9   :  { %6026 = vmatpush1.bf16.msra.mxu0 %v9850_v19  ;;  %v9861_v19 = vld [vmem:[#allocation59_spill] sm:$0xff] }
 0x8aa   :  { %6028 = vmatprep.subr.bf16.mxu0 %v9851_v15  ;;  %v9862_v15 = vld [vmem:[#allocation62_spill] sm:$0xff] }
 0x8ad   :  { %6030 = vmatpush1.bf16.msra.mxu0 %v9852_v40  ;;  %v9863_v40 = vld [vmem:[#allocation63_spill] sm:$0xff] }
 0x8ae   :  { %6032 = vmatprep.subr.bf16.mxu0 %v9853_v5  ;;  %v9864_v5 = vld [vmem:[#allocation66_spill] sm:$0xff] }
 0x8b1   :  { %6034 = vmatpush1.bf16.msra.mxu0 %v9854_v42  ;;  %v9865_v42 = vld [vmem:[#allocation67_spill] sm:$0xff] }
 0x8b2   :  { %6036 = vmatprep.subr.bf16.mxu0 %v9855_v52  ;;  %v9866_v52 = vld [vmem:[#allocation70_spill] sm:$0xff] }
 0x8b5   :  { %6038 = vmatpush1.bf16.msra.mxu0 %v9856_v24  ;;  %v9867_v24 = vld [vmem:[#allocation71_spill] sm:$0xff] }
 0x8b6   :  { %6040 = vmatprep.subr.bf16.mxu0 %v9857_v57  ;;  %v9868_v57 = vld [vmem:[#allocation73_spill] sm:$0xff] }
 0x8b9   :  { %6042 = vmatpush1.bf16.msra.mxu0 %v9858_v36  ;;  %v9869_v36 = vld [vmem:[#allocation89_spill] sm:$0xff] }
 0x8ba   :  { %6044 = vmatprep.subr.bf16.mxu0 %v9859_v14 }
 0x8bd   :  { %6046 = vmatpush1.bf16.msra.mxu0 %v9860_v10 }
 0x8be   :  { %6048 = vmatprep.subr.bf16.mxu0 %v9861_v19 }
 0x8c1   :  { %6050 = vmatpush1.bf16.msra.mxu0 %v9862_v15 }
 0x8c2   :  { %6052 = vmatprep.subr.bf16.mxu0 %v9863_v40 }
 0x8c5   :  { %6054 = vmatpush1.bf16.msra.mxu0 %v9864_v5 }
 0x8c6   :  { %6056 = vmatprep.subr.bf16.mxu0 %v9865_v42 }
 0x8c9   :  { %6058 = vmatpush1.bf16.msra.mxu0 %v9866_v52 }
 0x8ca   :  { %6060 = vmatprep.subr.bf16.mxu0 %v9867_v24 }
 0x8cd   :  { %6062 = vmatpush1.bf16.msra.mxu0 %v9868_v57 }
 0x8ce   :  { %6128 = vmatprep.subr.bf16.mxu0 %v9869_v36  ;;  %v8488_v36 = vld [vmem:[%s9183_s10] ss:$0 sm:$0xff] }
 0x943   :  { %v2347_v14 = vpop.f32.mrb[36].mxu0 }
 0x944   :  { %v2348_v10 = vadd.f32 %v2347_v14, %v9782_v55  ;;  %v2349_v19 = vpop.f32.mrb[37].mxu0  ;;  %v2436_v14 = vadd.f32 %v8488_v36, %v2256_v56 }
 0x945   :  { %v2350_v15 = vadd.f32 %v2349_v19, %v9870_v1 }
 0x946   :  { %v2422_v40 = vadd.f32 %v2348_v10, %v8417_v9 }
 0x947   :  { %v2423_v63 = vadd.f32 %v2350_v15, %v2254_v0 }
 0x948   :  { %v4339_v5 = vmul.f32 -1.442695, %v2422_v40 }
 0x949   :  { %v4340_v42 = vmul.f32 -1.442695, %v2423_v63 }
 0x94a   :  { %7070 = vpow2.f32 %v4339_v5 }
 0x94b   :  { %7072 = vpow2.f32 %v4340_v42 }
 0x954   :  { %v7071_v52 = vpop.eup %7070 }
 0x955   :  { %v2430_v38 = vadd.f32 1.0, %v7071_v52  ;;  %v7073_v24 = vpop.eup %7072 }
 0x956   :  { %v2431_v55 = vadd.f32 1.0, %v7073_v24  ;;  %v9875_v24 = vld [vmem:[#allocation98_spill] sm:$0xff] }
 0x957   :  { %7074 = vrcp.f32 %v2430_v38 }
 0x958   :  { %7076 = vrcp.f32 %v2431_v55  ;;  %v9871_v55 = vld [vmem:[#allocation92_spill] sm:$0xff] }
 0x961   :  { %v7075_v19 = vpop.eup %7074 }
 0x962   :  { %v2437_v1 = vmul.f32 %v7075_v19, %v2436_v14  ;;  %v7077_v40 = vpop.eup %7076  ;;  %v9876_v14 = vld [vmem:[#allocation100_spill] sm:$0xff]  ;;  %v9877_v19 = vld [vmem:[#allocation102_spill] sm:$0xff] }
 0x963   :  { %v2418_v9 = vpop.f32.mrb[38].mxu0  ;;  %v2440_v38 = vsub.f32 1.0, %v7077_v40  ;;  %v2442_v52 = vmul.f32 %v7077_v40, %v8323_v47  ;;  %v9882_v40 = vld [vmem:[#allocation112_spill] sm:$0xff] }
 0x964   :  { %v2419_v15 = vadd.f32 %v2418_v9, %v7984_v20  ;;  %v4732_v63 = vpop.f32.mrb[39].mxu0  ;;  %v9878_v9 = vld [vmem:[#allocation104_spill] sm:$0xff] }
 0x965   :  { %v9880_v63 = vld [vmem:[#allocation108_spill] sm:$0xff] }
 0x966   :  { %v2438_v0 = vadd.f32 %v2437_v1, %v2419_v15  ;;  %v8501_v1 = vsel %vm4341_vm5, %v8428_v30, %v8329_v18  ;;  %v9873_v18 = vld [vmem:[#allocation94_spill] sm:$0xff]  ;;  %v9874_v30 = vld [vmem:[#allocation96_spill] sm:$0xff] }
 0x967   :  { %v9879_v15 = vld [vmem:[#allocation106_spill] sm:$0xff] }
 0x968   :  { %7078 = vtanh.f32 %v2438_v0  ;;  %v9881_v0 = vld [vmem:[#allocation110_spill] sm:$0xff] }
 0x972   :  { %v7079_v5 = vpop.eup %7078 }
 0x973   :  { %v2441_v42 = vmul.f32 %v7079_v5, %v2440_v38  ;;  %v9883_v38 = vld [vmem:[#allocation114_spill] sm:$0xff]  ;;  %v9884_v5 = vld [vmem:[#allocation116_spill] sm:$0xff] }
 0x975   :  { %v2443_v10 = vadd.f32 %v2442_v52, %v2441_v42  ;;  %v9885_v42 = vld [vmem:[#allocation118_spill] sm:$0xff]  ;;  %v9886_v52 = vld [vmem:[#allocation120_spill] sm:$0xff] }
 0x977   :  { %v8495_v56 = vsel %vm4341_vm5, %v2443_v10, %v8323_v47  ;;  %v9872_v47 = vld [vmem:[#allocation119_spill] sm:$0xff]  ;;  %v9887_v10 = vld [vmem:[#allocation121_spill] sm:$0xff] }
 0x978   :  { %2519 = vmatprep.mubr.f32.mxu1 %v8495_v56  ;;  %2590 = vmatprep.mubr.f32.mxu0 %v8495_v56 }
 0x979   :  { %2520 = vmatmul.mubr.f32.vlgmr.msra.gmra.mrb[8].mxu1 %v8501_v1  ;;  %2591 = vmatmul.mubr.f32.vlgmr.msra.gmra.mrb[40].mxu0 %v8501_v1 }
 0x97a   :  { %6066 = vmatpush1.bf16.msra.mxu1 %v9611_v44  ;;  %2661 = vmatprep.mubr.f32.mxu1 %v8495_v56 }
 0x97b   :  { %6068 = vmatprep.subr.bf16.mxu1 %v9612_v45  ;;  %6130 = vmatpush1.bf16.msra.mxu0 %v9613_v23 }
 0x97c   :  { %6132 = vmatprep.subr.bf16.mxu0 %v9614_v50  ;;  %2754 = vmatprep.mubr.f32.mxu0 %v9521_v61 }
 0x97e   :  { %6070 = vmatpush1.bf16.msra.mxu1 %v9615_v26 }
 0x97f   :  { %6072 = vmatprep.subr.bf16.mxu1 %v9696_v33  ;;  %6134 = vmatpush1.bf16.msra.mxu0 %v9697_v16 }
 0x980   :  { %6136 = vmatprep.subr.bf16.mxu0 %v9698_v27 }
 0x982   :  { %6074 = vmatpush1.bf16.msra.mxu1 %v9699_v29 }
 0x983   :  { %6076 = vmatprep.subr.bf16.mxu1 %v9700_v34  ;;  %6138 = vmatpush1.bf16.msra.mxu0 %v9701_v49 }
 0x984   :  { %6140 = vmatprep.subr.bf16.mxu0 %v9702_v54 }
 0x986   :  { %6078 = vmatpush1.bf16.msra.mxu1 %v9623_v62 }
 0x987   :  { %6080 = vmatprep.subr.bf16.mxu1 %v9703_v59  ;;  %6142 = vmatpush1.bf16.msra.mxu0 %v9704_v32 }
 0x988   :  { %6144 = vmatprep.subr.bf16.mxu0 %v9783_v17 }
 0x98a   :  { %6082 = vmatpush1.bf16.msra.mxu1 %v9784_v28 }
 0x98b   :  { %6084 = vmatprep.subr.bf16.mxu1 %v9785_v21  ;;  %6146 = vmatpush1.bf16.msra.mxu0 %v9786_v43 }
 0x98c   :  { %6148 = vmatprep.subr.bf16.mxu0 %v9787_v6 }
 0x98e   :  { %6086 = vmatpush1.bf16.msra.mxu1 %v9708_v7 }
 0x98f   :  { %6088 = vmatprep.subr.bf16.mxu1 %v9709_v58  ;;  %6150 = vmatpush1.bf16.msra.mxu0 %v9710_v51 }
 0x990   :  { %6152 = vmatprep.subr.bf16.mxu0 %v9711_v2 }
 0x992   :  { %6090 = vmatpush1.bf16.msra.mxu1 %v9712_v3 }
 0x993   :  { %6092 = vmatprep.subr.bf16.mxu1 %v9713_v37  ;;  %6154 = vmatpush1.bf16.msra.mxu0 %v9714_v8 }
 0x994   :  { %6156 = vmatprep.subr.bf16.mxu0 %v9715_v60 }
 0x996   :  { %6094 = vmatpush1.bf16.msra.mxu1 %v9788_v53 }
 0x997   :  { %6096 = vmatprep.subr.bf16.mxu1 %v9871_v55  ;;  %6158 = vmatpush1.bf16.msra.mxu0 %v9872_v47 }
 0x998   :  { %6159 = vmatprep.subr.bf16.mxu0 %v9580_v46 }
 0x99a   :  { %6098 = vmatpush1.bf16.msra.mxu1 %v9873_v18 }
 0x99b   :  { %6100 = vmatprep.subr.bf16.mxu1 %v9874_v30 }
 0x99e   :  { %6102 = vmatpush1.bf16.msra.mxu1 %v9875_v24 }
 0x99f   :  { %6104 = vmatprep.subr.bf16.mxu1 %v9876_v14  ;;  %v9921_v14 = vld [vmem:[#allocation129_spill] sm:$0xff] }
 0x9a2   :  { %6106 = vmatpush1.bf16.msra.mxu1 %v9877_v19  ;;  %v9888_v19 = vld [vmem:[#allocation10_spill] sm:$0xff] }
 0x9a3   :  { %6108 = vmatprep.subr.bf16.mxu1 %v9878_v9  ;;  %v9899_v9 = vld [vmem:[#allocation32_spill] sm:$0xff] }
 0x9a6   :  { %6110 = vmatpush1.bf16.msra.mxu1 %v9879_v15  ;;  %v9889_v15 = vld [vmem:[#allocation12_spill] sm:$0xff] }
 0x9a7   :  { %6112 = vmatprep.subr.bf16.mxu1 %v9880_v63  ;;  %v9890_v63 = vld [vmem:[#allocation13_spill] sm:$0xff] }
 0x9aa   :  { %6114 = vmatpush1.bf16.msra.mxu1 %v9881_v0  ;;  %v9891_v0 = vld [vmem:[#allocation16_spill] sm:$0xff] }
 0x9ab   :  { %6116 = vmatprep.subr.bf16.mxu1 %v9882_v40  ;;  %v9892_v40 = vld [vmem:[#allocation17_spill] sm:$0xff] }
 0x9ae   :  { %6118 = vmatpush1.bf16.msra.mxu1 %v9883_v38  ;;  %v9893_v38 = vld [vmem:[#allocation20_spill] sm:$0xff] }
 0x9af   :  { %6120 = vmatprep.subr.bf16.mxu1 %v9884_v5  ;;  %v9894_v5 = vld [vmem:[#allocation21_spill] sm:$0xff] }
 0x9b2   :  { %6122 = vmatpush1.bf16.msra.mxu1 %v9885_v42  ;;  %v9895_v42 = vld [vmem:[#allocation24_spill] sm:$0xff] }
 0x9b3   :  { %6124 = vmatprep.subr.bf16.mxu1 %v9886_v52  ;;  %v9896_v52 = vld [vmem:[#allocation25_spill] sm:$0xff] }
 0x9b6   :  { %6126 = vmatpush1.bf16.msra.mxu1 %v9887_v10  ;;  %v9897_v10 = vld [vmem:[#allocation28_spill] sm:$0xff] }
 0x9b7   :  { %6184 = vmatprep.subr.bf16.mxu1 %v9888_v19  ;;  %v9898_v19 = vld [vmem:[#allocation29_spill] sm:$0xff] }
 0x9b9   :  { %2662 = vmatmul.mubr.f32.vlgmr.msra.gmra.mrb[24].mxu1 %v8501_v1 }
 0x9ba   :  { %6186 = vmatpush1.bf16.msra.mxu1 %v9889_v15  ;;  %v9900_v15 = vld [vmem:[#allocation33_spill] sm:$0xff] }
 0x9bb   :  { %6188 = vmatprep.subr.bf16.mxu1 %v9890_v63  ;;  %v9901_v63 = vld [vmem:[#allocation36_spill] sm:$0xff] }
 0x9be   :  { %6190 = vmatpush1.bf16.msra.mxu1 %v9891_v0  ;;  %v9902_v0 = vld [vmem:[#allocation37_spill] sm:$0xff] }
 0x9bf   :  { %6192 = vmatprep.subr.bf16.mxu1 %v9892_v40  ;;  %v9903_v40 = vld [vmem:[#allocation40_spill] sm:$0xff] }
 0x9c2   :  { %6194 = vmatpush1.bf16.msra.mxu1 %v9893_v38  ;;  %v9904_v38 = vld [vmem:[#allocation41_spill] sm:$0xff] }
 0x9c3   :  { %6196 = vmatprep.subr.bf16.mxu1 %v9894_v5  ;;  %v9905_v5 = vld [vmem:[#allocation44_spill] sm:$0xff] }
 0x9c6   :  { %6198 = vmatpush1.bf16.msra.mxu1 %v9895_v42  ;;  %v9906_v42 = vld [vmem:[#allocation45_spill] sm:$0xff] }
 0x9c7   :  { %6200 = vmatprep.subr.bf16.mxu1 %v9896_v52  ;;  %v9907_v52 = vld [vmem:[#allocation48_spill] sm:$0xff] }
 0x9ca   :  { %6202 = vmatpush1.bf16.msra.mxu1 %v9897_v10  ;;  %v9908_v10 = vld [vmem:[#allocation49_spill] sm:$0xff] }
 0x9cb   :  { %6204 = vmatprep.subr.bf16.mxu1 %v9898_v19  ;;  %v9909_v19 = vld [vmem:[#allocation52_spill] sm:$0xff] }
 0x9ce   :  { %6206 = vmatpush1.bf16.msra.mxu1 %v9899_v9  ;;  %v9910_v9 = vld [vmem:[#allocation53_spill] sm:$0xff] }
 0x9cf   :  { %6208 = vmatprep.subr.bf16.mxu1 %v9900_v15  ;;  %v9911_v15 = vld [vmem:[#allocation56_spill] sm:$0xff] }
 0x9d2   :  { %6210 = vmatpush1.bf16.msra.mxu1 %v9901_v63  ;;  %v9912_v63 = vld [vmem:[#allocation57_spill] sm:$0xff] }
 0x9d3   :  { %6212 = vmatprep.subr.bf16.mxu1 %v9902_v0  ;;  %v9913_v0 = vld [vmem:[#allocation60_spill] sm:$0xff] }
 0x9d6   :  { %6214 = vmatpush1.bf16.msra.mxu1 %v9903_v40  ;;  %v9914_v40 = vld [vmem:[#allocation61_spill] sm:$0xff] }
 0x9d7   :  { %6216 = vmatprep.subr.bf16.mxu1 %v9904_v38  ;;  %v9915_v38 = vld [vmem:[#allocation64_spill] sm:$0xff] }
 0x9da   :  { %6218 = vmatpush1.bf16.msra.mxu1 %v9905_v5  ;;  %v9916_v5 = vld [vmem:[#allocation65_spill] sm:$0xff] }
 0x9db   :  { %6220 = vmatprep.subr.bf16.mxu1 %v9906_v42  ;;  %v9917_v42 = vld [vmem:[#allocation68_spill] sm:$0xff] }
 0x9de   :  { %6222 = vmatpush1.bf16.msra.mxu1 %v9907_v52  ;;  %v9918_v52 = vld [vmem:[#allocation69_spill] sm:$0xff] }
 0x9df   :  { %6224 = vmatprep.subr.bf16.mxu1 %v9908_v10  ;;  %v9919_v10 = vld [vmem:[#allocation72_spill] sm:$0xff] }
 0x9e2   :  { %6226 = vmatpush1.bf16.msra.mxu1 %v9909_v19  ;;  %v9920_v19 = vld [vmem:[#allocation74_spill] sm:$0xff] }
 0x9e3   :  { %6228 = vmatprep.subr.bf16.mxu1 %v9910_v9 }
 0x9e6   :  { %6230 = vmatpush1.bf16.msra.mxu1 %v9911_v15 }
 0x9e7   :  { %6232 = vmatprep.subr.bf16.mxu1 %v9912_v63 }
 0x9ea   :  { %6234 = vmatpush1.bf16.msra.mxu1 %v9913_v0 }
 0x9eb   :  { %6236 = vmatprep.subr.bf16.mxu1 %v9914_v40 }
 0x9ee   :  { %6238 = vmatpush1.bf16.msra.mxu1 %v9915_v38 }
 0x9ef   :  { %6240 = vmatprep.subr.bf16.mxu1 %v9916_v5 }
 0x9f2   :  { %6242 = vmatpush1.bf16.msra.mxu1 %v9917_v42 }
 0x9f3   :  { %6244 = vmatprep.subr.bf16.mxu1 %v9918_v52 }
 0x9f6   :  { %6246 = vmatpush1.bf16.msra.mxu1 %v9919_v10 }
 0x9f7   :  { %6312 = vmatprep.subr.bf16.mxu1 %v9920_v19 }
 0xa4c   :  { %v2521_v9 = vpop.f32.mrb[8].mxu1  ;;  %v2592_v15 = vpop.f32.mrb[40].mxu0 }
 0xa4d   :  { %v6965_v63 = vadd.f32 %v2521_v9, %v9921_v14  ;;  %v2523_v24 = vpop.f32.mrb[9].mxu1  ;;  %v8589_v0 = vpop.f32.mrb[41].mxu0  ;;  %v2682_v19 = vadd.f32 %v8423_v4, %v2592_v15  ;;  %v9922_v9 = vld [vmem:[#allocation126_spill] sm:$0xff] }
 0xa4e   :  { %v6966_v38 = vadd.f32 %v2523_v24, %v9665_v41  ;;  %v9928_v15 = vld [vmem:[#allocation22_spill] sm:$0xff] }
 0xa4f   :  { %v4342_v40 = vmul.f32 -1.442695, %v6965_v63 }
 0xa50   :  { %v4343_v5 = vmul.f32 -1.442695, %v6966_v38 }
 0xa51   :  { %7080 = vpow2.f32 %v4342_v40 }
 0xa52   :  { %7082 = vpow2.f32 %v4343_v5  ;;  %v9929_v5 = vld [vmem:[#allocation23_spill] sm:$0xff] }
 0xa5b   :  { %v7081_v42 = vpop.eup %7080 }
 0xa5c   :  { %v2676_v30 = vadd.f32 1.0, %v7081_v42  ;;  %v7083_v52 = vpop.eup %7082  ;;  %v9930_v42 = vld [vmem:[#allocation26_spill] sm:$0xff] }
 0xa5d   :  { %v2677_v10 = vadd.f32 1.0, %v7083_v52  ;;  %v9931_v52 = vld [vmem:[#allocation27_spill] sm:$0xff] }
 0xa5e   :  { %7084 = vrcp.f32 %v2676_v30  ;;  %v9925_v30 = vld [vmem:[#allocation15_spill] sm:$0xff] }
 0xa5f   :  { %7086 = vrcp.f32 %v2677_v10  ;;  %v9932_v10 = vld [vmem:[#allocation30_spill] sm:$0xff] }
 0xa68   :  { %v7085_v18 = vpop.eup %7084 }
 0xa69   :  { %v2683_v47 = vmul.f32 %v7085_v18, %v2682_v19  ;;  %v7087_v55 = vpop.eup %7086  ;;  %v9924_v18 = vld [vmem:[#allocation14_spill] sm:$0xff]  ;;  %v9927_v19 = vld [vmem:[#allocation19_spill] sm:$0xff] }
 0xa6a   :  { %v2686_v63 = vsub.f32 1.0, %v7087_v55  ;;  %v2688_v40 = vmul.f32 %v7087_v55, %v8501_v1 }
 0xa6b   :  { %v2684_v14 = vadd.f32 %v2683_v47, %v9922_v9  ;;  %v9923_v47 = vld [vmem:[#allocation11_spill] sm:$0xff] }
 0xa6c   :  { %v9933_v9 = vld [vmem:[#allocation31_spill] sm:$0xff] }
 0xa6d   :  { %7088 = vtanh.f32 %v2684_v14  ;;  %v9926_v14 = vld [vmem:[#allocation18_spill] sm:$0xff] }
 0xa77   :  { %v7089_v53 = vpop.eup %7088 }
 0xa78   :  { %v2687_v24 = vmul.f32 %v7089_v53, %v2686_v63  ;;  %v9934_v63 = vld [vmem:[#allocation34_spill] sm:$0xff] }
 0xa7a   :  { %v8595_v38 = vadd.f32 %v2688_v40, %v2687_v24  ;;  %v9935_v24 = vld [vmem:[#allocation35_spill] sm:$0xff]  ;;  %v9936_v40 = vld [vmem:[#allocation38_spill] sm:$0xff] }
 0xa7c   :  { %2755 = vmatmul.mubr.f32.vlgmr.msra.gmra.mrb[42].mxu0 %v8595_v38 }
 0xa7d   :  { %6161 = vmatpush3.bf16.msra.mxu0 %v7892_v39  ;;  %4765 = vmatprep.mubr.msk.f32.mxu0 %vm7225_vm1, %v9521_v61 }
 0xa7e   :  { %6162 = vmatprep.subr.bf16.mxu0 %v9580_v46 }
 0xa81   :  { %6164 = vmatpush3.bf16.msra.mxu0 %v7898_v12 }
 0xa82   :  { %6165 = vmatprep.subr.bf16.mxu0 %v9580_v46 }
 0xa85   :  { %6167 = vmatpush3.bf16.msra.mxu0 %v7904_v35 }
 0xa86   :  { %6168 = vmatprep.subr.bf16.mxu0 %v9580_v46 }
 0xa89   :  { %6170 = vmatpush3.bf16.msra.mxu0 %v7908_v31 }
 0xa8a   :  { %6171 = vmatprep.subr.bf16.mxu0 %v9580_v46 }
 0xa8c   :  { %v2663_v53 = vpop.f32.mrb[24].mxu1 }
 0xa8d   :  { %v2665_v55 = vpop.f32.mrb[25].mxu1  ;;  %6173 = vmatpush3.bf16.msra.mxu0 %v7912_v22 }
 0xa8e   :  { %6174 = vmatprep.subr.bf16.mxu0 %v9580_v46 }
 0xa91   :  { %6176 = vmatpush3.bf16.msra.mxu0 %v7916_v48 }
 0xa92   :  { %6177 = vmatprep.subr.bf16.mxu0 %v9580_v46 }
 0xa95   :  { %6179 = vmatpush3.bf16.msra.mxu0 %v7920_v13 }
 0xa96   :  { %6180 = vmatprep.subr.bf16.mxu0 %v9580_v46 }
 0xa99   :  { %6182 = vmatpush3.bf16.msra.mxu0 %v7924_v11 }
 0xa9a   :  { %6248 = vmatprep.subr.bf16.mxu0 %v9923_v47 }
 0xa9c   :  { %4766 = vmatmul.mubr.f32.vlgmr.msra.gmra.mrb[44].mxu0 %v8595_v38 }
 0xa9d   :  { %6250 = vmatpush1.bf16.msra.mxu0 %v9924_v18 }
 0xa9e   :  { %6252 = vmatprep.subr.bf16.mxu0 %v9925_v30  ;;  %v9956_v30 = vld [vmem:[#allocation139_spill] sm:$0xff] }
 0xaa1   :  { %6254 = vmatpush1.bf16.msra.mxu0 %v9926_v14  ;;  %v9937_v14 = vld [vmem:[#allocation39_spill] sm:$0xff] }
 0xaa2   :  { %6256 = vmatprep.subr.bf16.mxu0 %v9927_v19  ;;  %v9938_v19 = vld [vmem:[#allocation42_spill] sm:$0xff] }
 0xaa5   :  { %6258 = vmatpush1.bf16.msra.mxu0 %v9928_v15  ;;  %v9939_v15 = vld [vmem:[#allocation43_spill] sm:$0xff] }
 0xaa6   :  { %6260 = vmatprep.subr.bf16.mxu0 %v9929_v5  ;;  %v9940_v5 = vld [vmem:[#allocation46_spill] sm:$0xff] }
 0xaa9   :  { %6262 = vmatpush1.bf16.msra.mxu0 %v9930_v42  ;;  %v9941_v42 = vld [vmem:[#allocation47_spill] sm:$0xff] }
 0xaaa   :  { %6264 = vmatprep.subr.bf16.mxu0 %v9931_v52  ;;  %v9942_v52 = vld [vmem:[#allocation50_spill] sm:$0xff] }
 0xaad   :  { %6266 = vmatpush1.bf16.msra.mxu0 %v9932_v10  ;;  %v9943_v10 = vld [vmem:[#allocation51_spill] sm:$0xff] }
 0xaae   :  { %6268 = vmatprep.subr.bf16.mxu0 %v9933_v9  ;;  %v9944_v9 = vld [vmem:[#allocation54_spill] sm:$0xff] }
 0xab1   :  { %6270 = vmatpush1.bf16.msra.mxu0 %v9934_v63  ;;  %v9945_v63 = vld [vmem:[#allocation55_spill] sm:$0xff] }
 0xab2   :  { %6272 = vmatprep.subr.bf16.mxu0 %v9935_v24  ;;  %v9946_v24 = vld [vmem:[#allocation58_spill] sm:$0xff] }
 0xab5   :  { %6274 = vmatpush1.bf16.msra.mxu0 %v9936_v40  ;;  %v9947_v40 = vld [vmem:[#allocation59_spill] sm:$0xff] }
 0xab6   :  { %6276 = vmatprep.subr.bf16.mxu0 %v9937_v14  ;;  %v9948_v14 = vld [vmem:[#allocation62_spill] sm:$0xff] }
 0xab9   :  { %6278 = vmatpush1.bf16.msra.mxu0 %v9938_v19  ;;  %v9949_v19 = vld [vmem:[#allocation63_spill] sm:$0xff] }
 0xaba   :  { %6280 = vmatprep.subr.bf16.mxu0 %v9939_v15  ;;  %v9950_v15 = vld [vmem:[#allocation66_spill] sm:$0xff] }
 0xabd   :  { %6282 = vmatpush1.bf16.msra.mxu0 %v9940_v5  ;;  %v9951_v5 = vld [vmem:[#allocation67_spill] sm:$0xff] }
 0xabe   :  { %6284 = vmatprep.subr.bf16.mxu0 %v9941_v42  ;;  %v9952_v42 = vld [vmem:[#allocation70_spill] sm:$0xff] }
 0xac1   :  { %6286 = vmatpush1.bf16.msra.mxu0 %v9942_v52  ;;  %v9953_v52 = vld [vmem:[#allocation71_spill] sm:$0xff] }
 0xac2   :  { %6288 = vmatprep.subr.bf16.mxu0 %v9943_v10 }
 0xac5   :  { %6290 = vmatpush1.bf16.msra.mxu0 %v9944_v9  ;;  %v9954_v9 = vld [vmem:[#allocation89_spill] sm:$0xff] }
 0xac6   :  { %6292 = vmatprep.subr.bf16.mxu0 %v9945_v63 }
 0xac9   :  { %6294 = vmatpush1.bf16.msra.mxu0 %v9946_v24  ;;  %v9955_v24 = vld [vmem:[#allocation138_spill] sm:$0xff] }
 0xaca   :  { %6296 = vmatprep.subr.bf16.mxu0 %v9947_v40 }
 0xacd   :  { %6298 = vmatpush1.bf16.msra.mxu0 %v9948_v14 }
 0xace   :  { %6300 = vmatprep.subr.bf16.mxu0 %v9949_v19 }
 0xad1   :  { %6302 = vmatpush1.bf16.msra.mxu0 %v9950_v15 }
 0xad2   :  { %6304 = vmatprep.subr.bf16.mxu0 %v9951_v5 }
 0xad5   :  { %6306 = vmatpush1.bf16.msra.mxu0 %v9952_v42 }
 0xad6   :  { %6308 = vmatprep.subr.bf16.mxu0 %v9953_v52 }
 0xad9   :  { %6310 = vmatpush1.bf16.msra.mxu0 %v9868_v57  ;;  %v2845_v57 = vadd.f32 %v8488_v36, %v2665_v55 }
 0xada   :  { %6376 = vmatprep.subr.bf16.mxu0 %v9954_v9 }
 0xb4f   :  { %v2756_v63 = vpop.f32.mrb[42].mxu0 }
 0xb50   :  { %v2757_v10 = vadd.f32 %v2756_v63, %v9955_v24  ;;  %v2758_v40 = vpop.f32.mrb[43].mxu0 }
 0xb51   :  { %v2759_v14 = vadd.f32 %v2758_v40, %v9956_v30 }
 0xb52   :  { %v2831_v19 = vadd.f32 %v2757_v10, %v8589_v0  ;;  %v9966_v10 = vld [vmem:[#allocation106_spill] sm:$0xff] }
 0xb53   :  { %v2832_v18 = vadd.f32 %v2759_v14, %v2663_v53 }
 0xb54   :  { %v4344_v15 = vmul.f32 -1.442695, %v2831_v19 }
 0xb55   :  { %v4345_v5 = vmul.f32 -1.442695, %v2832_v18 }
 0xb56   :  { %7090 = vpow2.f32 %v4344_v15 }
 0xb57   :  { %7092 = vpow2.f32 %v4345_v5  ;;  %v9963_v5 = vld [vmem:[#allocation100_spill] sm:$0xff] }
 0xb60   :  { %v7091_v42 = vpop.eup %7090 }
 0xb61   :  { %v2839_v47 = vadd.f32 1.0, %v7091_v42  ;;  %v7093_v52 = vpop.eup %7092  ;;  %v9964_v42 = vld [vmem:[#allocation102_spill] sm:$0xff] }
 0xb62   :  { %v2840_v9 = vadd.f32 1.0, %v7093_v52  ;;  %v9965_v52 = vld [vmem:[#allocation104_spill] sm:$0xff] }
 0xb63   :  { %7094 = vrcp.f32 %v2839_v47 }
 0xb64   :  { %7096 = vrcp.f32 %v2840_v9  ;;  %v9967_v9 = vld [vmem:[#allocation108_spill] sm:$0xff] }
 0xb6d   :  { %v7095_v11 = vpop.eup %7094 }
 0xb6e   :  { %v2846_v13 = vmul.f32 %v7095_v11, %v2845_v57  ;;  %v7097_v53 = vpop.eup %7096  ;;  %v9957_v11 = vld [vmem:[#allocation90_spill] sm:$0xff]  ;;  %v9958_v57 = vld [vmem:[#allocation92_spill] sm:$0xff] }
 0xb6f   :  { %v2827_v63 = vpop.f32.mrb[44].mxu0  ;;  %v2849_v14 = vsub.f32 1.0, %v7097_v53  ;;  %v2851_v15 = vmul.f32 %v7097_v53, %v8495_v56  ;;  %v9971_v53 = vld [vmem:[#allocation116_spill] sm:$0xff] }
 0xb70   :  { %v2828_v40 = vadd.f32 %v2827_v63, %v7984_v20  ;;  %v4767_v30 = vpop.f32.mrb[45].mxu0  ;;  %v9968_v63 = vld [vmem:[#allocation110_spill] sm:$0xff] }
 0xb71   :  { %v9962_v30 = vld [vmem:[#allocation98_spill] sm:$0xff] }
 0xb72   :  { %v2847_v0 = vadd.f32 %v2846_v13, %v2828_v40  ;;  %v8663_v13 = vsel %vm4346_vm6, %v8595_v38, %v8501_v1  ;;  %v9960_v1 = vld [vmem:[#allocation94_spill] sm:$0xff]  ;;  %v9961_v38 = vld [vmem:[#allocation96_spill] sm:$0xff] }
 0xb73   :  { %v9969_v40 = vld [vmem:[#allocation112_spill] sm:$0xff] }
 0xb74   :  { %7098 = vtanh.f32 %v2847_v0  ;;  %v9970_v0 = vld [vmem:[#allocation114_spill] sm:$0xff] }
 0xb7e   :  { %v7099_v18 = vpop.eup %7098 }
 0xb7f   :  { %v2850_v19 = vmul.f32 %v7099_v18, %v2849_v14  ;;  %v9972_v14 = vld [vmem:[#allocation118_spill] sm:$0xff]  ;;  %v9973_v18 = vld [vmem:[#allocation120_spill] sm:$0xff] }
 0xb81   :  { %v2852_v47 = vadd.f32 %v2851_v15, %v2850_v19  ;;  %v9974_v19 = vld [vmem:[#allocation121_spill] sm:$0xff]  ;;  %v9975_v15 = vld [vmem:[#allocation10_spill] sm:$0xff] }
 0xb83   :  { %v8657_v55 = vsel %vm4346_vm6, %v2852_v47, %v8495_v56  ;;  %v9959_v56 = vld [vmem:[#allocation119_spill] sm:$0xff]  ;;  %v9976_v47 = vld [vmem:[#allocation12_spill] sm:$0xff] }
 0xb84   :  { %2928 = vmatprep.mubr.f32.mxu1 %v8657_v55  ;;  %2999 = vmatprep.mubr.f32.mxu0 %v8657_v55 }
 0xb85   :  { %2929 = vmatmul.mubr.f32.vlgmr.msra.gmra.mrb[10].mxu1 %v8663_v13  ;;  %3000 = vmatmul.mubr.f32.vlgmr.msra.gmra.mrb[46].mxu0 %v8663_v13 }
 0xb86   :  { %6314 = vmatpush1.bf16.msra.mxu1 %v9611_v44  ;;  %3070 = vmatprep.mubr.f32.mxu1 %v8657_v55 }
 0xb87   :  { %6316 = vmatprep.subr.bf16.mxu1 %v9612_v45  ;;  %6378 = vmatpush1.bf16.msra.mxu0 %v9613_v23 }
 0xb88   :  { %6380 = vmatprep.subr.bf16.mxu0 %v9614_v50  ;;  %3163 = vmatprep.mubr.f32.mxu0 %v9521_v61 }
 0xb8a   :  { %6318 = vmatpush1.bf16.msra.mxu1 %v9615_v26 }
 0xb8b   :  { %6320 = vmatprep.subr.bf16.mxu1 %v9696_v33  ;;  %6382 = vmatpush1.bf16.msra.mxu0 %v9697_v16 }
 0xb8c   :  { %6384 = vmatprep.subr.bf16.mxu0 %v9698_v27 }
 0xb8e   :  { %6322 = vmatpush1.bf16.msra.mxu1 %v9699_v29 }
 0xb8f   :  { %6324 = vmatprep.subr.bf16.mxu1 %v9700_v34  ;;  %6386 = vmatpush1.bf16.msra.mxu0 %v9701_v49 }
 0xb90   :  { %6388 = vmatprep.subr.bf16.mxu0 %v9702_v54 }
 0xb92   :  { %6326 = vmatpush1.bf16.msra.mxu1 %v9623_v62 }
 0xb93   :  { %6328 = vmatprep.subr.bf16.mxu1 %v9703_v59  ;;  %6390 = vmatpush1.bf16.msra.mxu0 %v9704_v32 }
 0xb94   :  { %6392 = vmatprep.subr.bf16.mxu0 %v9783_v17 }
 0xb96   :  { %6330 = vmatpush1.bf16.msra.mxu1 %v9784_v28 }
 0xb97   :  { %6332 = vmatprep.subr.bf16.mxu1 %v9785_v21  ;;  %6394 = vmatpush1.bf16.msra.mxu0 %v9786_v43 }
 0xb98   :  { %6396 = vmatprep.subr.bf16.mxu0 %v9787_v6 }
 0xb9a   :  { %6334 = vmatpush1.bf16.msra.mxu1 %v9708_v7 }
 0xb9b   :  { %6336 = vmatprep.subr.bf16.mxu1 %v9709_v58  ;;  %6398 = vmatpush1.bf16.msra.mxu0 %v9710_v51 }
 0xb9c   :  { %6400 = vmatprep.subr.bf16.mxu0 %v9711_v2 }
 0xb9e   :  { %6338 = vmatpush1.bf16.msra.mxu1 %v9712_v3 }
 0xb9f   :  { %6340 = vmatprep.subr.bf16.mxu1 %v9713_v37  ;;  %6402 = vmatpush1.bf16.msra.mxu0 %v9714_v8 }
 0xba0   :  { %6404 = vmatprep.subr.bf16.mxu0 %v9715_v60 }
 0xba2   :  { %6342 = vmatpush1.bf16.msra.mxu1 %v9957_v11 }
 0xba3   :  { %6344 = vmatprep.subr.bf16.mxu1 %v9958_v57  ;;  %6406 = vmatpush1.bf16.msra.mxu0 %v9959_v56 }
 0xba4   :  { %6407 = vmatprep.subr.bf16.mxu0 %v9580_v46 }
 0xba6   :  { %6346 = vmatpush1.bf16.msra.mxu1 %v9960_v1 }
 0xba7   :  { %6348 = vmatprep.subr.bf16.mxu1 %v9961_v38 }
 0xbaa   :  { %6350 = vmatpush1.bf16.msra.mxu1 %v9962_v30 }
 0xbab   :  { %6352 = vmatprep.subr.bf16.mxu1 %v9963_v5 }
 0xbae   :  { %6354 = vmatpush1.bf16.msra.mxu1 %v9964_v42 }
 0xbaf   :  { %6356 = vmatprep.subr.bf16.mxu1 %v9965_v52  ;;  %v10008_v52 = vld [vmem:[#allocation129_spill] sm:$0xff] }
 0xbb2   :  { %6358 = vmatpush1.bf16.msra.mxu1 %v9966_v10  ;;  %v9986_v10 = vld [vmem:[#allocation32_spill] sm:$0xff] }
 0xbb3   :  { %6360 = vmatprep.subr.bf16.mxu1 %v9967_v9  ;;  %v9977_v9 = vld [vmem:[#allocation13_spill] sm:$0xff] }
 0xbb6   :  { %6362 = vmatpush1.bf16.msra.mxu1 %v9968_v63  ;;  %v9978_v63 = vld [vmem:[#allocation16_spill] sm:$0xff] }
 0xbb7   :  { %6364 = vmatprep.subr.bf16.mxu1 %v9969_v40  ;;  %v9979_v40 = vld [vmem:[#allocation17_spill] sm:$0xff] }
 0xbba   :  { %6366 = vmatpush1.bf16.msra.mxu1 %v9970_v0  ;;  %v9980_v0 = vld [vmem:[#allocation20_spill] sm:$0xff] }
 0xbbb   :  { %6368 = vmatprep.subr.bf16.mxu1 %v9971_v53  ;;  %v9981_v53 = vld [vmem:[#allocation21_spill] sm:$0xff] }
 0xbbe   :  { %6370 = vmatpush1.bf16.msra.mxu1 %v9972_v14  ;;  %v9982_v14 = vld [vmem:[#allocation24_spill] sm:$0xff] }
 0xbbf   :  { %6372 = vmatprep.subr.bf16.mxu1 %v9973_v18  ;;  %v9983_v18 = vld [vmem:[#allocation25_spill] sm:$0xff] }
 0xbc2   :  { %6374 = vmatpush1.bf16.msra.mxu1 %v9974_v19  ;;  %v9984_v19 = vld [vmem:[#allocation28_spill] sm:$0xff] }
 0xbc3   :  { %6432 = vmatprep.subr.bf16.mxu1 %v9975_v15  ;;  %v9985_v15 = vld [vmem:[#allocation29_spill] sm:$0xff] }
 0xbc5   :  { %3071 = vmatmul.mubr.f32.vlgmr.msra.gmra.mrb[26].mxu1 %v8663_v13 }
 0xbc6   :  { %6434 = vmatpush1.bf16.msra.mxu1 %v9976_v47  ;;  %v9987_v47 = vld [vmem:[#allocation33_spill] sm:$0xff] }
 0xbc7   :  { %6436 = vmatprep.subr.bf16.mxu1 %v9977_v9  ;;  %v9988_v9 = vld [vmem:[#allocation36_spill] sm:$0xff] }
 0xbca   :  { %6438 = vmatpush1.bf16.msra.mxu1 %v9978_v63  ;;  %v9989_v63 = vld [vmem:[#allocation37_spill] sm:$0xff] }
 0xbcb   :  { %6440 = vmatprep.subr.bf16.mxu1 %v9979_v40  ;;  %v9990_v40 = vld [vmem:[#allocation40_spill] sm:$0xff] }
 0xbce   :  { %6442 = vmatpush1.bf16.msra.mxu1 %v9980_v0  ;;  %v9991_v0 = vld [vmem:[#allocation41_spill] sm:$0xff] }
 0xbcf   :  { %6444 = vmatprep.subr.bf16.mxu1 %v9981_v53  ;;  %v9992_v53 = vld [vmem:[#allocation44_spill] sm:$0xff] }
 0xbd2   :  { %6446 = vmatpush1.bf16.msra.mxu1 %v9982_v14  ;;  %v9993_v14 = vld [vmem:[#allocation45_spill] sm:$0xff] }
 0xbd3   :  { %6448 = vmatprep.subr.bf16.mxu1 %v9983_v18  ;;  %v9994_v18 = vld [vmem:[#allocation48_spill] sm:$0xff] }
 0xbd6   :  { %6450 = vmatpush1.bf16.msra.mxu1 %v9984_v19  ;;  %v9995_v19 = vld [vmem:[#allocation49_spill] sm:$0xff] }
 0xbd7   :  { %6452 = vmatprep.subr.bf16.mxu1 %v9985_v15  ;;  %v9996_v15 = vld [vmem:[#allocation52_spill] sm:$0xff] }
 0xbda   :  { %6454 = vmatpush1.bf16.msra.mxu1 %v9986_v10  ;;  %v9997_v10 = vld [vmem:[#allocation53_spill] sm:$0xff] }
 0xbdb   :  { %6456 = vmatprep.subr.bf16.mxu1 %v9987_v47  ;;  %v9998_v47 = vld [vmem:[#allocation56_spill] sm:$0xff] }
 0xbde   :  { %6458 = vmatpush1.bf16.msra.mxu1 %v9988_v9  ;;  %v9999_v9 = vld [vmem:[#allocation57_spill] sm:$0xff] }
 0xbdf   :  { %6460 = vmatprep.subr.bf16.mxu1 %v9989_v63  ;;  %v10000_v63 = vld [vmem:[#allocation60_spill] sm:$0xff] }
 0xbe2   :  { %6462 = vmatpush1.bf16.msra.mxu1 %v9990_v40  ;;  %v10001_v40 = vld [vmem:[#allocation61_spill] sm:$0xff] }
 0xbe3   :  { %6464 = vmatprep.subr.bf16.mxu1 %v9991_v0  ;;  %v10002_v0 = vld [vmem:[#allocation64_spill] sm:$0xff] }
 0xbe6   :  { %6466 = vmatpush1.bf16.msra.mxu1 %v9992_v53  ;;  %v10003_v53 = vld [vmem:[#allocation65_spill] sm:$0xff] }
 0xbe7   :  { %6468 = vmatprep.subr.bf16.mxu1 %v9993_v14  ;;  %v10004_v14 = vld [vmem:[#allocation68_spill] sm:$0xff] }
 0xbea   :  { %6470 = vmatpush1.bf16.msra.mxu1 %v9994_v18  ;;  %v10005_v18 = vld [vmem:[#allocation69_spill] sm:$0xff] }
 0xbeb   :  { %6472 = vmatprep.subr.bf16.mxu1 %v9995_v19  ;;  %v10006_v19 = vld [vmem:[#allocation72_spill] sm:$0xff] }
 0xbee   :  { %6474 = vmatpush1.bf16.msra.mxu1 %v9996_v15  ;;  %v10007_v15 = vld [vmem:[#allocation74_spill] sm:$0xff] }
 0xbef   :  { %6476 = vmatprep.subr.bf16.mxu1 %v9997_v10 }
 0xbf2   :  { %6478 = vmatpush1.bf16.msra.mxu1 %v9998_v47 }
 0xbf3   :  { %6480 = vmatprep.subr.bf16.mxu1 %v9999_v9 }
 0xbf6   :  { %6482 = vmatpush1.bf16.msra.mxu1 %v10000_v63 }
 0xbf7   :  { %6484 = vmatprep.subr.bf16.mxu1 %v10001_v40 }
 0xbfa   :  { %6486 = vmatpush1.bf16.msra.mxu1 %v10002_v0 }
 0xbfb   :  { %6488 = vmatprep.subr.bf16.mxu1 %v10003_v53 }
 0xbfe   :  { %6490 = vmatpush1.bf16.msra.mxu1 %v10004_v14 }
 0xbff   :  { %6492 = vmatprep.subr.bf16.mxu1 %v10005_v18 }
 0xc02   :  { %6494 = vmatpush1.bf16.msra.mxu1 %v10006_v19 }
 0xc03   :  { %6560 = vmatprep.subr.bf16.mxu1 %v10007_v15 }
 0xc58   :  { %v2930_v10 = vpop.f32.mrb[10].mxu1  ;;  %v3001_v47 = vpop.f32.mrb[46].mxu0 }
 0xc59   :  { %v6967_v9 = vadd.f32 %v2930_v10, %v10008_v52  ;;  %v2932_v42 = vpop.f32.mrb[11].mxu1  ;;  %v8751_v63 = vpop.f32.mrb[47].mxu0  ;;  %v3091_v15 = vadd.f32 %v8423_v4, %v3001_v47  ;;  %v10009_v10 = vld [vmem:[#allocation125_spill] sm:$0xff]  ;;  %v10020_v47 = vld [vmem:[#allocation27_spill] sm:$0xff] }
 0xc5a   :  { %v6968_v0 = vadd.f32 %v2932_v42, %v9665_v41 }
 0xc5b   :  { %v4347_v40 = vmul.f32 -1.442695, %v6967_v9 }
 0xc5c   :  { %v4348_v53 = vmul.f32 -1.442695, %v6968_v0 }
 0xc5d   :  { %7100 = vpow2.f32 %v4347_v40 }
 0xc5e   :  { %7102 = vpow2.f32 %v4348_v53  ;;  %v10015_v53 = vld [vmem:[#allocation18_spill] sm:$0xff] }
 0xc67   :  { %v7101_v14 = vpop.eup %7100 }
 0xc68   :  { %v3085_v5 = vadd.f32 1.0, %v7101_v14  ;;  %v7103_v18 = vpop.eup %7102  ;;  %v10016_v14 = vld [vmem:[#allocation19_spill] sm:$0xff] }
 0xc69   :  { %v3086_v19 = vadd.f32 1.0, %v7103_v18  ;;  %v10017_v18 = vld [vmem:[#allocation22_spill] sm:$0xff] }
 0xc6a   :  { %7104 = vrcp.f32 %v3085_v5  ;;  %v10013_v5 = vld [vmem:[#allocation14_spill] sm:$0xff] }
 0xc6b   :  { %7106 = vrcp.f32 %v3086_v19  ;;  %v10018_v19 = vld [vmem:[#allocation23_spill] sm:$0xff] }
 0xc74   :  { %v7105_v30 = vpop.eup %7104 }
 0xc75   :  { %v3092_v38 = vmul.f32 %v7105_v30, %v3091_v15  ;;  %v7107_v1 = vpop.eup %7106  ;;  %v10012_v30 = vld [vmem:[#allocation11_spill] sm:$0xff]  ;;  %v10019_v15 = vld [vmem:[#allocation26_spill] sm:$0xff] }
 0xc76   :  { %v3095_v9 = vsub.f32 1.0, %v7107_v1  ;;  %v3097_v40 = vmul.f32 %v7107_v1, %v8663_v13  ;;  %v10010_v1 = vld [vmem:[#allocation136_spill] sm:$0xff] }
 0xc77   :  { %v3093_v52 = vadd.f32 %v3092_v38, %v10009_v10  ;;  %v10011_v38 = vld [vmem:[#allocation137_spill] sm:$0xff]  ;;  %v10021_v10 = vld [vmem:[#allocation30_spill] sm:$0xff] }
 0xc79   :  { %7108 = vtanh.f32 %v3093_v52  ;;  %v10014_v52 = vld [vmem:[#allocation15_spill] sm:$0xff] }
 0xc83   :  { %v7109_v56 = vpop.eup %7108 }
 0xc84   :  { %v3096_v42 = vmul.f32 %v7109_v56, %v3095_v9  ;;  %v10022_v9 = vld [vmem:[#allocation31_spill] sm:$0xff] }
 0xc86   :  { %v8757_v0 = vadd.f32 %v3097_v40, %v3096_v42  ;;  %v10023_v42 = vld [vmem:[#allocation34_spill] sm:$0xff]  ;;  %v10024_v40 = vld [vmem:[#allocation35_spill] sm:$0xff] }
 0xc88   :  { %3164 = vmatmul.mubr.f32.vlgmr.msra.gmra.mrb[48].mxu0 %v8757_v0 }
 0xc89   :  { %6409 = vmatpush3.bf16.msra.mxu0 %v7892_v39  ;;  %4800 = vmatprep.mubr.msk.f32.mxu0 %vm7225_vm1, %v9521_v61 }
 0xc8a   :  { %6410 = vmatprep.subr.bf16.mxu0 %v9580_v46 }
 0xc8d   :  { %6412 = vmatpush3.bf16.msra.mxu0 %v7898_v12 }
 0xc8e   :  { %6413 = vmatprep.subr.bf16.mxu0 %v9580_v46 }
 0xc91   :  { %6415 = vmatpush3.bf16.msra.mxu0 %v7904_v35 }
 0xc92   :  { %6416 = vmatprep.subr.bf16.mxu0 %v9580_v46 }
 0xc95   :  { %6418 = vmatpush3.bf16.msra.mxu0 %v7908_v31 }
 0xc96   :  { %6419 = vmatprep.subr.bf16.mxu0 %v9580_v46 }
 0xc98   :  { %v3072_v4 = vpop.f32.mrb[26].mxu1 }
 0xc99   :  { %v3074_v56 = vpop.f32.mrb[27].mxu1  ;;  %6421 = vmatpush3.bf16.msra.mxu0 %v7912_v22 }
 0xc9a   :  { %6422 = vmatprep.subr.bf16.mxu0 %v9580_v46 }
 0xc9d   :  { %6424 = vmatpush3.bf16.msra.mxu0 %v7916_v48 }
 0xc9e   :  { %6425 = vmatprep.subr.bf16.mxu0 %v9580_v46 }
 0xca1   :  { %6427 = vmatpush3.bf16.msra.mxu0 %v10010_v1 }
 0xca2   :  { %6428 = vmatprep.subr.bf16.mxu0 %v9580_v46 }
 0xca5   :  { %6430 = vmatpush3.bf16.msra.mxu0 %v10011_v38 }
 0xca6   :  { %6496 = vmatprep.subr.bf16.mxu0 %v10012_v30 }
 0xca8   :  { %4801 = vmatmul.mubr.f32.vlgmr.msra.gmra.mrb[50].mxu0 %v8757_v0 }
 0xca9   :  { %6498 = vmatpush1.bf16.msra.mxu0 %v10013_v5  ;;  %v10045_v5 = vld [vmem:[#allocation139_spill] sm:$0xff] }
 0xcaa   :  { %6500 = vmatprep.subr.bf16.mxu0 %v10014_v52  ;;  %v10025_v52 = vld [vmem:[#allocation38_spill] sm:$0xff] }
 0xcad   :  { %6502 = vmatpush1.bf16.msra.mxu0 %v10015_v53  ;;  %v10026_v53 = vld [vmem:[#allocation39_spill] sm:$0xff] }
 0xcae   :  { %6504 = vmatprep.subr.bf16.mxu0 %v10016_v14  ;;  %v10027_v14 = vld [vmem:[#allocation42_spill] sm:$0xff] }
 0xcb1   :  { %6506 = vmatpush1.bf16.msra.mxu0 %v10017_v18  ;;  %v10028_v18 = vld [vmem:[#allocation43_spill] sm:$0xff] }
 0xcb2   :  { %6508 = vmatprep.subr.bf16.mxu0 %v10018_v19  ;;  %v10029_v19 = vld [vmem:[#allocation46_spill] sm:$0xff] }
 0xcb5   :  { %6510 = vmatpush1.bf16.msra.mxu0 %v10019_v15  ;;  %v10030_v15 = vld [vmem:[#allocation47_spill] sm:$0xff] }
 0xcb6   :  { %6512 = vmatprep.subr.bf16.mxu0 %v10020_v47  ;;  %v10031_v47 = vld [vmem:[#allocation50_spill] sm:$0xff] }
 0xcb9   :  { %6514 = vmatpush1.bf16.msra.mxu0 %v10021_v10  ;;  %v10032_v10 = vld [vmem:[#allocation51_spill] sm:$0xff] }
 0xcba   :  { %6516 = vmatprep.subr.bf16.mxu0 %v10022_v9  ;;  %v10033_v9 = vld [vmem:[#allocation54_spill] sm:$0xff] }
 0xcbd   :  { %6518 = vmatpush1.bf16.msra.mxu0 %v10023_v42  ;;  %v10034_v42 = vld [vmem:[#allocation55_spill] sm:$0xff] }
 0xcbe   :  { %6520 = vmatprep.subr.bf16.mxu0 %v10024_v40  ;;  %v10035_v40 = vld [vmem:[#allocation58_spill] sm:$0xff] }
 0xcc1   :  { %6522 = vmatpush1.bf16.msra.mxu0 %v10025_v52  ;;  %v10036_v52 = vld [vmem:[#allocation59_spill] sm:$0xff] }
 0xcc2   :  { %6524 = vmatprep.subr.bf16.mxu0 %v10026_v53  ;;  %v10037_v53 = vld [vmem:[#allocation62_spill] sm:$0xff] }
 0xcc5   :  { %6526 = vmatpush1.bf16.msra.mxu0 %v10027_v14  ;;  %v10038_v14 = vld [vmem:[#allocation63_spill] sm:$0xff] }
 0xcc6   :  { %6528 = vmatprep.subr.bf16.mxu0 %v10028_v18  ;;  %v10039_v18 = vld [vmem:[#allocation66_spill] sm:$0xff] }
 0xcc9   :  { %6530 = vmatpush1.bf16.msra.mxu0 %v10029_v19  ;;  %v10040_v19 = vld [vmem:[#allocation67_spill] sm:$0xff] }
 0xcca   :  { %6532 = vmatprep.subr.bf16.mxu0 %v10030_v15  ;;  %v10041_v15 = vld [vmem:[#allocation70_spill] sm:$0xff] }
 0xccd   :  { %6534 = vmatpush1.bf16.msra.mxu0 %v10031_v47  ;;  %v10042_v47 = vld [vmem:[#allocation71_spill] sm:$0xff] }
 0xcce   :  { %6536 = vmatprep.subr.bf16.mxu0 %v10032_v10  ;;  %v10043_v10 = vld [vmem:[#allocation73_spill] sm:$0xff] }
 0xcd1   :  { %6538 = vmatpush1.bf16.msra.mxu0 %v10033_v9  ;;  %v10044_v9 = vld [vmem:[#allocation89_spill] sm:$0xff] }
 0xcd2   :  { %6540 = vmatprep.subr.bf16.mxu0 %v10034_v42 }
 0xcd5   :  { %6542 = vmatpush1.bf16.msra.mxu0 %v10035_v40 }
 0xcd6   :  { %6544 = vmatprep.subr.bf16.mxu0 %v10036_v52 }
 0xcd9   :  { %6546 = vmatpush1.bf16.msra.mxu0 %v10037_v53 }
 0xcda   :  { %6548 = vmatprep.subr.bf16.mxu0 %v10038_v14 }
 0xcdd   :  { %6550 = vmatpush1.bf16.msra.mxu0 %v10039_v18 }
 0xcde   :  { %6552 = vmatprep.subr.bf16.mxu0 %v10040_v19 }
 0xce1   :  { %6554 = vmatpush1.bf16.msra.mxu0 %v10041_v15 }
 0xce2   :  { %6556 = vmatprep.subr.bf16.mxu0 %v10042_v47 }
 0xce5   :  { %6558 = vmatpush1.bf16.msra.mxu0 %v10043_v10  ;;  %v3254_v10 = vadd.f32 %v8488_v36, %v3074_v56  ;;  %v10049_v56 = vld [vmem:[#allocation98_spill] sm:$0xff] }
 0xce6   :  { %6624 = vmatprep.subr.bf16.mxu0 %v10044_v9 }
 0xd5b   :  { %v3165_v42 = vpop.f32.mrb[48].mxu0 }
 0xd5c   :  { %v3166_v40 = vadd.f32 %v3165_v42, %v9955_v24  ;;  %v3167_v52 = vpop.f32.mrb[49].mxu0 }
 0xd5d   :  { %v3168_v53 = vadd.f32 %v3167_v52, %v10045_v5 }
 0xd5e   :  { %v3240_v14 = vadd.f32 %v3166_v40, %v8751_v63  ;;  %v10057_v40 = vld [vmem:[#allocation114_spill] sm:$0xff] }
 0xd5f   :  { %v3241_v30 = vadd.f32 %v3168_v53, %v3072_v4 }
 0xd60   :  { %v4349_v18 = vmul.f32 -1.442695, %v3240_v14 }
 0xd61   :  { %v4350_v19 = vmul.f32 -1.442695, %v3241_v30 }
 0xd62   :  { %7110 = vpow2.f32 %v4349_v18 }
 0xd63   :  { %7112 = vpow2.f32 %v4350_v19  ;;  %v10052_v19 = vld [vmem:[#allocation104_spill] sm:$0xff] }
 0xd6c   :  { %v7111_v15 = vpop.eup %7110 }
 0xd6d   :  { %v3248_v38 = vadd.f32 1.0, %v7111_v15  ;;  %v7113_v47 = vpop.eup %7112  ;;  %v10053_v15 = vld [vmem:[#allocation106_spill] sm:$0xff] }
 0xd6e   :  { %v3249_v9 = vadd.f32 1.0, %v7113_v47  ;;  %v10054_v47 = vld [vmem:[#allocation108_spill] sm:$0xff] }
 0xd6f   :  { %7114 = vrcp.f32 %v3248_v38 }
 0xd70   :  { %7116 = vrcp.f32 %v3249_v9  ;;  %v10056_v9 = vld [vmem:[#allocation112_spill] sm:$0xff] }
 0xd79   :  { %v7115_v1 = vpop.eup %7114 }
 0xd7a   :  { %v3255_v48 = vmul.f32 %v7115_v1, %v3254_v10  ;;  %v7117_v4 = vpop.eup %7116  ;;  %v10050_v1 = vld [vmem:[#allocation100_spill] sm:$0xff]  ;;  %v10055_v10 = vld [vmem:[#allocation110_spill] sm:$0xff] }
 0xd7b   :  { %v3236_v42 = vpop.f32.mrb[50].mxu0  ;;  %v3258_v53 = vsub.f32 1.0, %v7117_v4  ;;  %v3260_v18 = vmul.f32 %v7117_v4, %v8657_v55  ;;  %v10061_v4 = vld [vmem:[#allocation121_spill] sm:$0xff] }
 0xd7c   :  { %v3237_v52 = vadd.f32 %v3236_v42, %v7984_v20  ;;  %v4802_v5 = vpop.f32.mrb[51].mxu0  ;;  %v10058_v42 = vld [vmem:[#allocation116_spill] sm:$0xff] }
 0xd7d   :  { %v10051_v5 = vld [vmem:[#allocation102_spill] sm:$0xff] }
 0xd7e   :  { %v3256_v63 = vadd.f32 %v3255_v48, %v3237_v52  ;;  %v8825_v48 = vsel %vm4351_vm7, %v8757_v0, %v8663_v13  ;;  %v10047_v13 = vld [vmem:[#allocation94_spill] sm:$0xff]  ;;  %v10048_v0 = vld [vmem:[#allocation96_spill] sm:$0xff] }
 0xd7f   :  { %v10059_v52 = vld [vmem:[#allocation118_spill] sm:$0xff] }
 0xd80   :  { %7118 = vtanh.f32 %v3256_v63  ;;  %v10060_v63 = vld [vmem:[#allocation120_spill] sm:$0xff] }
 0xd8a   :  { %v7119_v30 = vpop.eup %7118 }
 0xd8b   :  { %v3259_v14 = vmul.f32 %v7119_v30, %v3258_v53  ;;  %v10062_v53 = vld [vmem:[#allocation10_spill] sm:$0xff]  ;;  %v10063_v30 = vld [vmem:[#allocation12_spill] sm:$0xff] }
 0xd8d   :  { %v3261_v38 = vadd.f32 %v3260_v18, %v3259_v14  ;;  %v10064_v14 = vld [vmem:[#allocation13_spill] sm:$0xff]  ;;  %v10065_v18 = vld [vmem:[#allocation16_spill] sm:$0xff] }
 0xd8f   :  { %v8819_v36 = vsel %vm4351_vm7, %v3261_v38, %v8657_v55  ;;  %v10046_v55 = vld [vmem:[#allocation119_spill] sm:$0xff]  ;;  %v10066_v38 = vld [vmem:[#allocation17_spill] sm:$0xff] }
 0xd90   :  { %3337 = vmatprep.mubr.f32.mxu1 %v8819_v36  ;;  %3408 = vmatprep.mubr.f32.mxu0 %v8819_v36 }
 0xd91   :  { %3338 = vmatmul.mubr.f32.vlgmr.msra.gmra.mrb[12].mxu1 %v8825_v48  ;;  %3409 = vmatmul.mubr.f32.vlgmr.msra.gmra.mrb[52].mxu0 %v8825_v48 }
 0xd92   :  { %6562 = vmatpush1.bf16.msra.mxu1 %v9611_v44  ;;  %3479 = vmatprep.mubr.f32.mxu1 %v8819_v36 }
 0xd93   :  { %6564 = vmatprep.subr.bf16.mxu1 %v9612_v45  ;;  %6626 = vmatpush1.bf16.msra.mxu0 %v9613_v23 }
 0xd94   :  { %6628 = vmatprep.subr.bf16.mxu0 %v9614_v50  ;;  %3572 = vmatprep.mubr.f32.mxu0 %v9521_v61 }
 0xd96   :  { %6566 = vmatpush1.bf16.msra.mxu1 %v9615_v26 }
 0xd97   :  { %6568 = vmatprep.subr.bf16.mxu1 %v9696_v33  ;;  %6630 = vmatpush1.bf16.msra.mxu0 %v9697_v16 }
 0xd98   :  { %6632 = vmatprep.subr.bf16.mxu0 %v9698_v27 }
 0xd9a   :  { %6570 = vmatpush1.bf16.msra.mxu1 %v9699_v29 }
 0xd9b   :  { %6572 = vmatprep.subr.bf16.mxu1 %v9700_v34  ;;  %6634 = vmatpush1.bf16.msra.mxu0 %v9701_v49 }
 0xd9c   :  { %6636 = vmatprep.subr.bf16.mxu0 %v9702_v54 }
 0xd9e   :  { %6574 = vmatpush1.bf16.msra.mxu1 %v9623_v62 }
 0xd9f   :  { %6576 = vmatprep.subr.bf16.mxu1 %v9703_v59  ;;  %6638 = vmatpush1.bf16.msra.mxu0 %v9704_v32 }
 0xda0   :  { %6640 = vmatprep.subr.bf16.mxu0 %v9783_v17 }
 0xda2   :  { %6578 = vmatpush1.bf16.msra.mxu1 %v9784_v28 }
 0xda3   :  { %6580 = vmatprep.subr.bf16.mxu1 %v9785_v21  ;;  %6642 = vmatpush1.bf16.msra.mxu0 %v9786_v43 }
 0xda4   :  { %6644 = vmatprep.subr.bf16.mxu0 %v9787_v6 }
 0xda6   :  { %6582 = vmatpush1.bf16.msra.mxu1 %v9708_v7 }
 0xda7   :  { %6584 = vmatprep.subr.bf16.mxu1 %v9709_v58  ;;  %6646 = vmatpush1.bf16.msra.mxu0 %v9710_v51 }
 0xda8   :  { %6648 = vmatprep.subr.bf16.mxu0 %v9711_v2 }
 0xdaa   :  { %6586 = vmatpush1.bf16.msra.mxu1 %v9712_v3 }
 0xdab   :  { %6588 = vmatprep.subr.bf16.mxu1 %v9713_v37  ;;  %6650 = vmatpush1.bf16.msra.mxu0 %v9714_v8 }
 0xdac   :  { %6652 = vmatprep.subr.bf16.mxu0 %v9715_v60 }
 0xdae   :  { %6590 = vmatpush1.bf16.msra.mxu1 %v9957_v11 }
 0xdaf   :  { %6592 = vmatprep.subr.bf16.mxu1 %v9958_v57  ;;  %6654 = vmatpush1.bf16.msra.mxu0 %v10046_v55 }
 0xdb0   :  { %6655 = vmatprep.subr.bf16.mxu0 %v9580_v46 }
 0xdb2   :  { %6594 = vmatpush1.bf16.msra.mxu1 %v10047_v13 }
 0xdb3   :  { %6596 = vmatprep.subr.bf16.mxu1 %v10048_v0 }
 0xdb6   :  { %6598 = vmatpush1.bf16.msra.mxu1 %v10049_v56 }
 0xdb7   :  { %6600 = vmatprep.subr.bf16.mxu1 %v10050_v1 }
 0xdba   :  { %6602 = vmatpush1.bf16.msra.mxu1 %v10051_v5 }
 0xdbb   :  { %6604 = vmatprep.subr.bf16.mxu1 %v10052_v19 }
 0xdbe   :  { %6606 = vmatpush1.bf16.msra.mxu1 %v10053_v15 }
 0xdbf   :  { %6608 = vmatprep.subr.bf16.mxu1 %v10054_v47 }
 0xdc2   :  { %6610 = vmatpush1.bf16.msra.mxu1 %v10055_v10  ;;  %v10095_v10 = vld [vmem:[#allocation129_spill] sm:$0xff] }
 0xdc3   :  { %6612 = vmatprep.subr.bf16.mxu1 %v10056_v9  ;;  %v10073_v9 = vld [vmem:[#allocation32_spill] sm:$0xff] }
 0xdc6   :  { %6614 = vmatpush1.bf16.msra.mxu1 %v10057_v40  ;;  %v10067_v40 = vld [vmem:[#allocation20_spill] sm:$0xff] }
 0xdc7   :  { %6616 = vmatprep.subr.bf16.mxu1 %v10058_v42  ;;  %v10068_v42 = vld [vmem:[#allocation21_spill] sm:$0xff] }
 0xdca   :  { %6618 = vmatpush1.bf16.msra.mxu1 %v10059_v52  ;;  %v10069_v52 = vld [vmem:[#allocation24_spill] sm:$0xff] }
 0xdcb   :  { %6620 = vmatprep.subr.bf16.mxu1 %v10060_v63  ;;  %v10070_v63 = vld [vmem:[#allocation25_spill] sm:$0xff] }
 0xdce   :  { %6622 = vmatpush1.bf16.msra.mxu1 %v10061_v4  ;;  %v10071_v4 = vld [vmem:[#allocation28_spill] sm:$0xff] }
 0xdcf   :  { %6680 = vmatprep.subr.bf16.mxu1 %v10062_v53  ;;  %v10072_v53 = vld [vmem:[#allocation29_spill] sm:$0xff] }
 0xdd1   :  { %3480 = vmatmul.mubr.f32.vlgmr.msra.gmra.mrb[28].mxu1 %v8825_v48 }
 0xdd2   :  { %6682 = vmatpush1.bf16.msra.mxu1 %v10063_v30  ;;  %v10074_v30 = vld [vmem:[#allocation33_spill] sm:$0xff] }
 0xdd3   :  { %6684 = vmatprep.subr.bf16.mxu1 %v10064_v14  ;;  %v10075_v14 = vld [vmem:[#allocation36_spill] sm:$0xff] }
 0xdd6   :  { %6686 = vmatpush1.bf16.msra.mxu1 %v10065_v18  ;;  %v10076_v18 = vld [vmem:[#allocation37_spill] sm:$0xff] }
 0xdd7   :  { %6688 = vmatprep.subr.bf16.mxu1 %v10066_v38  ;;  %v10077_v38 = vld [vmem:[#allocation40_spill] sm:$0xff] }
 0xdda   :  { %6690 = vmatpush1.bf16.msra.mxu1 %v10067_v40  ;;  %v10078_v40 = vld [vmem:[#allocation41_spill] sm:$0xff] }
 0xddb   :  { %6692 = vmatprep.subr.bf16.mxu1 %v10068_v42  ;;  %v10079_v42 = vld [vmem:[#allocation44_spill] sm:$0xff] }
 0xdde   :  { %6694 = vmatpush1.bf16.msra.mxu1 %v10069_v52  ;;  %v10080_v52 = vld [vmem:[#allocation45_spill] sm:$0xff] }
 0xddf   :  { %6696 = vmatprep.subr.bf16.mxu1 %v10070_v63  ;;  %v10081_v63 = vld [vmem:[#allocation48_spill] sm:$0xff] }
 0xde2   :  { %6698 = vmatpush1.bf16.msra.mxu1 %v10071_v4  ;;  %v10082_v4 = vld [vmem:[#allocation49_spill] sm:$0xff] }
 0xde3   :  { %6700 = vmatprep.subr.bf16.mxu1 %v10072_v53  ;;  %v10083_v53 = vld [vmem:[#allocation52_spill] sm:$0xff] }
 0xde6   :  { %6702 = vmatpush1.bf16.msra.mxu1 %v10073_v9  ;;  %v10084_v9 = vld [vmem:[#allocation53_spill] sm:$0xff] }
 0xde7   :  { %6704 = vmatprep.subr.bf16.mxu1 %v10074_v30  ;;  %v10085_v30 = vld [vmem:[#allocation56_spill] sm:$0xff] }
 0xdea   :  { %6706 = vmatpush1.bf16.msra.mxu1 %v10075_v14  ;;  %v10086_v14 = vld [vmem:[#allocation57_spill] sm:$0xff] }
 0xdeb   :  { %6708 = vmatprep.subr.bf16.mxu1 %v10076_v18  ;;  %v10087_v18 = vld [vmem:[#allocation60_spill] sm:$0xff] }
 0xdee   :  { %6710 = vmatpush1.bf16.msra.mxu1 %v10077_v38  ;;  %v10088_v38 = vld [vmem:[#allocation61_spill] sm:$0xff] }
 0xdef   :  { %6712 = vmatprep.subr.bf16.mxu1 %v10078_v40  ;;  %v10089_v40 = vld [vmem:[#allocation64_spill] sm:$0xff] }
 0xdf2   :  { %6714 = vmatpush1.bf16.msra.mxu1 %v10079_v42  ;;  %v10090_v42 = vld [vmem:[#allocation65_spill] sm:$0xff] }
 0xdf3   :  { %6716 = vmatprep.subr.bf16.mxu1 %v10080_v52  ;;  %v10091_v52 = vld [vmem:[#allocation68_spill] sm:$0xff] }
 0xdf6   :  { %6718 = vmatpush1.bf16.msra.mxu1 %v10081_v63  ;;  %v10092_v63 = vld [vmem:[#allocation69_spill] sm:$0xff] }
 0xdf7   :  { %6720 = vmatprep.subr.bf16.mxu1 %v10082_v4  ;;  %v10093_v4 = vld [vmem:[#allocation72_spill] sm:$0xff] }
 0xdfa   :  { %6722 = vmatpush1.bf16.msra.mxu1 %v10083_v53  ;;  %v10094_v53 = vld [vmem:[#allocation74_spill] sm:$0xff] }
 0xdfb   :  { %6724 = vmatprep.subr.bf16.mxu1 %v10084_v9 }
 0xdfe   :  { %6726 = vmatpush1.bf16.msra.mxu1 %v10085_v30 }
 0xdff   :  { %6728 = vmatprep.subr.bf16.mxu1 %v10086_v14 }
 0xe02   :  { %6730 = vmatpush1.bf16.msra.mxu1 %v10087_v18 }
 0xe03   :  { %6732 = vmatprep.subr.bf16.mxu1 %v10088_v38 }
 0xe06   :  { %6734 = vmatpush1.bf16.msra.mxu1 %v10089_v40 }
 0xe07   :  { %6736 = vmatprep.subr.bf16.mxu1 %v10090_v42 }
 0xe0a   :  { %6738 = vmatpush1.bf16.msra.mxu1 %v10091_v52 }
 0xe0b   :  { %6740 = vmatprep.subr.bf16.mxu1 %v10092_v63 }
 0xe0e   :  { %6742 = vmatpush1.bf16.msra.mxu1 %v10093_v4 }
 0xe0f   :  { %6808 = vmatprep.subr.bf16.mxu1 %v10094_v53  ;;  %v8919_v53 = vld [vmem:[%s9180_s7] ss:$0 sm:$0xff] }
 0xe64   :  { %v3339_v9 = vpop.f32.mrb[12].mxu1  ;;  %v3410_v30 = vpop.f32.mrb[52].mxu0 }
 0xe65   :  { %v6969_v14 = vadd.f32 %v3339_v9, %v10095_v10  ;;  %v3341_v47 = vpop.f32.mrb[13].mxu1  ;;  %v8913_v18 = vpop.f32.mrb[53].mxu0  ;;  %v3500_v9 = vadd.f32 %v8919_v53, %v3410_v30  ;;  %v10097_v30 = vld [vmem:[#allocation135_spill] sm:$0xff] }
 0xe66   :  { %v6970_v40 = vadd.f32 %v3341_v47, %v9665_v41 }
 0xe67   :  { %v4352_v38 = vmul.f32 -1.442695, %v6969_v14  ;;  %v10096_v14 = vld [vmem:[#allocation128_spill] sm:$0xff] }
 0xe68   :  { %v4353_v42 = vmul.f32 -1.442695, %v6970_v40 }
 0xe69   :  { %7120 = vpow2.f32 %v4352_v38 }
 0xe6a   :  { %7122 = vpow2.f32 %v4353_v42 }
 0xe73   :  { %v7121_v52 = vpop.eup %7120 }
 0xe74   :  { %v3494_v15 = vadd.f32 1.0, %v7121_v52  ;;  %v7123_v63 = vpop.eup %7122 }
 0xe75   :  { %v3495_v4 = vadd.f32 1.0, %v7123_v63 }
 0xe76   :  { %7124 = vrcp.f32 %v3494_v15 }
 0xe77   :  { %7126 = vrcp.f32 %v3495_v4  ;;  %v10098_v4 = vld [vmem:[#allocation136_spill] sm:$0xff] }
 0xe80   :  { %v7125_v10 = vpop.eup %7124 }
 0xe81   :  { %v3501_v19 = vmul.f32 %v7125_v10, %v3500_v9  ;;  %v7127_v38 = vpop.eup %7126  ;;  %v10099_v9 = vld [vmem:[#allocation137_spill] sm:$0xff] }
 0xe82   :  { %v3504_v40 = vsub.f32 1.0, %v7127_v38  ;;  %v3506_v15 = vmul.f32 %v7127_v38, %v8825_v48  ;;  %v10102_v38 = vld [vmem:[#allocation15_spill] sm:$0xff] }
 0xe83   :  { %v3502_v47 = vadd.f32 %v3501_v19, %v10096_v14  ;;  %v10100_v14 = vld [vmem:[#allocation11_spill] sm:$0xff] }
 0xe85   :  { %7128 = vtanh.f32 %v3502_v47  ;;  %v10101_v47 = vld [vmem:[#allocation14_spill] sm:$0xff] }
 0xe8f   :  { %v7129_v42 = vpop.eup %7128 }
 0xe90   :  { %v3505_v52 = vmul.f32 %v7129_v42, %v3504_v40  ;;  %v10103_v40 = vld [vmem:[#allocation18_spill] sm:$0xff]  ;;  %v10104_v42 = vld [vmem:[#allocation19_spill] sm:$0xff] }
 0xe92   :  { %v8924_v63 = vadd.f32 %v3506_v15, %v3505_v52  ;;  %v10105_v52 = vld [vmem:[#allocation22_spill] sm:$0xff]  ;;  %v10106_v15 = vld [vmem:[#allocation23_spill] sm:$0xff] }
 0xe94   :  { %3573 = vmatmul.mubr.f32.vlgmr.msra.gmra.mrb[54].mxu0 %v8924_v63 }
 0xe95   :  { %6657 = vmatpush3.bf16.msra.mxu0 %v7892_v39  ;;  %4835 = vmatprep.mubr.msk.f32.mxu0 %vm7225_vm1, %v9521_v61 }
 0xe96   :  { %6658 = vmatprep.subr.bf16.mxu0 %v9580_v46 }
 0xe99   :  { %6660 = vmatpush3.bf16.msra.mxu0 %v7898_v12 }
 0xe9a   :  { %6661 = vmatprep.subr.bf16.mxu0 %v9580_v46 }
 0xe9d   :  { %6663 = vmatpush3.bf16.msra.mxu0 %v7904_v35 }
 0xe9e   :  { %6664 = vmatprep.subr.bf16.mxu0 %v9580_v46 }
 0xea1   :  { %6666 = vmatpush3.bf16.msra.mxu0 %v7908_v31  ;;  %v10133_v31 = vld [vmem:[#allocation139_spill] sm:$0xff] }
 0xea2   :  { %6667 = vmatprep.subr.bf16.mxu0 %v9580_v46 }
 0xea4   :  { %v3481_v19 = vpop.f32.mrb[28].mxu1 }
 0xea5   :  { %v3483_v10 = vpop.f32.mrb[29].mxu1  ;;  %6669 = vmatpush3.bf16.msra.mxu0 %v7912_v22  ;;  %v10111_v22 = vld [vmem:[#allocation34_spill] sm:$0xff] }
 0xea6   :  { %6670 = vmatprep.subr.bf16.mxu0 %v9580_v46 }
 0xea9   :  { %6672 = vmatpush3.bf16.msra.mxu0 %v10097_v30  ;;  %v10108_v30 = vld [vmem:[#allocation27_spill] sm:$0xff] }
 0xeaa   :  { %6673 = vmatprep.subr.bf16.mxu0 %v9580_v46 }
 0xead   :  { %6675 = vmatpush3.bf16.msra.mxu0 %v10098_v4  ;;  %v10107_v4 = vld [vmem:[#allocation26_spill] sm:$0xff] }
 0xeae   :  { %6676 = vmatprep.subr.bf16.mxu0 %v9580_v46 }
 0xeb1   :  { %6678 = vmatpush3.bf16.msra.mxu0 %v10099_v9  ;;  %v10109_v9 = vld [vmem:[#allocation30_spill] sm:$0xff] }
 0xeb2   :  { %6744 = vmatprep.subr.bf16.mxu0 %v10100_v14  ;;  %v10110_v14 = vld [vmem:[#allocation31_spill] sm:$0xff] }
 0xeb4   :  { %4836 = vmatmul.mubr.f32.vlgmr.msra.gmra.mrb[56].mxu0 %v8924_v63 }
 0xeb5   :  { %6746 = vmatpush1.bf16.msra.mxu0 %v10101_v47  ;;  %v10112_v47 = vld [vmem:[#allocation35_spill] sm:$0xff] }
 0xeb6   :  { %6748 = vmatprep.subr.bf16.mxu0 %v10102_v38  ;;  %v10113_v38 = vld [vmem:[#allocation38_spill] sm:$0xff] }
 0xeb9   :  { %6750 = vmatpush1.bf16.msra.mxu0 %v10103_v40  ;;  %v10114_v40 = vld [vmem:[#allocation39_spill] sm:$0xff] }
 0xeba   :  { %6752 = vmatprep.subr.bf16.mxu0 %v10104_v42  ;;  %v10115_v42 = vld [vmem:[#allocation42_spill] sm:$0xff] }
 0xebd   :  { %6754 = vmatpush1.bf16.msra.mxu0 %v10105_v52  ;;  %v10116_v52 = vld [vmem:[#allocation43_spill] sm:$0xff] }
 0xebe   :  { %6756 = vmatprep.subr.bf16.mxu0 %v10106_v15  ;;  %v10117_v15 = vld [vmem:[#allocation46_spill] sm:$0xff] }
 0xec1   :  { %6758 = vmatpush1.bf16.msra.mxu0 %v10107_v4  ;;  %v10118_v4 = vld [vmem:[#allocation47_spill] sm:$0xff] }
 0xec2   :  { %6760 = vmatprep.subr.bf16.mxu0 %v10108_v30  ;;  %v10119_v30 = vld [vmem:[#allocation50_spill] sm:$0xff] }
 0xec5   :  { %6762 = vmatpush1.bf16.msra.mxu0 %v10109_v9  ;;  %v10120_v9 = vld [vmem:[#allocation51_spill] sm:$0xff] }
 0xec6   :  { %6764 = vmatprep.subr.bf16.mxu0 %v10110_v14  ;;  %v10121_v14 = vld [vmem:[#allocation54_spill] sm:$0xff] }
 0xec9   :  { %6766 = vmatpush1.bf16.msra.mxu0 %v10111_v22  ;;  %v10122_v22 = vld [vmem:[#allocation55_spill] sm:$0xff] }
 0xeca   :  { %6768 = vmatprep.subr.bf16.mxu0 %v10112_v47  ;;  %v10123_v47 = vld [vmem:[#allocation58_spill] sm:$0xff] }
 0xecd   :  { %6770 = vmatpush1.bf16.msra.mxu0 %v10113_v38  ;;  %v10124_v38 = vld [vmem:[#allocation59_spill] sm:$0xff] }
 0xece   :  { %6772 = vmatprep.subr.bf16.mxu0 %v10114_v40  ;;  %v10125_v40 = vld [vmem:[#allocation62_spill] sm:$0xff] }
 0xed1   :  { %6774 = vmatpush1.bf16.msra.mxu0 %v10115_v42  ;;  %v10126_v42 = vld [vmem:[#allocation63_spill] sm:$0xff] }
 0xed2   :  { %6776 = vmatprep.subr.bf16.mxu0 %v10116_v52  ;;  %v10127_v52 = vld [vmem:[#allocation66_spill] sm:$0xff] }
 0xed5   :  { %6778 = vmatpush1.bf16.msra.mxu0 %v10117_v15  ;;  %v10128_v15 = vld [vmem:[#allocation67_spill] sm:$0xff] }
 0xed6   :  { %6780 = vmatprep.subr.bf16.mxu0 %v10118_v4  ;;  %v10129_v4 = vld [vmem:[#allocation70_spill] sm:$0xff] }
 0xed9   :  { %6782 = vmatpush1.bf16.msra.mxu0 %v10119_v30  ;;  %v10130_v30 = vld [vmem:[#allocation71_spill] sm:$0xff] }
 0xeda   :  { %6784 = vmatprep.subr.bf16.mxu0 %v10120_v9  ;;  %v10131_v9 = vld [vmem:[#allocation73_spill] sm:$0xff] }
 0xedd   :  { %6786 = vmatpush1.bf16.msra.mxu0 %v10121_v14  ;;  %v10132_v14 = vld [vmem:[#allocation89_spill] sm:$0xff] }
 0xede   :  { %6788 = vmatprep.subr.bf16.mxu0 %v10122_v22 }
 0xee1   :  { %6790 = vmatpush1.bf16.msra.mxu0 %v10123_v47 }
 0xee2   :  { %6792 = vmatprep.subr.bf16.mxu0 %v10124_v38 }
 0xee5   :  { %6794 = vmatpush1.bf16.msra.mxu0 %v10125_v40 }
 0xee6   :  { %6796 = vmatprep.subr.bf16.mxu0 %v10126_v42 }
 0xee9   :  { %6798 = vmatpush1.bf16.msra.mxu0 %v10127_v52 }
 0xeea   :  { %6800 = vmatprep.subr.bf16.mxu0 %v10128_v15 }
 0xeed   :  { %6802 = vmatpush1.bf16.msra.mxu0 %v10129_v4 }
 0xeee   :  { %6804 = vmatprep.subr.bf16.mxu0 %v10130_v30 }
 0xef1   :  { %6806 = vmatpush1.bf16.msra.mxu0 %v10131_v9  ;;  %v8984_v9 = vld [vmem:[%s9183_s10] ss:$0 sm:$0xff] }
 0xef2   :  { %6872 = vmatprep.subr.bf16.mxu0 %v10132_v14  ;;  %v3663_v14 = vadd.f32 %v8984_v9, %v3483_v10 }
 0xf67   :  { %v3574_v22 = vpop.f32.mrb[54].mxu0 }
 0xf68   :  { %v3575_v47 = vadd.f32 %v3574_v22, %v9955_v24  ;;  %v3576_v38 = vpop.f32.mrb[55].mxu0 }
 0xf69   :  { %v3577_v40 = vadd.f32 %v3576_v38, %v10133_v31 }
 0xf6a   :  { %v3649_v42 = vadd.f32 %v3575_v47, %v8913_v18 }
 0xf6b   :  { %v3650_v35 = vadd.f32 %v3577_v40, %v3481_v19 }
 0xf6c   :  { %v4354_v52 = vmul.f32 -1.442695, %v3649_v42 }
 0xf6d   :  { %v4355_v15 = vmul.f32 -1.442695, %v3650_v35 }
 0xf6e   :  { %7130 = vpow2.f32 %v4354_v52 }
 0xf6f   :  { %7132 = vpow2.f32 %v4355_v15 }
 0xf78   :  { %v7131_v4 = vpop.eup %7130 }
 0xf79   :  { %v3657_v12 = vadd.f32 1.0, %v7131_v4  ;;  %v7133_v30 = vpop.eup %7132 }
 0xf7a   :  { %v3658_v22 = vadd.f32 1.0, %v7133_v30  ;;  %v10152_v30 = vld [vmem:[#allocation137_spill] sm:$0xff] }
 0xf7b   :  { %7134 = vrcp.f32 %v3657_v12 }
 0xf7c   :  { %7136 = vrcp.f32 %v3658_v22  ;;  %v4091_v22 = vld [vmem:[%s9184_s11 + $0x8] sm:$0xff] }
 0xf85   :  { %v7135_v38 = vpop.eup %7134 }
 0xf86   :  { %v3664_v31 = vmul.f32 %v7135_v38, %v3663_v14  ;;  %v7137_v40 = vpop.eup %7136  ;;  %v4090_v14 = vld [vmem:[%s9184_s11] sm:$0xff] }
 0xf87   :  { %v3645_v18 = vpop.f32.mrb[56].mxu0  ;;  %v3667_v12 = vsub.f32 1.0, %v7137_v40  ;;  %v3669_v15 = vmul.f32 %v7137_v40, %v8819_v36  ;;  %v6928_v38 = vpack.c.bf16 %v4091_v22, %v4090_v14 }
 0xf88   :  { %v3646_v19 = vadd.f32 %v3645_v18, %v7984_v20  ;;  %v4837_v35 = vpop.f32.mrb[57].mxu0  ;;  %v4092_v18 = vld [vmem:[%s9184_s11 + $0x10] sm:$0xff] }
 0xf8a   :  { %v3665_v47 = vadd.f32 %v3664_v31, %v3646_v19  ;;  %v8997_v31 = vsel %vm4356_vm8, %v8924_v63, %v8825_v48  ;;  %v10151_v63 = vld [vmem:[#allocation136_spill] sm:$0xff]  ;;  %v4093_v19 = vld [vmem:[%s9184_s11 + $0x18] sm:$0xff] }
 0xf8b   :  { %v6931_v35 = vpack.c.bf16 %v4093_v19, %v4092_v18 }
 0xf8c   :  { %7138 = vtanh.f32 %v3665_v47  ;;  %v4095_v47 = vld [vmem:[%s9184_s11 + $0x28] sm:$0xff] }
 0xf96   :  { %v7139_v42 = vpop.eup %7138 }
 0xf97   :  { %v3668_v52 = vmul.f32 %v7139_v42, %v3667_v12  ;;  %v4096_v12 = vld [vmem:[%s9184_s11 + $0x30] sm:$0xff]  ;;  %v4097_v42 = vld [vmem:[%s9184_s11 + $0x38] sm:$0xff] }
 0xf99   :  { %v3670_v4 = vadd.f32 %v3669_v15, %v3668_v52  ;;  %v6937_v52 = vpack.c.bf16 %v4097_v42, %v4096_v12  ;;  %v4098_v15 = vld [vmem:[%s9184_s11 + $0x40] sm:$0xff] }
 0xf9b   :  { %v8991_v10 = vsel %vm4356_vm8, %v3670_v4, %v8819_v36  ;;  %v4099_v4 = vld [vmem:[%s9184_s11 + $0x48] sm:$0xff] }
 0xf9c   :  { %3746 = vmatprep.mubr.f32.mxu1 %v8991_v10  ;;  %3817 = vmatprep.mubr.f32.mxu0 %v8991_v10 }
 0xf9d   :  { %3747 = vmatmul.mubr.f32.vlgmr.msra.gmra.mrb[14].mxu1 %v8997_v31  ;;  %3818 = vmatmul.mubr.f32.vlgmr.msra.gmra.mrb[58].mxu0 %v8997_v31 }
 0xf9e   :  { %6810 = vmatpush1.bf16.msra.mxu1 %v9611_v44  ;;  %3888 = vmatprep.mubr.f32.mxu1 %v8991_v10  ;;  %v10134_v44 = vld [vmem:[#allocation104_spill] sm:$0xff] }
 0xf9f   :  { %6812 = vmatprep.subr.bf16.mxu1 %v9612_v45  ;;  %6874 = vmatpush1.bf16.msra.mxu0 %v9613_v23  ;;  %v10135_v45 = vld [vmem:[#allocation106_spill] sm:$0xff]  ;;  %v10136_v23 = vld [vmem:[#allocation108_spill] sm:$0xff] }
 0xfa0   :  { %6876 = vmatprep.subr.bf16.mxu0 %v9614_v50  ;;  %3981 = vmatprep.mubr.f32.mxu0 %v9521_v61  ;;  %v10137_v50 = vld [vmem:[#allocation110_spill] sm:$0xff] }
 0xfa2   :  { %6814 = vmatpush1.bf16.msra.mxu1 %v9615_v26  ;;  %v10138_v26 = vld [vmem:[#allocation112_spill] sm:$0xff] }
 0xfa3   :  { %6816 = vmatprep.subr.bf16.mxu1 %v9696_v33  ;;  %6878 = vmatpush1.bf16.msra.mxu0 %v9697_v16  ;;  %v10141_v33 = vld [vmem:[#allocation118_spill] sm:$0xff]  ;;  %v10142_v16 = vld [vmem:[#allocation120_spill] sm:$0xff] }
 0xfa4   :  { %6880 = vmatprep.subr.bf16.mxu0 %v9698_v27  ;;  %v10143_v27 = vld [vmem:[#allocation121_spill] sm:$0xff] }
 0xfa6   :  { %6818 = vmatpush1.bf16.msra.mxu1 %v9699_v29 }
 0xfa7   :  { %6820 = vmatprep.subr.bf16.mxu1 %v9700_v34  ;;  %6882 = vmatpush1.bf16.msra.mxu0 %v9701_v49  ;;  %v10144_v49 = vld [vmem:[#allocation129_spill] sm:$0xff] }
 0xfa8   :  { %6884 = vmatprep.subr.bf16.mxu0 %v9702_v54 }
 0xfaa   :  { %6822 = vmatpush1.bf16.msra.mxu1 %v9623_v62  ;;  %v10140_v62 = vld [vmem:[#allocation116_spill] sm:$0xff] }
 0xfab   :  { %6824 = vmatprep.subr.bf16.mxu1 %v9703_v59  ;;  %6886 = vmatpush1.bf16.msra.mxu0 %v9704_v32 }
 0xfac   :  { %6888 = vmatprep.subr.bf16.mxu0 %v9783_v17 }
 0xfae   :  { %6826 = vmatpush1.bf16.msra.mxu1 %v9784_v28 }
 0xfaf   :  { %6828 = vmatprep.subr.bf16.mxu1 %v9785_v21  ;;  %6890 = vmatpush1.bf16.msra.mxu0 %v9786_v43  ;;  %v10145_v43 = vld [vmem:[#allocation127_spill] sm:$0xff] }
 0xfb0   :  { %6892 = vmatprep.subr.bf16.mxu0 %v9787_v6 }
 0xfb2   :  { %6830 = vmatpush1.bf16.msra.mxu1 %v9708_v7 }
 0xfb3   :  { %6832 = vmatprep.subr.bf16.mxu1 %v9709_v58  ;;  %6894 = vmatpush1.bf16.msra.mxu0 %v9710_v51 }
 0xfb4   :  { %6896 = vmatprep.subr.bf16.mxu0 %v9711_v2 }
 0xfb6   :  { %6834 = vmatpush1.bf16.msra.mxu1 %v9712_v3 }
 0xfb7   :  { %6836 = vmatprep.subr.bf16.mxu1 %v9713_v37  ;;  %6898 = vmatpush1.bf16.msra.mxu0 %v9714_v8 }
 0xfb8   :  { %6900 = vmatprep.subr.bf16.mxu0 %v9715_v60  ;;  %v10139_v60 = vld [vmem:[#allocation114_spill] sm:$0xff] }
 0xfba   :  { %6838 = vmatpush1.bf16.msra.mxu1 %v9957_v11 }
 0xfbb   :  { %6840 = vmatprep.subr.bf16.mxu1 %v9958_v57  ;;  %6902 = vmatpush1.bf16.msra.mxu0 %v10046_v55 }
 0xfbc   :  { %6903 = vmatprep.subr.bf16.mxu0 %v9580_v46 }
 0xfbe   :  { %6842 = vmatpush1.bf16.msra.mxu1 %v10047_v13  ;;  %v10146_v13 = vld [vmem:[#allocation131_spill] sm:$0xff] }
 0xfbf   :  { %6844 = vmatprep.subr.bf16.mxu1 %v10048_v0  ;;  %v10147_v0 = vld [vmem:[#allocation132_spill] sm:$0xff] }
 0xfc2   :  { %6846 = vmatpush1.bf16.msra.mxu1 %v10049_v56  ;;  %v10148_v56 = vld [vmem:[#allocation133_spill] sm:$0xff] }
 0xfc3   :  { %6848 = vmatprep.subr.bf16.mxu1 %v10050_v1 }
 0xfc6   :  { %6850 = vmatpush1.bf16.msra.mxu1 %v10051_v5 }
 0xfc7   :  { %6852 = vmatprep.subr.bf16.mxu1 %v10134_v44  ;;  %v4100_v44 = vld [vmem:[%s9184_s11 + $0x50] sm:$0xff] }
 0xfca   :  { %6854 = vmatpush1.bf16.msra.mxu1 %v10135_v45  ;;  %v4101_v45 = vld [vmem:[%s9184_s11 + $0x58] sm:$0xff] }
 0xfcb   :  { %6856 = vmatprep.subr.bf16.mxu1 %v10136_v23  ;;  %v6943_v23 = vpack.c.bf16 %v4101_v45, %v4100_v44 }
 0xfce   :  { %6858 = vmatpush1.bf16.msra.mxu1 %v10137_v50  ;;  %v4102_v50 = vld [vmem:[%s9184_s11 + $0x60] sm:$0xff] }
 0xfcf   :  { %6860 = vmatprep.subr.bf16.mxu1 %v10138_v26  ;;  %v4103_v26 = vld [vmem:[%s9184_s11 + $0x68] sm:$0xff] }
 0xfd2   :  { %6862 = vmatpush1.bf16.msra.mxu1 %v10139_v60  ;;  %v6946_v60 = vpack.c.bf16 %v4103_v26, %v4102_v50 }
 0xfd3   :  { %6864 = vmatprep.subr.bf16.mxu1 %v10140_v62  ;;  %v4104_v62 = vld [vmem:[%s9184_s11 + $0x70] sm:$0xff] }
 0xfd6   :  { %6866 = vmatpush1.bf16.msra.mxu1 %v10141_v33  ;;  %v4105_v33 = vld [vmem:[%s9184_s11 + $0x78] sm:$0xff] }
 0xfd7   :  { %6868 = vmatprep.subr.bf16.mxu1 %v10142_v16  ;;  %v6949_v16 = vpack.c.bf16 %v4105_v33, %v4104_v62 }
 0xfda   :  { %6870 = vmatpush1.bf16.msra.mxu1 %v10143_v27  ;;  %v4184_v27 = vld [vmem:[%s9186_s13] sm:$0xff] }
 0xfdb   :  { %6927 = vmatprep.subr.bf16.mxu1 %v9580_v46 }
 0xfdd   :  { %3889 = vmatmul.mubr.f32.vlgmr.msra.gmra.mrb[30].mxu1 %v8997_v31 }
 0xfde   :  { %4905 = vmatprep.mubr.msk.f32.mxu1 %vm7225_vm1, %v9521_v61  ;;  %6929 = vmatpush3.bf16.msra.mxu1 %v6928_v38 }
 0xfdf   :  { %6930 = vmatprep.subr.bf16.mxu1 %v9580_v46 }
 0xfe2   :  { %6932 = vmatpush3.bf16.msra.mxu1 %v6931_v35 }
 0xfe3   :  { %6933 = vmatprep.subr.bf16.mxu1 %v9580_v46 }
0x1070   :  { %v3748_v29 = vpop.f32.mrb[14].mxu1  ;;  %v3819_v34 = vpop.f32.mrb[58].mxu0 }
0x1071   :  { %v6971_v54 = vadd.f32 %v3748_v29, %v10144_v49  ;;  %v3750_v59 = vpop.f32.mrb[15].mxu1  ;;  %v9055_v32 = vpop.f32.mrb[59].mxu0  ;;  %v3909_v17 = vadd.f32 %v8919_v53, %v3819_v34  ;;  %v10150_v53 = vld [vmem:[#allocation135_spill] sm:$0xff] }
0x1072   :  { %v6972_v7 = vadd.f32 %v3750_v59, %v9665_v41  ;;  %v4185_v29 = vld [vmem:[%s9186_s13 + $0x8] sm:$0xff] }
0x1073   :  { %v4357_v8 = vmul.f32 -1.442695, %v6971_v54  ;;  %v6952_v34 = vpack.c.bf16 %v4185_v29, %v4184_v27 }
0x1074   :  { %v4358_v58 = vmul.f32 -1.442695, %v6972_v7 }
0x1075   :  { %7140 = vpow2.f32 %v4357_v8  ;;  %v10153_v8 = vld [vmem:[#allocation139_spill] sm:$0xff] }
0x1076   :  { %7142 = vpow2.f32 %v4358_v58 }
0x107f   :  { %v7141_v51 = vpop.eup %7140 }
0x1080   :  { %v3903_v2 = vadd.f32 1.0, %v7141_v51  ;;  %v7143_v3 = vpop.eup %7142 }
0x1081   :  { %v3904_v37 = vadd.f32 1.0, %v7143_v3 }
0x1082   :  { %7144 = vrcp.f32 %v3903_v2 }
0x1083   :  { %7146 = vrcp.f32 %v3904_v37 }
0x108c   :  { %v7145_v28 = vpop.eup %7144 }
0x108d   :  { %v3910_v21 = vmul.f32 %v7145_v28, %v3909_v17  ;;  %v7147_v11 = vpop.eup %7146 }
0x108e   :  { %v3913_v57 = vsub.f32 1.0, %v7147_v11  ;;  %v3915_v48 = vmul.f32 %v7147_v11, %v8997_v31  ;;  %v6940_v31 = vpack.c.bf16 %v4099_v4, %v4098_v15 }
0x108f   :  { %v3911_v6 = vadd.f32 %v3910_v21, %v10145_v43 }
0x1091   :  { %7148 = vtanh.f32 %v3911_v6 }
0x109b   :  { %v7149_v36 = vpop.eup %7148 }
0x109c   :  { %v3914_v41 = vmul.f32 %v7149_v36, %v3913_v57 }
0x109e   :  { %v3916_v55 = vadd.f32 %v3915_v48, %v3914_v41 }
0x10a0   :  { %3982 = vmatmul.mubr.f32.vlgmr.msra.gmra.mrb[60].mxu0 %v3916_v55 }
0x10a1   :  { %6905 = vmatpush3.bf16.msra.mxu0 %v7892_v39  ;;  %4870 = vmatprep.mubr.msk.f32.mxu0 %vm7225_vm1, %v9521_v61  ;;  %v10149_v39 = vld [vmem:[#allocation134_spill] sm:$0xff] }
0x10a2   :  { %6906 = vmatprep.subr.bf16.mxu0 %v9580_v46 }
0x10a5   :  { %6908 = vmatpush3.bf16.msra.mxu0 %v10146_v13 }
0x10a6   :  { %6909 = vmatprep.subr.bf16.mxu0 %v9580_v46 }
0x10a9   :  { %6911 = vmatpush3.bf16.msra.mxu0 %v10147_v0 }
0x10aa   :  { %6912 = vmatprep.subr.bf16.mxu0 %v9580_v46 }
0x10ad   :  { %6914 = vmatpush3.bf16.msra.mxu0 %v10148_v56  ;;  %v4186_v56 = vld [vmem:[%s9186_s13 + $0x10] sm:$0xff] }
0x10ae   :  { %6915 = vmatprep.subr.bf16.mxu0 %v9580_v46 }
0x10b0   :  { %v3890_v1 = vpop.f32.mrb[30].mxu1 }
0x10b1   :  { %v9071_v5 = vpop.f32.mrb[31].mxu1  ;;  %6917 = vmatpush3.bf16.msra.mxu0 %v10149_v39 }
0x10b2   :  { %6918 = vmatprep.subr.bf16.mxu0 %v9580_v46 }
0x10b5   :  { %6920 = vmatpush3.bf16.msra.mxu0 %v10150_v53 }
0x10b6   :  { %6921 = vmatprep.subr.bf16.mxu0 %v9580_v46 }
0x10b9   :  { %6923 = vmatpush3.bf16.msra.mxu0 %v10151_v63 }
0x10ba   :  { %6924 = vmatprep.subr.bf16.mxu0 %v9580_v46 }
0x10bd   :  { %6926 = vmatpush3.bf16.msra.mxu0 %v10152_v30 }
0x10be   :  { %6951 = vmatprep.subr.bf16.mxu0 %v9580_v46 }
0x10c0   :  { %4871 = vmatmul.mubr.f32.vlgmr.msra.gmra.mrb[62].mxu0 %v3916_v55 }
0x10c1   :  { %4916 = vmatprep.mubr.msk.f32.mxu0 %vm7225_vm1, %v9521_v61  ;;  %v4094_v61 = vld [vmem:[%s9184_s11 + $0x20] sm:$0xff]  ;;  %6953 = vmatpush3.bf16.msra.mxu0 %v6952_v34 }
0x10c2   :  { %v6934_v40 = vpack.c.bf16 %v4095_v47, %v4094_v61  ;;  %6954 = vmatprep.subr.bf16.mxu0 %v9580_v46 }
0x10c4   :  { %6935 = vmatpush3.bf16.msra.mxu1 %v6934_v40 }
0x10c5   :  { %6936 = vmatprep.subr.bf16.mxu1 %v9580_v46 }
0x10c8   :  { %6938 = vmatpush3.bf16.msra.mxu1 %v6937_v52 }
0x10c9   :  { %6939 = vmatprep.subr.bf16.mxu1 %v9580_v46 }
0x10cc   :  { %6941 = vmatpush3.bf16.msra.mxu1 %v6940_v31 }
0x10cd   :  { %6942 = vmatprep.subr.bf16.mxu1 %v9580_v46 }
0x10d0   :  { %6944 = vmatpush3.bf16.msra.mxu1 %v6943_v23 }
0x10d1   :  { %6945 = vmatprep.subr.bf16.mxu1 %v9580_v46 }
0x10d4   :  { %6947 = vmatpush3.bf16.msra.mxu1 %v6946_v60 }
0x10d5   :  { %6948 = vmatprep.subr.bf16.mxu1 %v9580_v46  ;;  %v4072_v46 = vadd.f32 %v8984_v9, %v9071_v5  ;;  %v4362_v5 = vld [vmem:[%s9185_s12] ss:$0 sm:$0xff] }
0x10d8   :  { %6950 = vmatpush3.bf16.msra.mxu1 %v6949_v16 }
0x1173   :  { %v3983_v49 = vpop.f32.mrb[60].mxu0 }
0x1174   :  { %v3984_v54 = vadd.f32 %v3983_v49, %v9955_v24  ;;  %v3985_v59 = vpop.f32.mrb[61].mxu0 }
0x1175   :  { %v3986_v7 = vadd.f32 %v3985_v59, %v10153_v8 }
0x1176   :  { %v4058_v58 = vadd.f32 %v3984_v54, %v9055_v32 }
0x1177   :  { %v4059_v51 = vadd.f32 %v3986_v7, %v3890_v1 }
0x1178   :  { %v4359_v2 = vmul.f32 -1.442695, %v4058_v58 }
0x1179   :  { %v4360_v3 = vmul.f32 -1.442695, %v4059_v51 }
0x117a   :  { %7150 = vpow2.f32 %v4359_v2 }
0x117b   :  { %7152 = vpow2.f32 %v4360_v3 }
0x1184   :  { %v7151_v37 = vpop.eup %7150 }
0x1185   :  { %v4066_v17 = vadd.f32 1.0, %v7151_v37  ;;  %v7153_v28 = vpop.eup %7152 }
0x1186   :  { %v4067_v21 = vadd.f32 1.0, %v7153_v28 }
0x1187   :  { %7154 = vrcp.f32 %v4066_v17 }
0x1188   :  { %7156 = vrcp.f32 %v4067_v21 }
0x1191   :  { %v7155_v43 = vpop.eup %7154 }
0x1192   :  { %v4073_v24 = vmul.f32 %v7155_v43, %v4072_v46  ;;  %v7157_v36 = vpop.eup %7156 }
0x1193   :  { %v4054_v6 = vpop.f32.mrb[62].mxu0  ;;  %v4076_v41 = vsub.f32 1.0, %v7157_v36  ;;  %v4078_v13 = vmul.f32 %v7157_v36, %v8991_v10 }
0x1194   :  { %v4055_v11 = vadd.f32 %v4054_v6, %v7984_v20  ;;  %v4872_v32 = vpop.f32.mrb[63].mxu0  ;;  %v4187_v20 = vld [vmem:[%s9186_s13 + $0x18] sm:$0xff] }
0x1195   :  { %v6955_v1 = vpack.c.bf16 %v4187_v20, %v4186_v56 }
0x1196   :  { %v4074_v57 = vadd.f32 %v4073_v24, %v4055_v11 }
0x1197   :  { %6956 = vmatpush3.bf16.msra.mxu0 %v6955_v1 }
0x1198   :  { %7158 = vtanh.f32 %v4074_v57 }
0x11a2   :  { %v7159_v48 = vpop.eup %7158 }
0x11a3   :  { %v4077_v55 = vmul.f32 %v7159_v48, %v4076_v41 }
0x11a5   :  { %v4079_v0 = vadd.f32 %v4078_v13, %v4077_v55 }
0x11a7   :  { %v4084_v9 = vsel %vm4361_vm9, %v4079_v0, %v8991_v10  ;;  %v4363_v10 = vld [vmem:[%s9187_s14] ss:$0 sm:$0xff] }
0x11a8   :  { %4906 = vmatmul.mubr.f32.vlgmr.msra.gmra.mrb[32].mxu1 %v4084_v9 }
0x127b   :  { %v4179_v39 = vpop.f32.mrb[32].mxu1 }
0x127c   :  { %v4180_v53 = vadd.f32 %v4362_v5, %v4179_v39  ;;  %v4907_v25 = vpop.f32.mrb[33].mxu1 }
0x127e   :  { %v4183_v63 = vmax.f32 %v4180_v53, 0.0 }
0x1280   :  { %4917 = vmatmul.mubr.msk.f32.vlgmr.msra.gmra.mrb[64].mxu0 %vm103_vm0, %v4183_v63 }
0x1353   :  { %v4264_v30 = vpop.f32.mrb[64].mxu0 }
0x1354   :  { %v4265_v14 = vadd.f32 %v4363_v10, %v4264_v30  ;;  %v4918_v22 = vpop.f32.mrb[65].mxu0 }
0x1356   :  { %v4269_v38 = vsel %vm4268_vm10, %v4265_v14, -inf }
0x1357   :  { %4270 = vmax.xlane.f32.xlu0 %v4269_v38 }
0x13e4   :  { %v4271_v18 = vpop.xlane.xlu0 %4270 }
0x13e5   :  { %v4272_v19 = vsub.f32 %v4265_v14, %v4271_v18 }
0x13e7   :  { %v4273_v35 = vmul.f32 1.442695, %v4272_v19 }
0x13e9   :  { %7160 = vpow2.f32 %v4273_v35 }
0x13f3   :  { %v7161_v61 = vpop.eup %7160 }
0x13f4   :  { %v4275_v47 = vsel %vm4268_vm10, %v7161_v61, 0.0 }
0x13f5   :  { %4276 = vadd.xlane.f32.xlu1 %v4275_v47 }
0x1482   :  { %v4277_v40 = vpop.xlane.xlu1 %4276 }
0x1483   :  { %7162 = vlog2.f32 %v4277_v40 }
0x148d   :  { %v7163_v12 = vpop.eup %7162 }
0x148e   :  { %v4279_v42 = vmul.f32 0.6931472, %v7163_v12 }
0x1490   :  { %v4280_v52 = vsub.f32 %v4272_v19, %v4279_v42 }
0x1492   :  { %4281 = vst.msk [vmem:[%s9188_s15] sm:$0xff] %vm4268_vm10, %v4280_v52 }
0x1493   :  { %4286 = vsyncpa [#allocation5], 1 }
0x1494   :  { %4287 = vsyncpa [#allocation7], 1 }

</bundles_post_ra>
